<compile_context>
chip_gen: v5e
topology: v5e:2x2
jax: 0.10.0
libtpu: 0.0.40
codegen_flags: <defaults>
</compile_context>

<pallas_src>
import functools
import math

import jax
import jax.numpy as jnp
from jax.experimental import pallas as pl
from jax.experimental.pallas import tpu as pltpu

# ---------------- config (small synthetic BERT) ----------------
HIDDEN = 32
N_HEADS = 4
HEAD_DIM = HIDDEN // N_HEADS
N_LAYERS = 2
INTERMEDIATE = 64
VOCAB = 128
MAX_POS = 16
N_CLASSES = 3
LN_EPS = 1e-12
OUT_PAD = 128          # lane-dense padded width for the classifier output

_VMEM = pl.BlockSpec(memory_space=pltpu.MemorySpace.VMEM)


# ---------------- packed parameter layouts (single source of truth) ----------------
def _build_mat_layout():
  layout, off = {}, 0
  for l in range(N_LAYERS):
    for name, rows, cols in ((f"wqkv{l}", 3 * HIDDEN, HIDDEN),
                             (f"wo{l}", HIDDEN, HIDDEN),
                             (f"w1{l}", INTERMEDIATE, HIDDEN),
                             (f"w2{l}", HIDDEN, INTERMEDIATE)):
      layout[name] = (off, rows, cols)
      off += rows
  for name, rows, cols in (("pool_w", HIDDEN, HIDDEN),
                           ("out_w", HIDDEN, OUT_PAD),
                           ("pool_b", 8, HIDDEN),      # bias stored in row 0
                           ("out_b", 8, OUT_PAD)):     # bias stored in row 0
    layout[name] = (off, rows, cols)
    off += rows
  return layout, off


def _build_col_layout():
  entries = [("emb_ln_g", HIDDEN), ("emb_ln_b", HIDDEN)]
  for l in range(N_LAYERS):
    entries += [(f"bqkv{l}", 3 * HIDDEN), (f"bo{l}", HIDDEN),
                (f"ln1_g{l}", HIDDEN), (f"ln1_b{l}", HIDDEN),
                (f"b1{l}", INTERMEDIATE), (f"b2{l}", HIDDEN),
                (f"ln2_g{l}", HIDDEN), (f"ln2_b{l}", HIDDEN)]
  layout, off = {}, 0
  for name, rows in entries:
    layout[name] = (off, rows)
    off += rows
  return layout, off


_MAT_OFF, MAT_ROWS = _build_mat_layout()
_COL_OFF, COL_ROWS = _build_col_layout()


# ---------------- fused forward kernel ----------------
def _bug_predictor_kernel(tok_ref, emb_tab_ref, mpack_ref, cpack_ref, logits_ref,
                          *, batch, seq, out_rows):
  H, dH, nH = HIDDEN, HEAD_DIM, N_HEADS
  bs = batch * seq
  f32 = jnp.float32
  scale = 1.0 / math.sqrt(dH)
  inv_s = 1.0 / seq

  # --- static slices of the packed parameter buffers (free ref views) ---
  def matp(name):
    r0, rows, cols = _MAT_OFF[name]
    return mpack_ref[r0:r0 + rows, 0:cols]

  def matrow(name):                      # single-row biases stored in row 0 of block
    r0, _, cols = _MAT_OFF[name]
    return mpack_ref[r0:r0 + 1, 0:cols]

  def colp(name):                        # (dim, 1) column params for transposed layout
    r0, rows = _COL_OFF[name]
    return cpack_ref[r0:r0 + rows, :]

  # LayerNorm over the hidden (sublane) axis; reductions via a hoisted 1/H ones-row
  # matmul (MXU is idle anyway, lowering is bulletproof).
  ones_h = jnp.full((1, H), 1.0 / H, dtype=f32)

  def layernorm_t(x, g, b):              # x: (H, bs); g, b: (H, 1)
    mu = jnp.dot(ones_h, x, preferred_element_type=f32)          # (1, bs)
    d = x - mu
    var = jnp.dot(ones_h, d * d, preferred_element_type=f32)     # (1, bs)
    return d * jax.lax.rsqrt(var + LN_EPS) * g + b

  ids = tok_ref[0:1, :].astype(f32)      # (1, bs) token ids
  am = tok_ref[1:2, :].astype(f32)       # (1, bs) attention mask (1 = keep, 0 = pad)

  # --- embeddings: one-hot selection matmul (word + position + token-type 0) ---
  vt = VOCAB + MAX_POS
  r = jax.lax.broadcasted_iota(jnp.int32, (vt, bs), 0).astype(f32)
  t = jax.lax.broadcasted_iota(jnp.int32, (vt, bs), 1).astype(f32)
  pos = t - seq * jnp.floor((t + 0.5) * inv_s)                   # t mod seq (exact)
  # word rows (< VOCAB) and position rows (>= VOCAB) never overlap -> just add.
  emb_sel = (r == ids).astype(f32) + (r == (VOCAB + pos)).astype(f32)   # (vt, bs)
  embT = jnp.dot(emb_tab_ref[...], emb_sel, preferred_element_type=f32)  # (H, bs)

  hT = layernorm_t(embT, colp("emb_ln_g"), colp("emb_ln_b"))

  # --- additive attention mask, built in-kernel: block-diagonal batch separation
  #     (-1e9 across examples) + HF-style key padding (-1e4 on padded keys) ---
  tq = jax.lax.broadcasted_iota(jnp.int32, (bs, bs), 0).astype(f32)
  tk = jax.lax.broadcasted_iota(jnp.int32, (bs, bs), 1).astype(f32)
  same = jnp.floor((tq + 0.5) * inv_s) == jnp.floor((tk + 0.5) * inv_s)
  mask2d = jnp.where(same, 0.0, -1e9) + (1.0 - am) * (-1e4)       # (bs, bs)

  for l in range(N_LAYERS):
    # --- self-attention: fused QKV projection, one (3H,H)x(H,bs) matmul ---
    qkvT = jnp.dot(matp(f"wqkv{l}"), hT,
                   preferred_element_type=f32) + colp(f"bqkv{l}")  # (3H, bs)
    ctx_parts = []
    for hh in range(nH):                 # static unroll; sublane-aligned slices
      qT = qkvT[hh * dH:(hh + 1) * dH, :]
      kT = qkvT[H + hh * dH:H + (hh + 1) * dH, :]
      vT = qkvT[2 * H + hh * dH:2 * H + (hh + 1) * dH, :]
      s = jax.lax.dot_general(qT, kT, (((0,), (0,)), ((), ())),
                              preferred_element_type=f32) * scale + mask2d  # (bs,bs)
      s = s - jnp.max(s, axis=-1, keepdims=True)
      p = jnp.exp(s)
      p = p / jnp.sum(p, axis=-1, keepdims=True)                  # exact softmax
      ctx_parts.append(jax.lax.dot_general(vT, p, (((1,), (1,)), ((), ())),
                                           preferred_element_type=f32))     # (dH,bs)
    ctxT = jnp.concatenate(ctx_parts, axis=0)                     # (H, bs) sublane concat
    # single output-projection matmul per layer (review item 1)
    attnT = jnp.dot(matp(f"wo{l}"), ctxT,
                    preferred_element_type=f32) + colp(f"bo{l}")
    hT = layernorm_t(attnT + hT, colp(f"ln1_g{l}"), colp(f"ln1_b{l}"))

    # --- feed-forward ---
    h1T = jnp.dot(matp(f"w1{l}"), hT,
                  preferred_element_type=f32) + colp(f"b1{l}")    # (I, bs)
    h1T = jax.nn.gelu(h1T, approximate=True)
    ffnT = jnp.dot(matp(f"w2{l}"), h1T,
                   preferred_element_type=f32) + colp(f"b2{l}")   # (H, bs)
    hT = layernorm_t(ffnT + hT, colp(f"ln2_g{l}"), colp(f"ln2_b{l}"))

  # --- pooler on [CLS] tokens + classifier ---
  # The selection matmul also transposes back to token-major; rows >= batch are zero.
  rr = jax.lax.broadcasted_iota(jnp.int32, (out_rows, bs), 0)
  cc = jax.lax.broadcasted_iota(jnp.int32, (out_rows, bs), 1)
  sel = jnp.where(jnp.logical_and(cc == rr * seq, rr < batch), 1.0, 0.0).astype(f32)
  cls = jax.lax.dot_general(sel, hT, (((1,), (1,)), ((), ())),
                            preferred_element_type=f32)           # (out_rows, H)
  pooled = jnp.tanh(jnp.dot(cls, matp("pool_w"), preferred_element_type=f32)
                    + matrow("pool_b"))
  # dropout(p=0.2) is identity in eval mode; lane-dense (8,128) unmasked store
  logits_ref[...] = (jnp.dot(pooled, matp("out_w"), preferred_element_type=f32)
                     + matrow("out_b")).astype(logits_ref.dtype)


# ---------------- parameter init (deterministic, synthetic) ----------------
def init_params(key):
  def nrm(k, shape, scale=0.02):
    return scale * jax.random.normal(k, shape, dtype=jnp.float32)

  keys = iter(jax.random.split(key, 16))
  L, H, I = N_LAYERS, HIDDEN, INTERMEDIATE
  return {
      "word_emb": nrm(next(keys), (VOCAB, H)),
      "pos_emb": nrm(next(keys), (MAX_POS, H)),
      "type_emb": nrm(next(keys), (2, H)),
      "emb_ln_g": jnp.ones((H,), jnp.float32),
      "emb_ln_b": jnp.zeros((H,), jnp.float32),
      "wqkv": nrm(next(keys), (L, H, 3 * H)),
      "bqkv": jnp.zeros((L, 3 * H), jnp.float32),
      "wo": nrm(next(keys), (L, H, H)),
      "bo": jnp.zeros((L, H), jnp.float32),
      "ln1_g": jnp.ones((L, H), jnp.float32),
      "ln1_b": jnp.zeros((L, H), jnp.float32),
      "w1": nrm(next(keys), (L, H, I)),
      "b1": jnp.zeros((L, I), jnp.float32),
      "w2": nrm(next(keys), (L, I, H)),
      "b2": jnp.zeros((L, H), jnp.float32),
      "ln2_g": jnp.ones((L, H), jnp.float32),
      "ln2_b": jnp.zeros((L, H), jnp.float32),
      "pooler_w": nrm(next(keys), (H, H)),
      "pooler_b": jnp.zeros((H,), jnp.float32),
      "out_w": nrm(next(keys), (H, N_CLASSES)),
      "out_b": jnp.zeros((N_CLASSES,), jnp.float32),
  }


def pack_params(p):
  """One-time packing of all weights into the kernel's VMEM buffers.

  TODO(synk): at production sizes store these bf16 (halve DMA bytes / VMEM); at
  H=32 the f32 copies are negligible.
  """
  # mat_pack: (MAT_ROWS, 128) f32 -- transposed layer matrices + pooler/classifier.
  def put_mat(mat, name, w):
    r0, _, _ = _MAT_OFF[name]
    w = jnp.asarray(w, jnp.float32)
    return mat.at[r0:r0 + w.shape[0], 0:w.shape[1]].set(w)

  mat = jnp.zeros((MAT_ROWS, 128), jnp.float32)
  for l in range(N_LAYERS):
    mat = put_mat(mat, f"wqkv{l}", p["wqkv"][l].T)     # (3H, H)
    mat = put_mat(mat, f"wo{l}", p["wo"][l].T)         # (H, H)
    mat = put_mat(mat, f"w1{l}", p["w1"][l].T)         # (I, H)
    mat = put_mat(mat, f"w2{l}", p["w2"][l].T)         # (H, I)
  mat = put_mat(mat, "pool_w", p["pooler_w"])          # (H, H), token-major use
  out_w_pad = jnp.zeros((HIDDEN, OUT_PAD), jnp.float32).at[:, :N_CLASSES].set(p["out_w"])
  mat = put_mat(mat, "out_w", out_w_pad)               # (H, 128)
  mat = put_mat(mat, "pool_b", p["pooler_b"][None, :])
  out_b_pad = jnp.zeros((1, OUT_PAD), jnp.float32).at[0, :N_CLASSES].set(p["out_b"])
  mat = put_mat(mat, "out_b", out_b_pad)

  # col_pack: (COL_ROWS, 1) f32 -- biases / LN params as columns for the transposed layout.
  def put_col(col, name, v):
    r0, rows = _COL_OFF[name]
    return col.at[r0:r0 + rows, 0].set(jnp.asarray(v, jnp.float32).reshape(-1))

  col = jnp.zeros((COL_ROWS, 1), jnp.float32)
  col = put_col(col, "emb_ln_g", p["emb_ln_g"])
  col = put_col(col, "emb_ln_b", p["emb_ln_b"])
  for l in range(N_LAYERS):
    col = put_col(col, f"bqkv{l}", p["bqkv"][l])
    col = put_col(col, f"bo{l}", p["bo"][l])
    col = put_col(col, f"ln1_g{l}", p["ln1_g"][l])
    col = put_col(col, f"ln1_b{l}", p["ln1_b"][l])
    col = put_col(col, f"b1{l}", p["b1"][l])
    col = put_col(col, f"b2{l}", p["b2"][l])
    col = put_col(col, f"ln2_g{l}", p["ln2_g"][l])
    col = put_col(col, f"ln2_b{l}", p["ln2_b"][l])

  # emb_tab: (H, VOCAB + MAX_POS) -- word embeddings^T ++ (pos + token-type-0)^T.
  emb_tab = jnp.concatenate(
      [p["word_emb"].T, (p["pos_emb"] + p["type_emb"][0][None, :]).T], axis=1)

  return {"emb_tab": emb_tab, "mat_pack": mat, "col_pack": col}


# ---------------- BugPredictor forward (wrapper is just glue) ----------------
def bug_predictor_forward(packed, input_ids, attention_mask):
  B, S = input_ids.shape
  assert S <= MAX_POS
  bs = B * S
  out_rows = max(8, ((B + 7) // 8) * 8)

  tok = jnp.concatenate([input_ids.reshape(1, bs),
                         attention_mask.reshape(1, bs)], axis=0).astype(jnp.int32)

  kern = functools.partial(_bug_predictor_kernel, batch=B, seq=S, out_rows=out_rows)
  logits_pad = pl.pallas_call(
      kern,
      out_shape=jax.ShapeDtypeStruct((out_rows, OUT_PAD), jnp.float32),
      in_specs=[_VMEM] * 4,
      out_specs=_VMEM,
  )(tok, packed["emb_tab"], packed["mat_pack"], packed["col_pack"])

  return logits_pad[:B, :N_CLASSES]


# ---------------- pure-JAX reference (for numerical validation) ----------------
def reference_forward(params, input_ids, attention_mask):
  B, S = input_ids.shape
  H, dH = HIDDEN, HEAD_DIM
  scale = 1.0 / math.sqrt(dH)

  we = jnp.take(params["word_emb"], input_ids.reshape(-1), axis=0)
  pe = jnp.tile(params["pos_emb"][:S], (B, 1))
  emb = we + pe + params["type_emb"][0][None, :]

  def ln(x, g, b):
    mu = jnp.mean(x, axis=-1, keepdims=True)
    d = x - mu
    var = jnp.mean(d * d, axis=-1, keepdims=True)
    return d * jax.lax.rsqrt(var + LN_EPS) * g + b

  h = ln(emb, params["emb_ln_g"], params["emb_ln_b"])

  batch_of = jnp.repeat(jnp.arange(B), S)
  same = batch_of[:, None] == batch_of[None, :]
  key_pad = (1.0 - attention_mask.reshape(-1).astype(jnp.float32)) * (-1e4)
  mask2d = jnp.where(same, 0.0, -1e9) + key_pad[None, :]

  for l in range(N_LAYERS):
    qkv = h @ params["wqkv"][l] + params["bqkv"][l]
    ctx = []
    for hh in range(N_HEADS):
      q = qkv[:, hh * dH:(hh + 1) * dH]
      k = qkv[:, H + hh * dH:H + (hh + 1) * dH]
      v = qkv[:, 2 * H + hh * dH:2 * H + (hh + 1) * dH]
      s = q @ k.T * scale + mask2d
      p = jax.nn.softmax(s, axis=-1)
      ctx.append(p @ v)
    ctx = jnp.concatenate(ctx, axis=-1)
    h = ln(ctx @ params["wo"][l] + params["bo"][l] + h,
           params["ln1_g"][l], params["ln1_b"][l])
    h1 = jax.nn.gelu(h @ params["w1"][l] + params["b1"][l], approximate=True)
    h = ln(h1 @ params["w2"][l] + params["b2"][l] + h,
           params["ln2_g"][l], params["ln2_b"][l])

  cls = h.reshape(B, S, H)[:, 0, :]
  pooled = jnp.tanh(cls @ params["pooler_w"] + params["pooler_b"])
  return pooled @ params["out_w"] + params["out_b"]


if __name__ == "__main__":
  key = jax.random.PRNGKey(0)
  k_ids, k_params = jax.random.split(key)

  B, S = 2, 8
  input_ids = jax.random.randint(k_ids, (B, S), 0, VOCAB, dtype=jnp.int32)
  attention_mask = jnp.ones((B, S), dtype=jnp.int32)
  attention_mask = attention_mask.at[1, 6:].set(0)   # pad last 2 tokens of example 1

  params = init_params(k_params)
  packed = pack_params(params)

  logits = jax.jit(bug_predictor_forward)(packed, input_ids, attention_mask)
  jax.block_until_ready(logits)
  assert logits.shape == (B, N_CLASSES)

  ref = reference_forward(params, input_ids, attention_mask)
  err = float(jnp.max(jnp.abs(logits - ref)))
  assert err < 2e-3, f"kernel vs reference mismatch: max abs err {err}"

  print("KERNEL_OK")
</pallas_src>

<mosaic_0001>
module attributes {stable_mosaic.version = 11 : i64} {
  func.func @_bug_predictor_kernel(%arg0: memref<2x16xi32, #tpu.memory_space<vmem>>, %arg1: memref<32x144xf32, #tpu.memory_space<vmem>>, %arg2: memref<528x128xf32, #tpu.memory_space<vmem>>, %arg3: memref<768x1xf32, #tpu.memory_space<vmem>>, %arg4: memref<8x128xf32, #tpu.memory_space<vmem>>) attributes {dimension_semantics = [], scalar_prefetch = 0 : i64, scratch_operands = 0 : i64, tpu.core_type = #tpu.core_type<tc>} {
    %cst = arith.constant 3.125000e-02 : f32
    %0 = vector.broadcast %cst : f32 to vector<1x32xf32>
    %c0 = arith.constant 0 : index
    %c0_0 = arith.constant 0 : index
    %1 = vector.load %arg0[%c0, %c0_0] : memref<2x16xi32, #tpu.memory_space<vmem>>, vector<1x16xi32>
    %2 = arith.sitofp %1 : vector<1x16xi32> to vector<1x16xf32>
    %c1 = arith.constant 1 : index
    %c0_1 = arith.constant 0 : index
    %3 = vector.load %arg0[%c1, %c0_1] : memref<2x16xi32, #tpu.memory_space<vmem>>, vector<1x16xi32>
    %4 = arith.sitofp %3 : vector<1x16xi32> to vector<1x16xf32>
    %5 = tpu.iota {dimensions = array<i32: 0>} : vector<144x16xi32>
    %6 = arith.sitofp %5 : vector<144x16xi32> to vector<144x16xf32>
    %7 = tpu.iota {dimensions = array<i32: 1>} : vector<144x16xi32>
    %8 = arith.sitofp %7 : vector<144x16xi32> to vector<144x16xf32>
    %cst_2 = arith.constant 5.000000e-01 : f32
    %9 = vector.broadcast %cst_2 : f32 to vector<144x16xf32>
    %10 = arith.addf %8, %9 : vector<144x16xf32>
    %cst_3 = arith.constant 1.250000e-01 : f32
    %11 = vector.broadcast %cst_3 : f32 to vector<144x16xf32>
    %12 = arith.mulf %10, %11 : vector<144x16xf32>
    %13 = math.floor %12 : vector<144x16xf32>
    %cst_4 = arith.constant 8.000000e+00 : f32
    %14 = vector.broadcast %cst_4 : f32 to vector<144x16xf32>
    %15 = arith.mulf %14, %13 : vector<144x16xf32>
    %16 = arith.subf %8, %15 : vector<144x16xf32>
    %17 = vector.broadcast %2 : vector<1x16xf32> to vector<144x16xf32>
    %18 = arith.cmpf oeq, %6, %17 : vector<144x16xf32>
    %19 = arith.extui %18 : vector<144x16xi1> to vector<144x16xi32>
    %20 = arith.sitofp %19 : vector<144x16xi32> to vector<144x16xf32>
    %cst_5 = arith.constant 1.280000e+02 : f32
    %21 = vector.broadcast %cst_5 : f32 to vector<144x16xf32>
    %22 = arith.addf %21, %16 : vector<144x16xf32>
    %23 = arith.cmpf oeq, %6, %22 : vector<144x16xf32>
    %24 = arith.extui %23 : vector<144x16xi1> to vector<144x16xi32>
    %25 = arith.sitofp %24 : vector<144x16xi32> to vector<144x16xf32>
    %26 = arith.addf %20, %25 : vector<144x16xf32>
    %c0_6 = arith.constant 0 : index
    %c0_7 = arith.constant 0 : index
    %27 = vector.load %arg1[%c0_6, %c0_7] : memref<32x144xf32, #tpu.memory_space<vmem>>, vector<32x144xf32>
    %cst_8 = arith.constant dense<0.000000e+00> : vector<32x16xf32>
    %28 = tpu.matmul %27, %26, %cst_8 {dimension_numbers = #tpu.dot_dimension_numbers<[1], [0], [0], [1], [0, 0, 1, 1], [], []>} : vector<32x144xf32>, vector<144x16xf32>, vector<32x16xf32> -> vector<32x16xf32>
    %c0_9 = arith.constant 0 : index
    %c0_10 = arith.constant 0 : index
    %29 = vector.load %arg3[%c0_9, %c0_10] : memref<768x1xf32, #tpu.memory_space<vmem>>, vector<32x1xf32>
    %c32 = arith.constant 32 : index
    %c0_11 = arith.constant 0 : index
    %30 = vector.load %arg3[%c32, %c0_11] : memref<768x1xf32, #tpu.memory_space<vmem>>, vector<32x1xf32>
    %cst_12 = arith.constant dense<0.000000e+00> : vector<1x16xf32>
    %31 = tpu.matmul %0, %28, %cst_12 {dimension_numbers = #tpu.dot_dimension_numbers<[1], [0], [0], [1], [0, 0, 1, 1], [], []>} : vector<1x32xf32>, vector<32x16xf32>, vector<1x16xf32> -> vector<1x16xf32>
    %32 = vector.broadcast %31 : vector<1x16xf32> to vector<32x16xf32>
    %33 = arith.subf %28, %32 : vector<32x16xf32>
    %34 = arith.mulf %33, %33 : vector<32x16xf32>
    %cst_13 = arith.constant dense<0.000000e+00> : vector<1x16xf32>
    %35 = tpu.matmul %0, %34, %cst_13 {dimension_numbers = #tpu.dot_dimension_numbers<[1], [0], [0], [1], [0, 0, 1, 1], [], []>} : vector<1x32xf32>, vector<32x16xf32>, vector<1x16xf32> -> vector<1x16xf32>
    %cst_14 = arith.constant 9.99999996E-13 : f32
    %36 = vector.broadcast %cst_14 : f32 to vector<1x16xf32>
    %37 = arith.addf %35, %36 : vector<1x16xf32>
    %38 = math.rsqrt %37 : vector<1x16xf32>
    %39 = vector.broadcast %38 : vector<1x16xf32> to vector<32x16xf32>
    %40 = arith.mulf %33, %39 : vector<32x16xf32>
    %41 = vector.broadcast %29 : vector<32x1xf32> to vector<32x16xf32>
    %42 = arith.mulf %40, %41 : vector<32x16xf32>
    %43 = vector.broadcast %30 : vector<32x1xf32> to vector<32x16xf32>
    %44 = arith.addf %42, %43 : vector<32x16xf32>
    %45 = tpu.iota {dimensions = array<i32: 0>} : vector<16x16xi32>
    %46 = arith.sitofp %45 : vector<16x16xi32> to vector<16x16xf32>
    %47 = tpu.iota {dimensions = array<i32: 1>} : vector<16x16xi32>
    %48 = arith.sitofp %47 : vector<16x16xi32> to vector<16x16xf32>
    %cst_15 = arith.constant 5.000000e-01 : f32
    %49 = vector.broadcast %cst_15 : f32 to vector<16x16xf32>
    %50 = arith.addf %46, %49 : vector<16x16xf32>
    %cst_16 = arith.constant 1.250000e-01 : f32
    %51 = vector.broadcast %cst_16 : f32 to vector<16x16xf32>
    %52 = arith.mulf %50, %51 : vector<16x16xf32>
    %53 = math.floor %52 : vector<16x16xf32>
    %cst_17 = arith.constant 5.000000e-01 : f32
    %54 = vector.broadcast %cst_17 : f32 to vector<16x16xf32>
    %55 = arith.addf %48, %54 : vector<16x16xf32>
    %cst_18 = arith.constant 1.250000e-01 : f32
    %56 = vector.broadcast %cst_18 : f32 to vector<16x16xf32>
    %57 = arith.mulf %55, %56 : vector<16x16xf32>
    %58 = math.floor %57 : vector<16x16xf32>
    %59 = arith.cmpf oeq, %53, %58 : vector<16x16xf32>
    %cst_19 = arith.constant 0.000000e+00 : f32
    %cst_20 = arith.constant -1.000000e+09 : f32
    %60 = vector.broadcast %cst_19 : f32 to vector<16x16xf32>
    %61 = vector.broadcast %cst_20 : f32 to vector<16x16xf32>
    %62 = arith.select %59, %60, %61 : vector<16x16xi1>, vector<16x16xf32>
    %cst_21 = arith.constant 1.000000e+00 : f32
    %63 = vector.broadcast %cst_21 : f32 to vector<1x16xf32>
    %64 = arith.subf %63, %4 : vector<1x16xf32>
    %cst_22 = arith.constant -1.000000e+04 : f32
    %65 = vector.broadcast %cst_22 : f32 to vector<1x16xf32>
    %66 = arith.mulf %64, %65 : vector<1x16xf32>
    %67 = vector.broadcast %66 : vector<1x16xf32> to vector<16x16xf32>
    %68 = arith.addf %62, %67 : vector<16x16xf32>
    %c0_23 = arith.constant 0 : index
    %c0_24 = arith.constant 0 : index
    %69 = vector.load %arg2[%c0_23, %c0_24] : memref<528x128xf32, #tpu.memory_space<vmem>>, vector<96x32xf32>
    %cst_25 = arith.constant dense<0.000000e+00> : vector<96x16xf32>
    %70 = tpu.matmul %69, %44, %cst_25 {dimension_numbers = #tpu.dot_dimension_numbers<[1], [0], [0], [1], [0, 0, 1, 1], [], []>} : vector<96x32xf32>, vector<32x16xf32>, vector<96x16xf32> -> vector<96x16xf32>
    %c64 = arith.constant 64 : index
    %c0_26 = arith.constant 0 : index
    %71 = vector.load %arg3[%c64, %c0_26] : memref<768x1xf32, #tpu.memory_space<vmem>>, vector<96x1xf32>
    %72 = vector.broadcast %71 : vector<96x1xf32> to vector<96x16xf32>
    %73 = arith.addf %70, %72 : vector<96x16xf32>
    %74 = vector.extract_strided_slice %73 {offsets = [0, 0], sizes = [8, 16], strides = [1, 1]} : vector<96x16xf32> to vector<8x16xf32>
    %75 = vector.extract_strided_slice %73 {offsets = [32, 0], sizes = [8, 16], strides = [1, 1]} : vector<96x16xf32> to vector<8x16xf32>
    %76 = vector.extract_strided_slice %73 {offsets = [64, 0], sizes = [8, 16], strides = [1, 1]} : vector<96x16xf32> to vector<8x16xf32>
    %cst_27 = arith.constant dense<0.000000e+00> : vector<16x16xf32>
    %77 = tpu.matmul %74, %75, %cst_27 {dimension_numbers = #tpu.dot_dimension_numbers<[0], [0], [1], [1], [0, 1, 1, 1], [], []>} : vector<8x16xf32>, vector<8x16xf32>, vector<16x16xf32> -> vector<16x16xf32>
    %cst_28 = arith.constant 0.353553385 : f32
    %78 = vector.broadcast %cst_28 : f32 to vector<16x16xf32>
    %79 = arith.mulf %77, %78 : vector<16x16xf32>
    %80 = arith.addf %79, %68 : vector<16x16xf32>
    %cst_29 = arith.constant dense<0xFF800000> : vector<16xf32>
    %81 = vector.multi_reduction <maximumf>, %80, %cst_29 [1] : vector<16x16xf32> to vector<16xf32>
    %82 = vector.shape_cast %81 : vector<16xf32> to vector<16x1xf32>
    %83 = vector.broadcast %82 : vector<16x1xf32> to vector<16x16xf32>
    %84 = arith.subf %80, %83 : vector<16x16xf32>
    %85 = math.exp %84 : vector<16x16xf32>
    %cst_30 = arith.constant dense<0.000000e+00> : vector<16xf32>
    %86 = vector.multi_reduction <add>, %85, %cst_30 [1] : vector<16x16xf32> to vector<16xf32>
    %87 = vector.shape_cast %86 : vector<16xf32> to vector<16x1xf32>
    %88 = vector.broadcast %87 : vector<16x1xf32> to vector<16x16xf32>
    %89 = arith.divf %85, %88 : vector<16x16xf32>
    %cst_31 = arith.constant dense<0.000000e+00> : vector<8x16xf32>
    %90 = tpu.matmul %76, %89, %cst_31 {dimension_numbers = #tpu.dot_dimension_numbers<[1], [1], [0], [0], [0, 0, 1, 0], [], []>} : vector<8x16xf32>, vector<16x16xf32>, vector<8x16xf32> -> vector<8x16xf32>
    %91 = vector.extract_strided_slice %73 {offsets = [8, 0], sizes = [8, 16], strides = [1, 1]} : vector<96x16xf32> to vector<8x16xf32>
    %92 = vector.extract_strided_slice %73 {offsets = [40, 0], sizes = [8, 16], strides = [1, 1]} : vector<96x16xf32> to vector<8x16xf32>
    %93 = vector.extract_strided_slice %73 {offsets = [72, 0], sizes = [8, 16], strides = [1, 1]} : vector<96x16xf32> to vector<8x16xf32>
    %cst_32 = arith.constant dense<0.000000e+00> : vector<16x16xf32>
    %94 = tpu.matmul %91, %92, %cst_32 {dimension_numbers = #tpu.dot_dimension_numbers<[0], [0], [1], [1], [0, 1, 1, 1], [], []>} : vector<8x16xf32>, vector<8x16xf32>, vector<16x16xf32> -> vector<16x16xf32>
    %cst_33 = arith.constant 0.353553385 : f32
    %95 = vector.broadcast %cst_33 : f32 to vector<16x16xf32>
    %96 = arith.mulf %94, %95 : vector<16x16xf32>
    %97 = arith.addf %96, %68 : vector<16x16xf32>
    %cst_34 = arith.constant dense<0xFF800000> : vector<16xf32>
    %98 = vector.multi_reduction <maximumf>, %97, %cst_34 [1] : vector<16x16xf32> to vector<16xf32>
    %99 = vector.shape_cast %98 : vector<16xf32> to vector<16x1xf32>
    %100 = vector.broadcast %99 : vector<16x1xf32> to vector<16x16xf32>
    %101 = arith.subf %97, %100 : vector<16x16xf32>
    %102 = math.exp %101 : vector<16x16xf32>
    %cst_35 = arith.constant dense<0.000000e+00> : vector<16xf32>
    %103 = vector.multi_reduction <add>, %102, %cst_35 [1] : vector<16x16xf32> to vector<16xf32>
    %104 = vector.shape_cast %103 : vector<16xf32> to vector<16x1xf32>
    %105 = vector.broadcast %104 : vector<16x1xf32> to vector<16x16xf32>
    %106 = arith.divf %102, %105 : vector<16x16xf32>
    %cst_36 = arith.constant dense<0.000000e+00> : vector<8x16xf32>
    %107 = tpu.matmul %93, %106, %cst_36 {dimension_numbers = #tpu.dot_dimension_numbers<[1], [1], [0], [0], [0, 0, 1, 0], [], []>} : vector<8x16xf32>, vector<16x16xf32>, vector<8x16xf32> -> vector<8x16xf32>
    %108 = vector.extract_strided_slice %73 {offsets = [16, 0], sizes = [8, 16], strides = [1, 1]} : vector<96x16xf32> to vector<8x16xf32>
    %109 = vector.extract_strided_slice %73 {offsets = [48, 0], sizes = [8, 16], strides = [1, 1]} : vector<96x16xf32> to vector<8x16xf32>
    %110 = vector.extract_strided_slice %73 {offsets = [80, 0], sizes = [8, 16], strides = [1, 1]} : vector<96x16xf32> to vector<8x16xf32>
    %cst_37 = arith.constant dense<0.000000e+00> : vector<16x16xf32>
    %111 = tpu.matmul %108, %109, %cst_37 {dimension_numbers = #tpu.dot_dimension_numbers<[0], [0], [1], [1], [0, 1, 1, 1], [], []>} : vector<8x16xf32>, vector<8x16xf32>, vector<16x16xf32> -> vector<16x16xf32>
    %cst_38 = arith.constant 0.353553385 : f32
    %112 = vector.broadcast %cst_38 : f32 to vector<16x16xf32>
    %113 = arith.mulf %111, %112 : vector<16x16xf32>
    %114 = arith.addf %113, %68 : vector<16x16xf32>
    %cst_39 = arith.constant dense<0xFF800000> : vector<16xf32>
    %115 = vector.multi_reduction <maximumf>, %114, %cst_39 [1] : vector<16x16xf32> to vector<16xf32>
    %116 = vector.shape_cast %115 : vector<16xf32> to vector<16x1xf32>
    %117 = vector.broadcast %116 : vector<16x1xf32> to vector<16x16xf32>
    %118 = arith.subf %114, %117 : vector<16x16xf32>
    %119 = math.exp %118 : vector<16x16xf32>
    %cst_40 = arith.constant dense<0.000000e+00> : vector<16xf32>
    %120 = vector.multi_reduction <add>, %119, %cst_40 [1] : vector<16x16xf32> to vector<16xf32>
    %121 = vector.shape_cast %120 : vector<16xf32> to vector<16x1xf32>
    %122 = vector.broadcast %121 : vector<16x1xf32> to vector<16x16xf32>
    %123 = arith.divf %119, %122 : vector<16x16xf32>
    %cst_41 = arith.constant dense<0.000000e+00> : vector<8x16xf32>
    %124 = tpu.matmul %110, %123, %cst_41 {dimension_numbers = #tpu.dot_dimension_numbers<[1], [1], [0], [0], [0, 0, 1, 0], [], []>} : vector<8x16xf32>, vector<16x16xf32>, vector<8x16xf32> -> vector<8x16xf32>
    %125 = vector.extract_strided_slice %73 {offsets = [24, 0], sizes = [8, 16], strides = [1, 1]} : vector<96x16xf32> to vector<8x16xf32>
    %126 = vector.extract_strided_slice %73 {offsets = [56, 0], sizes = [8, 16], strides = [1, 1]} : vector<96x16xf32> to vector<8x16xf32>
    %127 = vector.extract_strided_slice %73 {offsets = [88, 0], sizes = [8, 16], strides = [1, 1]} : vector<96x16xf32> to vector<8x16xf32>
    %cst_42 = arith.constant dense<0.000000e+00> : vector<16x16xf32>
    %128 = tpu.matmul %125, %126, %cst_42 {dimension_numbers = #tpu.dot_dimension_numbers<[0], [0], [1], [1], [0, 1, 1, 1], [], []>} : vector<8x16xf32>, vector<8x16xf32>, vector<16x16xf32> -> vector<16x16xf32>
    %cst_43 = arith.constant 0.353553385 : f32
    %129 = vector.broadcast %cst_43 : f32 to vector<16x16xf32>
    %130 = arith.mulf %128, %129 : vector<16x16xf32>
    %131 = arith.addf %130, %68 : vector<16x16xf32>
    %cst_44 = arith.constant dense<0xFF800000> : vector<16xf32>
    %132 = vector.multi_reduction <maximumf>, %131, %cst_44 [1] : vector<16x16xf32> to vector<16xf32>
    %133 = vector.shape_cast %132 : vector<16xf32> to vector<16x1xf32>
    %134 = vector.broadcast %133 : vector<16x1xf32> to vector<16x16xf32>
    %135 = arith.subf %131, %134 : vector<16x16xf32>
    %136 = math.exp %135 : vector<16x16xf32>
    %cst_45 = arith.constant dense<0.000000e+00> : vector<16xf32>
    %137 = vector.multi_reduction <add>, %136, %cst_45 [1] : vector<16x16xf32> to vector<16xf32>
    %138 = vector.shape_cast %137 : vector<16xf32> to vector<16x1xf32>
    %139 = vector.broadcast %138 : vector<16x1xf32> to vector<16x16xf32>
    %140 = arith.divf %136, %139 : vector<16x16xf32>
    %cst_46 = arith.constant dense<0.000000e+00> : vector<8x16xf32>
    %141 = tpu.matmul %127, %140, %cst_46 {dimension_numbers = #tpu.dot_dimension_numbers<[1], [1], [0], [0], [0, 0, 1, 0], [], []>} : vector<8x16xf32>, vector<16x16xf32>, vector<8x16xf32> -> vector<8x16xf32>
    %142 = tpu.concatenate %90, %107, %124, %141 in 0 : vector<8x16xf32>, vector<8x16xf32>, vector<8x16xf32>, vector<8x16xf32> -> vector<32x16xf32>
    %c96 = arith.constant 96 : index
    %c0_47 = arith.constant 0 : index
    %143 = vector.load %arg2[%c96, %c0_47] : memref<528x128xf32, #tpu.memory_space<vmem>>, vector<32x32xf32>
    %cst_48 = arith.constant dense<0.000000e+00> : vector<32x16xf32>
    %144 = tpu.matmul %143, %142, %cst_48 {dimension_numbers = #tpu.dot_dimension_numbers<[1], [0], [0], [1], [0, 0, 1, 1], [], []>} : vector<32x32xf32>, vector<32x16xf32>, vector<32x16xf32> -> vector<32x16xf32>
    %c160 = arith.constant 160 : index
    %c0_49 = arith.constant 0 : index
    %145 = vector.load %arg3[%c160, %c0_49] : memref<768x1xf32, #tpu.memory_space<vmem>>, vector<32x1xf32>
    %146 = vector.broadcast %145 : vector<32x1xf32> to vector<32x16xf32>
    %147 = arith.addf %144, %146 : vector<32x16xf32>
    %148 = arith.addf %147, %44 : vector<32x16xf32>
    %c192 = arith.constant 192 : index
    %c0_50 = arith.constant 0 : index
    %149 = vector.load %arg3[%c192, %c0_50] : memref<768x1xf32, #tpu.memory_space<vmem>>, vector<32x1xf32>
    %c224 = arith.constant 224 : index
    %c0_51 = arith.constant 0 : index
    %150 = vector.load %arg3[%c224, %c0_51] : memref<768x1xf32, #tpu.memory_space<vmem>>, vector<32x1xf32>
    %cst_52 = arith.constant dense<0.000000e+00> : vector<1x16xf32>
    %151 = tpu.matmul %0, %148, %cst_52 {dimension_numbers = #tpu.dot_dimension_numbers<[1], [0], [0], [1], [0, 0, 1, 1], [], []>} : vector<1x32xf32>, vector<32x16xf32>, vector<1x16xf32> -> vector<1x16xf32>
    %152 = vector.broadcast %151 : vector<1x16xf32> to vector<32x16xf32>
    %153 = arith.subf %148, %152 : vector<32x16xf32>
    %154 = arith.mulf %153, %153 : vector<32x16xf32>
    %cst_53 = arith.constant dense<0.000000e+00> : vector<1x16xf32>
    %155 = tpu.matmul %0, %154, %cst_53 {dimension_numbers = #tpu.dot_dimension_numbers<[1], [0], [0], [1], [0, 0, 1, 1], [], []>} : vector<1x32xf32>, vector<32x16xf32>, vector<1x16xf32> -> vector<1x16xf32>
    %cst_54 = arith.constant 9.99999996E-13 : f32
    %156 = vector.broadcast %cst_54 : f32 to vector<1x16xf32>
    %157 = arith.addf %155, %156 : vector<1x16xf32>
    %158 = math.rsqrt %157 : vector<1x16xf32>
    %159 = vector.broadcast %158 : vector<1x16xf32> to vector<32x16xf32>
    %160 = arith.mulf %153, %159 : vector<32x16xf32>
    %161 = vector.broadcast %149 : vector<32x1xf32> to vector<32x16xf32>
    %162 = arith.mulf %160, %161 : vector<32x16xf32>
    %163 = vector.broadcast %150 : vector<32x1xf32> to vector<32x16xf32>
    %164 = arith.addf %162, %163 : vector<32x16xf32>
    %c128 = arith.constant 128 : index
    %c0_55 = arith.constant 0 : index
    %165 = vector.load %arg2[%c128, %c0_55] : memref<528x128xf32, #tpu.memory_space<vmem>>, vector<64x32xf32>
    %cst_56 = arith.constant dense<0.000000e+00> : vector<64x16xf32>
    %166 = tpu.matmul %165, %164, %cst_56 {dimension_numbers = #tpu.dot_dimension_numbers<[1], [0], [0], [1], [0, 0, 1, 1], [], []>} : vector<64x32xf32>, vector<32x16xf32>, vector<64x16xf32> -> vector<64x16xf32>
    %c256 = arith.constant 256 : index
    %c0_57 = arith.constant 0 : index
    %167 = vector.load %arg3[%c256, %c0_57] : memref<768x1xf32, #tpu.memory_space<vmem>>, vector<64x1xf32>
    %168 = vector.broadcast %167 : vector<64x1xf32> to vector<64x16xf32>
    %169 = arith.addf %166, %168 : vector<64x16xf32>
    %170 = arith.mulf %169, %169 : vector<64x16xf32>
    %171 = arith.mulf %169, %170 : vector<64x16xf32>
    %cst_58 = arith.constant 4.471500e-02 : f32
    %172 = vector.broadcast %cst_58 : f32 to vector<64x16xf32>
    %173 = arith.mulf %172, %171 : vector<64x16xf32>
    %174 = arith.addf %169, %173 : vector<64x16xf32>
    %cst_59 = arith.constant 0.797884583 : f32
    %175 = vector.broadcast %cst_59 : f32 to vector<64x16xf32>
    %176 = arith.mulf %175, %174 : vector<64x16xf32>
    %177 = math.tanh %176 : vector<64x16xf32>
    %cst_60 = arith.constant 1.000000e+00 : f32
    %178 = vector.broadcast %cst_60 : f32 to vector<64x16xf32>
    %179 = arith.addf %178, %177 : vector<64x16xf32>
    %cst_61 = arith.constant 5.000000e-01 : f32
    %180 = vector.broadcast %cst_61 : f32 to vector<64x16xf32>
    %181 = arith.mulf %180, %179 : vector<64x16xf32>
    %182 = arith.mulf %169, %181 : vector<64x16xf32>
    %c192_62 = arith.constant 192 : index
    %c0_63 = arith.constant 0 : index
    %183 = vector.load %arg2[%c192_62, %c0_63] : memref<528x128xf32, #tpu.memory_space<vmem>>, vector<32x64xf32>
    %cst_64 = arith.constant dense<0.000000e+00> : vector<32x16xf32>
    %184 = tpu.matmul %183, %182, %cst_64 {dimension_numbers = #tpu.dot_dimension_numbers<[1], [0], [0], [1], [0, 0, 1, 1], [], []>} : vector<32x64xf32>, vector<64x16xf32>, vector<32x16xf32> -> vector<32x16xf32>
    %c320 = arith.constant 320 : index
    %c0_65 = arith.constant 0 : index
    %185 = vector.load %arg3[%c320, %c0_65] : memref<768x1xf32, #tpu.memory_space<vmem>>, vector<32x1xf32>
    %186 = vector.broadcast %185 : vector<32x1xf32> to vector<32x16xf32>
    %187 = arith.addf %184, %186 : vector<32x16xf32>
    %188 = arith.addf %187, %164 : vector<32x16xf32>
    %c352 = arith.constant 352 : index
    %c0_66 = arith.constant 0 : index
    %189 = vector.load %arg3[%c352, %c0_66] : memref<768x1xf32, #tpu.memory_space<vmem>>, vector<32x1xf32>
    %c384 = arith.constant 384 : index
    %c0_67 = arith.constant 0 : index
    %190 = vector.load %arg3[%c384, %c0_67] : memref<768x1xf32, #tpu.memory_space<vmem>>, vector<32x1xf32>
    %cst_68 = arith.constant dense<0.000000e+00> : vector<1x16xf32>
    %191 = tpu.matmul %0, %188, %cst_68 {dimension_numbers = #tpu.dot_dimension_numbers<[1], [0], [0], [1], [0, 0, 1, 1], [], []>} : vector<1x32xf32>, vector<32x16xf32>, vector<1x16xf32> -> vector<1x16xf32>
    %192 = vector.broadcast %191 : vector<1x16xf32> to vector<32x16xf32>
    %193 = arith.subf %188, %192 : vector<32x16xf32>
    %194 = arith.mulf %193, %193 : vector<32x16xf32>
    %cst_69 = arith.constant dense<0.000000e+00> : vector<1x16xf32>
    %195 = tpu.matmul %0, %194, %cst_69 {dimension_numbers = #tpu.dot_dimension_numbers<[1], [0], [0], [1], [0, 0, 1, 1], [], []>} : vector<1x32xf32>, vector<32x16xf32>, vector<1x16xf32> -> vector<1x16xf32>
    %cst_70 = arith.constant 9.99999996E-13 : f32
    %196 = vector.broadcast %cst_70 : f32 to vector<1x16xf32>
    %197 = arith.addf %195, %196 : vector<1x16xf32>
    %198 = math.rsqrt %197 : vector<1x16xf32>
    %199 = vector.broadcast %198 : vector<1x16xf32> to vector<32x16xf32>
    %200 = arith.mulf %193, %199 : vector<32x16xf32>
    %201 = vector.broadcast %189 : vector<32x1xf32> to vector<32x16xf32>
    %202 = arith.mulf %200, %201 : vector<32x16xf32>
    %203 = vector.broadcast %190 : vector<32x1xf32> to vector<32x16xf32>
    %204 = arith.addf %202, %203 : vector<32x16xf32>
    %c224_71 = arith.constant 224 : index
    %c0_72 = arith.constant 0 : index
    %205 = vector.load %arg2[%c224_71, %c0_72] : memref<528x128xf32, #tpu.memory_space<vmem>>, vector<96x32xf32>
    %cst_73 = arith.constant dense<0.000000e+00> : vector<96x16xf32>
    %206 = tpu.matmul %205, %204, %cst_73 {dimension_numbers = #tpu.dot_dimension_numbers<[1], [0], [0], [1], [0, 0, 1, 1], [], []>} : vector<96x32xf32>, vector<32x16xf32>, vector<96x16xf32> -> vector<96x16xf32>
    %c416 = arith.constant 416 : index
    %c0_74 = arith.constant 0 : index
    %207 = vector.load %arg3[%c416, %c0_74] : memref<768x1xf32, #tpu.memory_space<vmem>>, vector<96x1xf32>
    %208 = vector.broadcast %207 : vector<96x1xf32> to vector<96x16xf32>
    %209 = arith.addf %206, %208 : vector<96x16xf32>
    %210 = vector.extract_strided_slice %209 {offsets = [0, 0], sizes = [8, 16], strides = [1, 1]} : vector<96x16xf32> to vector<8x16xf32>
    %211 = vector.extract_strided_slice %209 {offsets = [32, 0], sizes = [8, 16], strides = [1, 1]} : vector<96x16xf32> to vector<8x16xf32>
    %212 = vector.extract_strided_slice %209 {offsets = [64, 0], sizes = [8, 16], strides = [1, 1]} : vector<96x16xf32> to vector<8x16xf32>
    %cst_75 = arith.constant dense<0.000000e+00> : vector<16x16xf32>
    %213 = tpu.matmul %210, %211, %cst_75 {dimension_numbers = #tpu.dot_dimension_numbers<[0], [0], [1], [1], [0, 1, 1, 1], [], []>} : vector<8x16xf32>, vector<8x16xf32>, vector<16x16xf32> -> vector<16x16xf32>
    %cst_76 = arith.constant 0.353553385 : f32
    %214 = vector.broadcast %cst_76 : f32 to vector<16x16xf32>
    %215 = arith.mulf %213, %214 : vector<16x16xf32>
    %216 = arith.addf %215, %68 : vector<16x16xf32>
    %cst_77 = arith.constant dense<0xFF800000> : vector<16xf32>
    %217 = vector.multi_reduction <maximumf>, %216, %cst_77 [1] : vector<16x16xf32> to vector<16xf32>
    %218 = vector.shape_cast %217 : vector<16xf32> to vector<16x1xf32>
    %219 = vector.broadcast %218 : vector<16x1xf32> to vector<16x16xf32>
    %220 = arith.subf %216, %219 : vector<16x16xf32>
    %221 = math.exp %220 : vector<16x16xf32>
    %cst_78 = arith.constant dense<0.000000e+00> : vector<16xf32>
    %222 = vector.multi_reduction <add>, %221, %cst_78 [1] : vector<16x16xf32> to vector<16xf32>
    %223 = vector.shape_cast %222 : vector<16xf32> to vector<16x1xf32>
    %224 = vector.broadcast %223 : vector<16x1xf32> to vector<16x16xf32>
    %225 = arith.divf %221, %224 : vector<16x16xf32>
    %cst_79 = arith.constant dense<0.000000e+00> : vector<8x16xf32>
    %226 = tpu.matmul %212, %225, %cst_79 {dimension_numbers = #tpu.dot_dimension_numbers<[1], [1], [0], [0], [0, 0, 1, 0], [], []>} : vector<8x16xf32>, vector<16x16xf32>, vector<8x16xf32> -> vector<8x16xf32>
    %227 = vector.extract_strided_slice %209 {offsets = [8, 0], sizes = [8, 16], strides = [1, 1]} : vector<96x16xf32> to vector<8x16xf32>
    %228 = vector.extract_strided_slice %209 {offsets = [40, 0], sizes = [8, 16], strides = [1, 1]} : vector<96x16xf32> to vector<8x16xf32>
    %229 = vector.extract_strided_slice %209 {offsets = [72, 0], sizes = [8, 16], strides = [1, 1]} : vector<96x16xf32> to vector<8x16xf32>
    %cst_80 = arith.constant dense<0.000000e+00> : vector<16x16xf32>
    %230 = tpu.matmul %227, %228, %cst_80 {dimension_numbers = #tpu.dot_dimension_numbers<[0], [0], [1], [1], [0, 1, 1, 1], [], []>} : vector<8x16xf32>, vector<8x16xf32>, vector<16x16xf32> -> vector<16x16xf32>
    %cst_81 = arith.constant 0.353553385 : f32
    %231 = vector.broadcast %cst_81 : f32 to vector<16x16xf32>
    %232 = arith.mulf %230, %231 : vector<16x16xf32>
    %233 = arith.addf %232, %68 : vector<16x16xf32>
    %cst_82 = arith.constant dense<0xFF800000> : vector<16xf32>
    %234 = vector.multi_reduction <maximumf>, %233, %cst_82 [1] : vector<16x16xf32> to vector<16xf32>
    %235 = vector.shape_cast %234 : vector<16xf32> to vector<16x1xf32>
    %236 = vector.broadcast %235 : vector<16x1xf32> to vector<16x16xf32>
    %237 = arith.subf %233, %236 : vector<16x16xf32>
    %238 = math.exp %237 : vector<16x16xf32>
    %cst_83 = arith.constant dense<0.000000e+00> : vector<16xf32>
    %239 = vector.multi_reduction <add>, %238, %cst_83 [1] : vector<16x16xf32> to vector<16xf32>
    %240 = vector.shape_cast %239 : vector<16xf32> to vector<16x1xf32>
    %241 = vector.broadcast %240 : vector<16x1xf32> to vector<16x16xf32>
    %242 = arith.divf %238, %241 : vector<16x16xf32>
    %cst_84 = arith.constant dense<0.000000e+00> : vector<8x16xf32>
    %243 = tpu.matmul %229, %242, %cst_84 {dimension_numbers = #tpu.dot_dimension_numbers<[1], [1], [0], [0], [0, 0, 1, 0], [], []>} : vector<8x16xf32>, vector<16x16xf32>, vector<8x16xf32> -> vector<8x16xf32>
    %244 = vector.extract_strided_slice %209 {offsets = [16, 0], sizes = [8, 16], strides = [1, 1]} : vector<96x16xf32> to vector<8x16xf32>
    %245 = vector.extract_strided_slice %209 {offsets = [48, 0], sizes = [8, 16], strides = [1, 1]} : vector<96x16xf32> to vector<8x16xf32>
    %246 = vector.extract_strided_slice %209 {offsets = [80, 0], sizes = [8, 16], strides = [1, 1]} : vector<96x16xf32> to vector<8x16xf32>
    %cst_85 = arith.constant dense<0.000000e+00> : vector<16x16xf32>
    %247 = tpu.matmul %244, %245, %cst_85 {dimension_numbers = #tpu.dot_dimension_numbers<[0], [0], [1], [1], [0, 1, 1, 1], [], []>} : vector<8x16xf32>, vector<8x16xf32>, vector<16x16xf32> -> vector<16x16xf32>
    %cst_86 = arith.constant 0.353553385 : f32
    %248 = vector.broadcast %cst_86 : f32 to vector<16x16xf32>
    %249 = arith.mulf %247, %248 : vector<16x16xf32>
    %250 = arith.addf %249, %68 : vector<16x16xf32>
    %cst_87 = arith.constant dense<0xFF800000> : vector<16xf32>
    %251 = vector.multi_reduction <maximumf>, %250, %cst_87 [1] : vector<16x16xf32> to vector<16xf32>
    %252 = vector.shape_cast %251 : vector<16xf32> to vector<16x1xf32>
    %253 = vector.broadcast %252 : vector<16x1xf32> to vector<16x16xf32>
    %254 = arith.subf %250, %253 : vector<16x16xf32>
    %255 = math.exp %254 : vector<16x16xf32>
    %cst_88 = arith.constant dense<0.000000e+00> : vector<16xf32>
    %256 = vector.multi_reduction <add>, %255, %cst_88 [1] : vector<16x16xf32> to vector<16xf32>
    %257 = vector.shape_cast %256 : vector<16xf32> to vector<16x1xf32>
    %258 = vector.broadcast %257 : vector<16x1xf32> to vector<16x16xf32>
    %259 = arith.divf %255, %258 : vector<16x16xf32>
    %cst_89 = arith.constant dense<0.000000e+00> : vector<8x16xf32>
    %260 = tpu.matmul %246, %259, %cst_89 {dimension_numbers = #tpu.dot_dimension_numbers<[1], [1], [0], [0], [0, 0, 1, 0], [], []>} : vector<8x16xf32>, vector<16x16xf32>, vector<8x16xf32> -> vector<8x16xf32>
    %261 = vector.extract_strided_slice %209 {offsets = [24, 0], sizes = [8, 16], strides = [1, 1]} : vector<96x16xf32> to vector<8x16xf32>
    %262 = vector.extract_strided_slice %209 {offsets = [56, 0], sizes = [8, 16], strides = [1, 1]} : vector<96x16xf32> to vector<8x16xf32>
    %263 = vector.extract_strided_slice %209 {offsets = [88, 0], sizes = [8, 16], strides = [1, 1]} : vector<96x16xf32> to vector<8x16xf32>
    %cst_90 = arith.constant dense<0.000000e+00> : vector<16x16xf32>
    %264 = tpu.matmul %261, %262, %cst_90 {dimension_numbers = #tpu.dot_dimension_numbers<[0], [0], [1], [1], [0, 1, 1, 1], [], []>} : vector<8x16xf32>, vector<8x16xf32>, vector<16x16xf32> -> vector<16x16xf32>
    %cst_91 = arith.constant 0.353553385 : f32
    %265 = vector.broadcast %cst_91 : f32 to vector<16x16xf32>
    %266 = arith.mulf %264, %265 : vector<16x16xf32>
    %267 = arith.addf %266, %68 : vector<16x16xf32>
    %cst_92 = arith.constant dense<0xFF800000> : vector<16xf32>
    %268 = vector.multi_reduction <maximumf>, %267, %cst_92 [1] : vector<16x16xf32> to vector<16xf32>
    %269 = vector.shape_cast %268 : vector<16xf32> to vector<16x1xf32>
    %270 = vector.broadcast %269 : vector<16x1xf32> to vector<16x16xf32>
    %271 = arith.subf %267, %270 : vector<16x16xf32>
    %272 = math.exp %271 : vector<16x16xf32>
    %cst_93 = arith.constant dense<0.000000e+00> : vector<16xf32>
    %273 = vector.multi_reduction <add>, %272, %cst_93 [1] : vector<16x16xf32> to vector<16xf32>
    %274 = vector.shape_cast %273 : vector<16xf32> to vector<16x1xf32>
    %275 = vector.broadcast %274 : vector<16x1xf32> to vector<16x16xf32>
    %276 = arith.divf %272, %275 : vector<16x16xf32>
    %cst_94 = arith.constant dense<0.000000e+00> : vector<8x16xf32>
    %277 = tpu.matmul %263, %276, %cst_94 {dimension_numbers = #tpu.dot_dimension_numbers<[1], [1], [0], [0], [0, 0, 1, 0], [], []>} : vector<8x16xf32>, vector<16x16xf32>, vector<8x16xf32> -> vector<8x16xf32>
    %278 = tpu.concatenate %226, %243, %260, %277 in 0 : vector<8x16xf32>, vector<8x16xf32>, vector<8x16xf32>, vector<8x16xf32> -> vector<32x16xf32>
    %c320_95 = arith.constant 320 : index
    %c0_96 = arith.constant 0 : index
    %279 = vector.load %arg2[%c320_95, %c0_96] : memref<528x128xf32, #tpu.memory_space<vmem>>, vector<32x32xf32>
    %cst_97 = arith.constant dense<0.000000e+00> : vector<32x16xf32>
    %280 = tpu.matmul %279, %278, %cst_97 {dimension_numbers = #tpu.dot_dimension_numbers<[1], [0], [0], [1], [0, 0, 1, 1], [], []>} : vector<32x32xf32>, vector<32x16xf32>, vector<32x16xf32> -> vector<32x16xf32>
    %c512 = arith.constant 512 : index
    %c0_98 = arith.constant 0 : index
    %281 = vector.load %arg3[%c512, %c0_98] : memref<768x1xf32, #tpu.memory_space<vmem>>, vector<32x1xf32>
    %282 = vector.broadcast %281 : vector<32x1xf32> to vector<32x16xf32>
    %283 = arith.addf %280, %282 : vector<32x16xf32>
    %284 = arith.addf %283, %204 : vector<32x16xf32>
    %c544 = arith.constant 544 : index
    %c0_99 = arith.constant 0 : index
    %285 = vector.load %arg3[%c544, %c0_99] : memref<768x1xf32, #tpu.memory_space<vmem>>, vector<32x1xf32>
    %c576 = arith.constant 576 : index
    %c0_100 = arith.constant 0 : index
    %286 = vector.load %arg3[%c576, %c0_100] : memref<768x1xf32, #tpu.memory_space<vmem>>, vector<32x1xf32>
    %cst_101 = arith.constant dense<0.000000e+00> : vector<1x16xf32>
    %287 = tpu.matmul %0, %284, %cst_101 {dimension_numbers = #tpu.dot_dimension_numbers<[1], [0], [0], [1], [0, 0, 1, 1], [], []>} : vector<1x32xf32>, vector<32x16xf32>, vector<1x16xf32> -> vector<1x16xf32>
    %288 = vector.broadcast %287 : vector<1x16xf32> to vector<32x16xf32>
    %289 = arith.subf %284, %288 : vector<32x16xf32>
    %290 = arith.mulf %289, %289 : vector<32x16xf32>
    %cst_102 = arith.constant dense<0.000000e+00> : vector<1x16xf32>
    %291 = tpu.matmul %0, %290, %cst_102 {dimension_numbers = #tpu.dot_dimension_numbers<[1], [0], [0], [1], [0, 0, 1, 1], [], []>} : vector<1x32xf32>, vector<32x16xf32>, vector<1x16xf32> -> vector<1x16xf32>
    %cst_103 = arith.constant 9.99999996E-13 : f32
    %292 = vector.broadcast %cst_103 : f32 to vector<1x16xf32>
    %293 = arith.addf %291, %292 : vector<1x16xf32>
    %294 = math.rsqrt %293 : vector<1x16xf32>
    %295 = vector.broadcast %294 : vector<1x16xf32> to vector<32x16xf32>
    %296 = arith.mulf %289, %295 : vector<32x16xf32>
    %297 = vector.broadcast %285 : vector<32x1xf32> to vector<32x16xf32>
    %298 = arith.mulf %296, %297 : vector<32x16xf32>
    %299 = vector.broadcast %286 : vector<32x1xf32> to vector<32x16xf32>
    %300 = arith.addf %298, %299 : vector<32x16xf32>
    %c352_104 = arith.constant 352 : index
    %c0_105 = arith.constant 0 : index
    %301 = vector.load %arg2[%c352_104, %c0_105] : memref<528x128xf32, #tpu.memory_space<vmem>>, vector<64x32xf32>
    %cst_106 = arith.constant dense<0.000000e+00> : vector<64x16xf32>
    %302 = tpu.matmul %301, %300, %cst_106 {dimension_numbers = #tpu.dot_dimension_numbers<[1], [0], [0], [1], [0, 0, 1, 1], [], []>} : vector<64x32xf32>, vector<32x16xf32>, vector<64x16xf32> -> vector<64x16xf32>
    %c608 = arith.constant 608 : index
    %c0_107 = arith.constant 0 : index
    %303 = vector.load %arg3[%c608, %c0_107] : memref<768x1xf32, #tpu.memory_space<vmem>>, vector<64x1xf32>
    %304 = vector.broadcast %303 : vector<64x1xf32> to vector<64x16xf32>
    %305 = arith.addf %302, %304 : vector<64x16xf32>
    %306 = arith.mulf %305, %305 : vector<64x16xf32>
    %307 = arith.mulf %305, %306 : vector<64x16xf32>
    %cst_108 = arith.constant 4.471500e-02 : f32
    %308 = vector.broadcast %cst_108 : f32 to vector<64x16xf32>
    %309 = arith.mulf %308, %307 : vector<64x16xf32>
    %310 = arith.addf %305, %309 : vector<64x16xf32>
    %cst_109 = arith.constant 0.797884583 : f32
    %311 = vector.broadcast %cst_109 : f32 to vector<64x16xf32>
    %312 = arith.mulf %311, %310 : vector<64x16xf32>
    %313 = math.tanh %312 : vector<64x16xf32>
    %cst_110 = arith.constant 1.000000e+00 : f32
    %314 = vector.broadcast %cst_110 : f32 to vector<64x16xf32>
    %315 = arith.addf %314, %313 : vector<64x16xf32>
    %cst_111 = arith.constant 5.000000e-01 : f32
    %316 = vector.broadcast %cst_111 : f32 to vector<64x16xf32>
    %317 = arith.mulf %316, %315 : vector<64x16xf32>
    %318 = arith.mulf %305, %317 : vector<64x16xf32>
    %c416_112 = arith.constant 416 : index
    %c0_113 = arith.constant 0 : index
    %319 = vector.load %arg2[%c416_112, %c0_113] : memref<528x128xf32, #tpu.memory_space<vmem>>, vector<32x64xf32>
    %cst_114 = arith.constant dense<0.000000e+00> : vector<32x16xf32>
    %320 = tpu.matmul %319, %318, %cst_114 {dimension_numbers = #tpu.dot_dimension_numbers<[1], [0], [0], [1], [0, 0, 1, 1], [], []>} : vector<32x64xf32>, vector<64x16xf32>, vector<32x16xf32> -> vector<32x16xf32>
    %c672 = arith.constant 672 : index
    %c0_115 = arith.constant 0 : index
    %321 = vector.load %arg3[%c672, %c0_115] : memref<768x1xf32, #tpu.memory_space<vmem>>, vector<32x1xf32>
    %322 = vector.broadcast %321 : vector<32x1xf32> to vector<32x16xf32>
    %323 = arith.addf %320, %322 : vector<32x16xf32>
    %324 = arith.addf %323, %300 : vector<32x16xf32>
    %c704 = arith.constant 704 : index
    %c0_116 = arith.constant 0 : index
    %325 = vector.load %arg3[%c704, %c0_116] : memref<768x1xf32, #tpu.memory_space<vmem>>, vector<32x1xf32>
    %c736 = arith.constant 736 : index
    %c0_117 = arith.constant 0 : index
    %326 = vector.load %arg3[%c736, %c0_117] : memref<768x1xf32, #tpu.memory_space<vmem>>, vector<32x1xf32>
    %cst_118 = arith.constant dense<0.000000e+00> : vector<1x16xf32>
    %327 = tpu.matmul %0, %324, %cst_118 {dimension_numbers = #tpu.dot_dimension_numbers<[1], [0], [0], [1], [0, 0, 1, 1], [], []>} : vector<1x32xf32>, vector<32x16xf32>, vector<1x16xf32> -> vector<1x16xf32>
    %328 = vector.broadcast %327 : vector<1x16xf32> to vector<32x16xf32>
    %329 = arith.subf %324, %328 : vector<32x16xf32>
    %330 = arith.mulf %329, %329 : vector<32x16xf32>
    %cst_119 = arith.constant dense<0.000000e+00> : vector<1x16xf32>
    %331 = tpu.matmul %0, %330, %cst_119 {dimension_numbers = #tpu.dot_dimension_numbers<[1], [0], [0], [1], [0, 0, 1, 1], [], []>} : vector<1x32xf32>, vector<32x16xf32>, vector<1x16xf32> -> vector<1x16xf32>
    %cst_120 = arith.constant 9.99999996E-13 : f32
    %332 = vector.broadcast %cst_120 : f32 to vector<1x16xf32>
    %333 = arith.addf %331, %332 : vector<1x16xf32>
    %334 = math.rsqrt %333 : vector<1x16xf32>
    %335 = vector.broadcast %334 : vector<1x16xf32> to vector<32x16xf32>
    %336 = arith.mulf %329, %335 : vector<32x16xf32>
    %337 = vector.broadcast %325 : vector<32x1xf32> to vector<32x16xf32>
    %338 = arith.mulf %336, %337 : vector<32x16xf32>
    %339 = vector.broadcast %326 : vector<32x1xf32> to vector<32x16xf32>
    %340 = arith.addf %338, %339 : vector<32x16xf32>
    %341 = tpu.iota {dimensions = array<i32: 0>} : vector<8x16xi32>
    %342 = tpu.iota {dimensions = array<i32: 1>} : vector<8x16xi32>
    %c8_i32 = arith.constant 8 : i32
    %343 = vector.broadcast %c8_i32 : i32 to vector<8x16xi32>
    %344 = arith.muli %341, %343 : vector<8x16xi32>
    %345 = arith.cmpi eq, %342, %344 : vector<8x16xi32>
    %c2_i32 = arith.constant 2 : i32
    %346 = vector.broadcast %c2_i32 : i32 to vector<8x16xi32>
    %347 = arith.cmpi slt, %341, %346 : vector<8x16xi32>
    %348 = arith.andi %345, %347 : vector<8x16xi1>
    %cst_121 = arith.constant 1.000000e+00 : f32
    %cst_122 = arith.constant 0.000000e+00 : f32
    %349 = vector.broadcast %cst_121 : f32 to vector<8x16xf32>
    %350 = vector.broadcast %cst_122 : f32 to vector<8x16xf32>
    %351 = arith.select %348, %349, %350 : vector<8x16xi1>, vector<8x16xf32>
    %cst_123 = arith.constant dense<0.000000e+00> : vector<8x32xf32>
    %352 = tpu.matmul %351, %340, %cst_123 {dimension_numbers = #tpu.dot_dimension_numbers<[1], [1], [0], [0], [0, 0, 1, 0], [], []>} : vector<8x16xf32>, vector<32x16xf32>, vector<8x32xf32> -> vector<8x32xf32>
    %c448 = arith.constant 448 : index
    %c0_124 = arith.constant 0 : index
    %353 = vector.load %arg2[%c448, %c0_124] : memref<528x128xf32, #tpu.memory_space<vmem>>, vector<32x32xf32>
    %cst_125 = arith.constant dense<0.000000e+00> : vector<8x32xf32>
    %354 = tpu.matmul %352, %353, %cst_125 {dimension_numbers = #tpu.dot_dimension_numbers<[1], [0], [0], [1], [0, 0, 1, 1], [], []>} : vector<8x32xf32>, vector<32x32xf32>, vector<8x32xf32> -> vector<8x32xf32>
    %c512_126 = arith.constant 512 : index
    %c0_127 = arith.constant 0 : index
    %355 = vector.load %arg2[%c512_126, %c0_127] : memref<528x128xf32, #tpu.memory_space<vmem>>, vector<1x32xf32>
    %356 = vector.broadcast %355 : vector<1x32xf32> to vector<8x32xf32>
    %357 = arith.addf %354, %356 : vector<8x32xf32>
    %358 = math.tanh %357 : vector<8x32xf32>
    %c480 = arith.constant 480 : index
    %c0_128 = arith.constant 0 : index
    %359 = vector.load %arg2[%c480, %c0_128] : memref<528x128xf32, #tpu.memory_space<vmem>>, vector<32x128xf32>
    %cst_129 = arith.constant dense<0.000000e+00> : vector<8x128xf32>
    %360 = tpu.matmul %358, %359, %cst_129 {dimension_numbers = #tpu.dot_dimension_numbers<[1], [0], [0], [1], [0, 0, 1, 1], [], []>} : vector<8x32xf32>, vector<32x128xf32>, vector<8x128xf32> -> vector<8x128xf32>
    %c520 = arith.constant 520 : index
    %c0_130 = arith.constant 0 : index
    %361 = vector.load %arg2[%c520, %c0_130] : memref<528x128xf32, #tpu.memory_space<vmem>>, vector<1x128xf32>
    %362 = vector.broadcast %361 : vector<1x128xf32> to vector<8x128xf32>
    %363 = arith.addf %360, %362 : vector<8x128xf32>
    %c0_131 = arith.constant 0 : index
    %c0_132 = arith.constant 0 : index
    %364 = vector.load %arg4[%c0_131, %c0_132] : memref<8x128xf32, #tpu.memory_space<vmem>>, vector<8x128xf32>
    tpu.vector_store %arg4[%c0_131, %c0_132], %363 {strides = array<i32>} : memref<8x128xf32, #tpu.memory_space<vmem>>, vector<8x128xf32>,
    return
  }
}

</mosaic_0001>

<bundles_post_ra>
// kernel: bug_predictor_forward.1
= control target key start
LH: loop header
LB: loop body
LE: loop exit
PB: predicated region body
PF: predicated region fallthrough
CT: control target
= control target key end

     0   :  { %v21_v0 = vlaneseq  ;;  %v3428_v27 = vmov 0.0   ;;  %s4622_s0 = inlined_call_operand.vmem [shape: s32[2,16], index: 0, kind: input, shape index: {}]   ;;  %s4623_s1 = inlined_call_operand.vmem [shape: f32[32,144], index: 1, kind: input, shape index: {}]   ;;  %s4624_s3 = inlined_call_operand.vmem [shape: f32[768,1], index: 3, kind: input, shape index: {}]   ;;  %s4625_s2 = inlined_call_operand.vmem [shape: f32[528,128], index: 2, kind: input, shape index: {}]   ;;  %s4626_s4 = inlined_call_operand.vmem [shape: f32[8,128], index: 4, kind: output, shape index: {}]  }
   0x1   :  { %v17_v1 = vld [vmem:[%s4622_s0] sm:$0x1] }
   0x2   :  { %v3460_v2 = vshrl.u32 %v21_v0, 7  ;;  %v3462_v3 = vand.u32 127, %v21_v0  ;;  %v18_v4 = vcvt.s32.f32 %v17_v1  ;;  %v19_v1 = vld [vmem:[%s4622_s0 + $0x1] sm:$0x1] }
   0x4   :  { %v37_v5 = vadd.s32 120, %v3460_v2  ;;  %v60_v6 = vcvt.s32.f32 %v3462_v3  ;;  %v36_v7 = vadd.s32 112, %v3460_v2  ;;  %v35_v8 = vadd.s32 104, %v3460_v2 }
   0x5   :  { %v34_v9 = vadd.s32 96, %v3460_v2  ;;  %v33_v10 = vadd.s32 88, %v3460_v2  ;;  %v32_v12 = vadd.s32 80, %v3460_v2  ;;  %v3471_v14 = vperm.slane %v18_v4, 0 }
   0x6   :  { %v61_v11 = vadd.f32 0.5, %v60_v6  ;;  %v55_v13 = vcvt.s32.f32 %v37_v5  ;;  %v54_v15 = vcvt.s32.f32 %v36_v7  ;;  %v53_v17 = vcvt.s32.f32 %v35_v8  ;;  %v199_v7 = vld [vmem:[%s4623_s1 + $0x28] sm:$0xff] }
   0x7   :  { %v52_v18 = vcvt.s32.f32 %v34_v9  ;;  %v51_v19 = vcvt.s32.f32 %v33_v10  ;;  %v31_v20 = vadd.s32 72, %v3460_v2  ;;  %v50_v22 = vcvt.s32.f32 %v32_v12 }
   0x8   :  { %v62_v16 = vmul.f32 0.125, %v61_v11  ;;  %vm82_vm0 = vcmp.eq.f32.partialorder %v55_v13, %v3471_v14  ;;  %vm81_vm1 = vcmp.eq.f32.partialorder %v54_v15, %v3471_v14  ;;  %vm80_vm2 = vcmp.eq.f32.partialorder %v53_v17, %v3471_v14 }
   0x9   :  { %vm79_vm3 = vcmp.eq.f32.partialorder %v52_v18, %v3471_v14  ;;  %v30_v24 = vadd.s32 64, %v3460_v2  ;;  %vm78_vm4 = vcmp.eq.f32.partialorder %v51_v19, %v3471_v14  ;;  %v49_v25 = vcvt.s32.f32 %v31_v20 }
   0xa   :  { %v3474_v21 = vfloor.f32 %v62_v16  ;;  %v3173_v28 = vsel %vm82_vm0, 1.0, %v3428_v27  ;;  %vm77_vm5 = vcmp.eq.f32.partialorder %v50_v22, %v3471_v14  ;;  %v3172_v29 = vsel %vm81_vm1, 1.0, %v3428_v27 }
   0xb   :  { %v3171_v30 = vsel %vm80_vm2, 1.0, %v3428_v27  ;;  %v3170_v31 = vsel %vm79_vm3, 1.0, %v3428_v27  ;;  %v29_v32 = vadd.s32 56, %v3460_v2  ;;  %v3169_v34 = vsel %vm78_vm4, 1.0, %v3428_v27 }
   0xc   :  { %v64_v23 = vmul.f32 8.0, %v3474_v21  ;;  %v48_v35 = vcvt.s32.f32 %v30_v24  ;;  %v28_v36 = vadd.s32 48, %v3460_v2  ;;  %v3168_v37 = vsel %vm77_vm5, 1.0, %v3428_v27 }
   0xd   :  { %vm3495_vm6 = vcmp.eq.f32.partialorder %v49_v25, %v3471_v14  ;;  %v27_v39 = vadd.s32 40, %v3460_v2  ;;  %v26_v40 = vadd.s32 32, %v3460_v2  ;;  %v47_v44 = vcvt.s32.f32 %v29_v32 }
   0xe   :  { %v65_v26 = vsub.f32 %v60_v6, %v64_v23  ;;  %vm3509_vm11 = vcmp.eq.f32.partialorder %v48_v35, %v3471_v14  ;;  %v46_v48 = vcvt.s32.f32 %v28_v36  ;;  %v3167_v51 = vsel %vm3495_vm6, 1.0, %v3428_v27  ;;  %v194_v6 = vld [vmem:[%s4623_s1] sm:$0xff] }
   0xf   :  { %v25_v52 = vadd.s32 24, %v3460_v2  ;;  %vm74_vm0 = vcmp.eq.f32.partialorder %v47_v44, %v3471_v14  ;;  %v45_v54 = vcvt.s32.f32 %v27_v39  ;;  %v44_v55 = vcvt.s32.f32 %v26_v40 }
  0x10   :  { %v3489_v33 = vadd.f32 128.0, %v65_v26  ;;  %v3166_v59 = vsel %vm3509_vm11, 1.0, %v3428_v27  ;;  %vm73_vm2 = vcmp.eq.f32.partialorder %v46_v48, %v3471_v14  ;;  %v3165_v62 = vsel %vm74_vm0, 1.0, %v3428_v27 }
  0x11   :  { %v43_v63 = vcvt.s32.f32 %v25_v52  ;;  %v24_v0 = vadd.s32 16, %v3460_v2  ;;  %vm3539_vm4 = vcmp.eq.f32.partialorder %v45_v54, %v3471_v14  ;;  %vm3544_vm5 = vcmp.eq.f32.partialorder %v44_v55, %v3471_v14 }
  0x12   :  { %vm137_vm7 = vcmp.eq.f32.partialorder %v55_v13, %v3489_v33  ;;  %vm136_vm8 = vcmp.eq.f32.partialorder %v54_v15, %v3489_v33  ;;  %vm135_vm9 = vcmp.eq.f32.partialorder %v53_v17, %v3489_v33  ;;  %vm134_vm10 = vcmp.eq.f32.partialorder %v52_v18, %v3489_v33 }
  0x13   :  { %v3191_v41 = vsel %vm137_vm7, 1.0, %v3428_v27  ;;  %v3190_v42 = vsel %vm136_vm8, 1.0, %v3428_v27  ;;  %v3189_v43 = vsel %vm135_vm9, 1.0, %v3428_v27  ;;  %v3188_v49 = vsel %vm134_vm10, 1.0, %v3428_v27 }
  0x14   :  { %v191_v45 = vadd.f32 %v3191_v41, %v3173_v28  ;;  %v190_v46 = vadd.f32 %v3190_v42, %v3172_v29  ;;  %vm133_vm12 = vcmp.eq.f32.partialorder %v51_v19, %v3489_v33  ;;  %vm132_vm13 = vcmp.eq.f32.partialorder %v50_v22, %v3489_v33 }
  0x15   :  { %vm131_vm14 = vcmp.eq.f32.partialorder %v49_v25, %v3489_v33  ;;  %v189_v50 = vadd.f32 %v3189_v43, %v3171_v30  ;;  %vm130_vm15 = vcmp.eq.f32.partialorder %v48_v35, %v3489_v33  ;;  %v3187_v53 = vsel %vm133_vm12, 1.0, %v3428_v27 }
  0x16   :  { %215 = vmatpush.msra.mxu0 %v191_v45  ;;  %v188_v56 = vadd.f32 %v3188_v49, %v3170_v31  ;;  %v3186_v57 = vsel %vm132_vm13, 1.0, %v3428_v27  ;;  %v3185_v58 = vsel %vm131_vm14, 1.0, %v3428_v27  ;;  %v3184_v60 = vsel %vm130_vm15, 1.0, %v3428_v27 }
  0x17   :  { %vm129_vm1 = vcmp.eq.f32.partialorder %v47_v44, %v3489_v33  ;;  %vm128_vm3 = vcmp.eq.f32.partialorder %v46_v48, %v3489_v33  ;;  %v187_v61 = vadd.f32 %v3187_v53, %v3169_v34  ;;  %v186_v4 = vadd.f32 %v3186_v57, %v3168_v37  ;;  %v273_v34 = vld [vmem:[%s4624_s3] sm:$0xff] }
  0x18   :  { %216 = vmatpush.msra.mxu0 %v190_v46  ;;  %v185_v5 = vadd.f32 %v3185_v58, %v3167_v51  ;;  %v184_v8 = vadd.f32 %v3184_v60, %v3166_v59  ;;  %v3183_v9 = vsel %vm129_vm1, 1.0, %v3428_v27  ;;  %v3164_v10 = vsel %vm73_vm2, 1.0, %v3428_v27 }
  0x19   :  { %v3182_v11 = vsel %vm128_vm3, 1.0, %v3428_v27  ;;  %vm3552_vm6 = vcmp.eq.f32.partialorder %v45_v54, %v3489_v33  ;;  %vm3557_vm7 = vcmp.eq.f32.partialorder %v44_v55, %v3489_v33  ;;  %v20_v15 = vcvt.s32.f32 %v19_v1 }
  0x1a   :  { %217 = vmatpush.msra.mxu0 %v189_v50  ;;  %v23_v16 = vadd.s32 8, %v3460_v2  ;;  %vm70_vm8 = vcmp.eq.f32.partialorder %v43_v63, %v3471_v14  ;;  %vm125_vm9 = vcmp.eq.f32.partialorder %v43_v63, %v3489_v33  ;;  %v42_v17 = vcvt.s32.f32 %v24_v0 }
  0x1b   :  { %v39_v18 = vadd.s32 136, %v3460_v2  ;;  %v3163_v19 = vsel %vm3539_vm4, 1.0, %v3428_v27  ;;  %v3162_v20 = vsel %vm3544_vm5, 1.0, %v3428_v27  ;;  %v407_v23 = vsub.f32 1.0, %v20_v15 }
  0x1c   :  { %218 = vmatpush.msra.mxu0 %v188_v56  ;;  %v41_v22 = vcvt.s32.f32 %v23_v16  ;;  %v183_v24 = vadd.f32 %v3183_v9, %v3165_v62  ;;  %v182_v25 = vadd.f32 %v3182_v11, %v3164_v10  ;;  %v3181_v26 = vsel %vm3552_vm6, 1.0, %v3428_v27  ;;  %v195_v62 = vld [vmem:[%s4623_s1 + $0x8] sm:$0xff]  ;;  %v201_v9 = vld [vmem:[%s4623_s1 + $0x38] sm:$0xff]  ;;  %v200_v10 = vld [vmem:[%s4623_s1 + $0x30] sm:$0xff] }
  0x1d   :  { %v57_v28 = vcvt.s32.f32 %v39_v18  ;;  %v3180_v29 = vsel %vm3557_vm7, 1.0, %v3428_v27  ;;  %v3161_v30 = vsel %vm70_vm8, 1.0, %v3428_v27  ;;  %v3179_v31 = vsel %vm125_vm9, 1.0, %v3428_v27 }
  0x1e   :  { %219 = vmatpush.msra.mxu0 %v187_v61  ;;  %v398_v32 = vadd.f32 0.5, %v41_v22  ;;  %vm3580_vm10 = vcmp.eq.f32.partialorder %v42_v17, %v3471_v14  ;;  %v40_v35 = vcvt.s32.f32 %v3460_v2  ;;  %vm124_vm13 = vcmp.eq.f32.partialorder %v42_v17, %v3489_v33 }
  0x1f   :  { %vm84_vm11 = vcmp.eq.f32.partialorder %v57_v28, %v3471_v14  ;;  %vm139_vm12 = vcmp.eq.f32.partialorder %v57_v28, %v3489_v33  ;;  %v408_v37 = vmul.f32 -10000.0, %v407_v23  ;;  %v181_v39 = vadd.f32 %v3181_v26, %v3163_v19  ;;  %v276_v26 = vld [vmem:[%s4624_s3 + $0x18] sm:$0xff] }
  0x20   :  { %220 = vmatpush.msra.mxu0 %v186_v4  ;;  %v400_v36 = vmul.f32 0.125, %v398_v32  ;;  %v3175_v38 = vsel %vm84_vm11, 1.0, %v3428_v27  ;;  %v180_v40 = vadd.f32 %v3180_v29, %v3162_v20  ;;  %v3193_v41 = vsel %vm139_vm12, 1.0, %v3428_v27  ;;  %v280_v28 = vld [vmem:[%s4624_s3 + $0x38] sm:$0xff]  ;;  %v274_v32 = vld [vmem:[%s4624_s3 + $0x8] sm:$0xff] }
  0x21   :  { %v397_v42 = vadd.f32 0.5, %v40_v35  ;;  %v179_v43 = vadd.f32 %v3179_v31, %v3161_v30  ;;  %v193_v45 = vadd.f32 %v3193_v41, %v3175_v38  ;;  %v38_v46 = vadd.s32 128, %v3460_v2  ;;  %v279_v30 = vld [vmem:[%s4624_s3 + $0x30] sm:$0xff] }
  0x22   :  { %221 = vmatpush.msra.mxu0 %v185_v5  ;;  %v402_v44 = vfloor.f32 %v400_v36  ;;  %v3160_v47 = vsel %vm3580_vm10, 1.0, %v3428_v27  ;;  %v3178_v48 = vsel %vm124_vm13, 1.0, %v3428_v27  ;;  %vm68_vm14 = vcmp.eq.f32.partialorder %v41_v22, %v3471_v14  ;;  %v275_v31 = vld [vmem:[%s4624_s3 + $0x10] sm:$0xff]  ;;  %v277_v36 = vld [vmem:[%s4624_s3 + $0x20] sm:$0xff] }
  0x23   :  { %v399_v49 = vmul.f32 0.125, %v397_v42  ;;  %v409_v50 = vperm.slane %v408_v37, 0  ;;  %258 = vmatpush.msra.mxu1 %v193_v45  ;;  %v56_v51 = vcvt.s32.f32 %v38_v46  ;;  %vm123_vm0 = vcmp.eq.f32.partialorder %v41_v22, %v3489_v33  ;;  %v424_v37 = vld [vmem:[%s4624_s3 + $0x40] sm:$0xff] }
  0x24   :  { %222 = vmatpush.msra.mxu0 %v184_v8  ;;  %vm404_vm15 = vcmp.eq.f32.partialorder %v402_v44, %v3474_v21  ;;  %v3429_v52 = vmov -1e+09   ;;  %vm67_vm1 = vcmp.eq.f32.partialorder %v40_v35, %v3471_v14  ;;  %vm122_vm2 = vcmp.eq.f32.partialorder %v40_v35, %v3489_v33  ;;  %v198_v8 = vld [vmem:[%s4623_s1 + $0x20] sm:$0xff]  ;;  %v278_v35 = vld [vmem:[%s4624_s3 + $0x28] sm:$0xff] }
  0x25   :  { %v406_v53 = vsel %vm404_vm15, 0.0, %v3429_v52  ;;  %v401_v54 = vfloor.f32 %v399_v49  ;;  %vm83_vm3 = vcmp.eq.f32.partialorder %v56_v51, %v3471_v14  ;;  %vm138_vm4 = vcmp.eq.f32.partialorder %v56_v51, %v3489_v33  ;;  %v197_v14 = vld [vmem:[%s4623_s1 + $0x18] sm:$0xff]  ;;  %v196_v33 = vld [vmem:[%s4623_s1 + $0x10] sm:$0xff]  ;;  %v425_v44 = vld [vmem:[%s4624_s3 + $0x48] sm:$0xff] }
  0x26   :  { %223 = vmatpush.msra.mxu0 %v183_v24  ;;  %v3599_v55 = vadd.f32 %v409_v50, %v406_v53  ;;  %v3159_v56 = vsel %vm68_vm14, 1.0, %v3428_v27  ;;  %v3174_v57 = vsel %vm83_vm3, 1.0, %v3428_v27  ;;  %v3192_v58 = vsel %vm138_vm4, 1.0, %v3428_v27  ;;  %v428_v45 = vld [vmem:[%s4624_s3 + $0x60] sm:$0xff] }
  0x27   :  { %vm403_vm5 = vcmp.eq.f32.partialorder %v401_v54, %v3474_v21  ;;  %v3177_v59 = vsel %vm123_vm0, 1.0, %v3428_v27  ;;  %v192_v61 = vadd.f32 %v3192_v58, %v3174_v57  ;;  %vm202_vm6 = vcmask 130048  }
  0x28   :  { %224 = vmatpush.msra.mxu0 %v182_v25  ;;  %v405_v60 = vsel %vm403_vm5, 0.0, %v3429_v52  ;;  %v178_v63 = vadd.f32 %v3178_v48, %v3160_v47  ;;  %v3158_v21 = vsel %vm67_vm1, 1.0, %v3428_v27  ;;  %v3176_v1 = vsel %vm122_vm2, 1.0, %v3428_v27  ;;  %v429_v48 = vld [vmem:[%s4624_s3 + $0x68] sm:$0xff] }
  0x29   :  { %v3614_v0 = vadd.f32 %v409_v50, %v405_v60  ;;  %259 = vmatpush.msra.mxu1 %v192_v61  ;;  %v177_v4 = vadd.f32 %v3177_v59, %v3159_v56  ;;  %v176_v5 = vadd.f32 %v3176_v1, %v3158_v21  ;;  %vm281_vm7 = vcmask 261120  }
  0x2a   :  { %225 = vmatpush.msra.mxu0 %v181_v39  ;;  %3194 = vmatmul.msk.f32.vlgmr.msra.gmra.mxu1 %vm202_vm6, %v195_v62  ;;  %v3430_v25 = vmov 0.03125   ;;  %v3431_v29 = vmov 0   ;;  %vm617_vm11 = vcmask 64512  }
  0x2b   :  { %3315 = vset.pattern.permute.xlu0 %v3431_v29  ;;  %3316 = vset.pattern.permute.xlu1 %v3431_v29 }
  0x2c   :  { %226 = vmatpush.msra.mxu0 %v180_v40  ;;  %366 = vperm.xlu0 %3315, %v276_v26   ;;  %v417_v26 = vld [vmem:[%s4625_s2 + $0x28] sm:$0xff] }
  0x2d   :  { %390 = vperm.xlu1 %3316, %v280_v28   ;;  %3317 = vset.pattern.permute.xlu2 %v3431_v29 }
  0x2e   :  { %227 = vmatpush.msra.mxu0 %v179_v43  ;;  %385 = vperm.xlu2 %3317, %v279_v30  }
  0x30   :  { %228 = vmatpush.msra.mxu0 %v178_v63 }
  0x32   :  { %229 = vmatpush.msra.mxu0 %v177_v4  ;;  %3195 = vmatmul.msk.f32.gmra.mxu1 %vm202_vm6, %v197_v14 }
  0x34   :  { %230 = vmatpush.msra.mxu0 %v176_v5  ;;  %361 = vperm.xlu0 %3315, %v275_v31  }
  0x35   :  { %231 = vmatmul.f32.vlgmr.msra.gmra.mxu0 %v194_v6  ;;  %356 = vperm.xlu1 %3316, %v274_v32  }
  0x36   :  { %351 = vperm.xlu2 %3317, %v273_v34  }
  0x3a   :  { %3196 = vmatmul.msk.f32.gmra.mxu1 %vm202_vm6, %v199_v7 }
  0x3c   :  { %380 = vperm.xlu0 %3315, %v278_v35  }
  0x3d   :  { %234 = vmatmul.f32.gmra.mxu0 %v196_v33  ;;  %375 = vperm.xlu1 %3316, %v277_v36  }
  0x3e   :  { %438 = vperm.xlu2 %3317, %v424_v37  }
  0x42   :  { %3197 = vmatmul.msk.f32.gmra.mxu1 %vm202_vm6, %v201_v9 }
  0x44   :  { %443 = vperm.xlu0 %3315, %v425_v44  }
  0x45   :  { %237 = vmatmul.f32.gmra.mxu0 %v198_v8  ;;  %458 = vperm.xlu1 %3316, %v428_v45  }
  0x46   :  { %463 = vperm.xlu2 %3317, %v429_v48  }
  0x4d   :  { %240 = vmatmul.f32.gmra.mxu0 %v200_v10 }
  0x88   :  { %v386_v61 = vpop.permute.xlu2 %385 }
  0x9e   :  { %v367_v54 = vpop.permute.xlu0 %366 }
  0x9f   :  { %v391_v57 = vpop.permute.xlu1 %390 }
  0xa6   :  { %v362_v63 = vpop.permute.xlu0 %361 }
  0xa7   :  { %v261_v11 = vpop.f32.mrf.mxu1  ;;  %v357_v4 = vpop.permute.xlu1 %356 }
  0xaf   :  { %v264_v13 = vpop.f32.mrf.mxu1 }
  0xb2   :  { %v232_v12 = vpop.f32.mrf.mxu0 }
  0xb3   :  { %v262_v24 = vadd.f32 %v261_v11, %v232_v12  ;;  %v352_v11 = vpop.permute.xlu2 %351 }
  0xb7   :  { %v267_v16 = vpop.f32.mrf.mxu1 }
  0xba   :  { %v235_v15 = vpop.f32.mrf.mxu0 }
  0xbb   :  { %v265_v23 = vadd.f32 %v264_v13, %v235_v15  ;;  %v381_v15 = vpop.permute.xlu0 %380  ;;  %v439_v28 = vpop.permute.xlu2 %438 }
  0xbf   :  { %v270_v18 = vpop.f32.mrf.mxu1 }
  0xc2   :  { %v238_v17 = vpop.f32.mrf.mxu0 }
  0xc3   :  { %v268_v22 = vadd.f32 %v267_v16, %v238_v17  ;;  %v376_v17 = vpop.permute.xlu1 %375  ;;  %v444_v31 = vpop.permute.xlu0 %443 }
  0xca   :  { %v241_v19 = vpop.f32.mrf.mxu0 }
  0xcb   :  { %v271_v20 = vadd.f32 %v270_v18, %v241_v19  ;;  %v412_v19 = vld [vmem:[%s4625_s2] sm:$0xff]  ;;  %v459_v37 = vpop.permute.xlu1 %458 }
  0xcd   :  { %297 = vmatpush.msra.mxu2 %v271_v20 }
  0xcf   :  { %298 = vmatpush.msra.mxu2 %v268_v22 }
  0xd1   :  { %299 = vmatpush.msra.mxu2 %v265_v23 }
  0xd3   :  { %300 = vmatpush.msra.mxu2 %v262_v24 }
  0xd4   :  { %3198 = vmatmul.msk.f32.vlgmr.msra.gmra.mxu2 %vm281_vm7, %v3430_v25 }
 0x157   :  { %v302_v38 = vpop.f32.mrf.mxu2 }
 0x158   :  { %v305_v39 = vperm.slane %v302_v38, 0 }
 0x15a   :  { %v309_v40 = vsub.f32 %v271_v20, %v305_v39  ;;  %v308_v41 = vsub.f32 %v268_v22, %v305_v39  ;;  %v307_v43 = vsub.f32 %v265_v23, %v305_v39  ;;  %v306_v47 = vsub.f32 %v262_v24, %v305_v39  ;;  %v413_v20 = vld [vmem:[%s4625_s2 + $0x8] sm:$0xff]  ;;  %v414_v22 = vld [vmem:[%s4625_s2 + $0x10] sm:$0xff]  ;;  %v415_v23 = vld [vmem:[%s4625_s2 + $0x18] sm:$0xff] }
 0x15b   :  { %v416_v24 = vld [vmem:[%s4625_s2 + $0x20] sm:$0xff] }
 0x15c   :  { %v313_v42 = vmul.f32 %v309_v40, %v309_v40  ;;  %v312_v46 = vmul.f32 %v308_v41, %v308_v41  ;;  %v311_v49 = vmul.f32 %v307_v43, %v307_v43  ;;  %v310_v50 = vmul.f32 %v306_v47, %v306_v47 }
 0x15e   :  { %326 = vmatpush.msra.mxu3 %v313_v42 }
 0x160   :  { %327 = vmatpush.msra.mxu3 %v312_v46 }
 0x162   :  { %328 = vmatpush.msra.mxu3 %v311_v49 }
 0x164   :  { %329 = vmatpush.msra.mxu3 %v310_v50 }
 0x165   :  { %3199 = vmatmul.msk.f32.vlgmr.msra.gmra.mxu3 %vm281_vm7, %v3430_v25 }
 0x1e8   :  { %v331_v51 = vpop.f32.mrf.mxu3 }
 0x1e9   :  { %v332_v52 = vadd.f32 1e-12, %v331_v51 }
 0x1eb   :  { %3320 = vrsqrt.f32 %v332_v52  ;;  %vm340_vm9 = vweird.f32 %v332_v52 }
 0x1f1   :  { %v3321_v53 = vpop.eup %3320 }
 0x1f2   :  { %v335_v56 = vmul.f32 %v3321_v53, %v332_v52  ;;  %vm341_vm8 = vweird.f32 %v3321_v53 }
 0x1f3   :  { %vm342_vm10 = vmor %vm340_vm9, %vm341_vm8 }
 0x1f4   :  { %v336_v58 = vmul.f32 %v3321_v53, %v335_v56 }
 0x1f6   :  { %v337_v59 = vmul.f32 0.5, %v336_v58 }
 0x1f8   :  { %v338_v60 = vsub.f32 1.5, %v337_v59 }
 0x1fa   :  { %v339_v62 = vmul.f32 %v3321_v53, %v338_v60 }
 0x1fc   :  { %v343_v21 = vsel %vm342_vm10, %v3321_v53, %v339_v62 }
 0x1fd   :  { %v344_v1 = vperm.slane %v343_v21, 0  ;;  %v418_v21 = vld [vmem:[%s4625_s2 + $0x30] sm:$0xff] }
 0x1ff   :  { %v346_v5 = vmul.f32 %v344_v1, %v307_v43  ;;  %v348_v6 = vmul.f32 %v344_v1, %v309_v40  ;;  %v347_v14 = vmul.f32 %v344_v1, %v308_v41  ;;  %v345_v33 = vmul.f32 %v344_v1, %v306_v47  ;;  %v464_v40 = vpop.permute.xlu2 %463  ;;  %v419_v1 = vld [vmem:[%s4625_s2 + $0x38] sm:$0xff] }
 0x201   :  { %v372_v7 = vmul.f32 %v367_v54, %v348_v6  ;;  %v371_v8 = vmul.f32 %v362_v63, %v347_v14  ;;  %v370_v9 = vmul.f32 %v357_v4, %v346_v5  ;;  %v369_v12 = vmul.f32 %v352_v11, %v345_v33  ;;  %v420_v4 = vld [vmem:[%s4625_s2 + $0x40] sm:$0xff]  ;;  %v421_v5 = vld [vmem:[%s4625_s2 + $0x48] sm:$0xff] }
 0x203   :  { %v3687_v10 = vadd.f32 %v391_v57, %v372_v7  ;;  %v3690_v13 = vadd.f32 %v386_v61, %v371_v8  ;;  %v3692_v16 = vadd.f32 %v381_v15, %v370_v9  ;;  %v3695_v18 = vadd.f32 %v376_v17, %v369_v12 }
 0x205   :  { %544 = vmatpush.msrb.mxu2 %v3687_v10 }
 0x207   :  { %545 = vmatpush.msrb.mxu2 %v3690_v13 }
 0x209   :  { %546 = vmatpush.msrb.mxu2 %v3692_v16 }
 0x20b   :  { %547 = vmatpush.msrb.mxu2 %v3695_v18 }
 0x20c   :  { %3200 = vmatmul.msk.f32.vlgmr.msrb.gmra.mxu2 %vm281_vm7, %v412_v19 }
 0x214   :  { %3201 = vmatmul.msk.f32.gmra.mxu2 %vm281_vm7, %v413_v20 }
 0x21c   :  { %3202 = vmatmul.msk.f32.gmra.mxu2 %vm281_vm7, %v414_v22 }
 0x224   :  { %3203 = vmatmul.msk.f32.gmra.mxu2 %vm281_vm7, %v415_v23 }
 0x22c   :  { %3204 = vmatmul.msk.f32.gmra.mxu2 %vm281_vm7, %v416_v24 }
 0x234   :  { %3205 = vmatmul.msk.f32.gmra.mxu2 %vm281_vm7, %v417_v26  ;;  %v426_v26 = vld [vmem:[%s4624_s3 + $0x50] sm:$0xff] }
 0x23c   :  { %3206 = vmatmul.msk.f32.gmra.mxu2 %vm281_vm7, %v418_v21 }
 0x244   :  { %3207 = vmatmul.msk.f32.gmra.mxu2 %vm281_vm7, %v419_v1 }
 0x24c   :  { %3208 = vmatmul.msk.f32.gmra.mxu2 %vm281_vm7, %v420_v4 }
 0x254   :  { %3209 = vmatmul.msk.f32.gmra.mxu2 %vm281_vm7, %v421_v5 }
 0x28f   :  { %v549_v29 = vpop.f32.mrf.mxu2 }
 0x290   :  { %v550_v30 = vadd.f32 %v549_v29, %v439_v28  ;;  %v432_v28 = vld [vmem:[%s4624_s3 + $0x80] sm:$0xff]  ;;  %v433_v29 = vld [vmem:[%s4624_s3 + $0x88] sm:$0xff] }
 0x292   :  { %585 = vxpose.xlu0.b32.start.end [1/1] (short) (narrow) %v550_v30, 16 }
 0x297   :  { %v552_v32 = vpop.f32.mrf.mxu2 }
 0x298   :  { %v553_v34 = vadd.f32 %v552_v32, %v444_v31 }
 0x29a   :  { %728 = vxpose.xlu1.b32.start.end [1/1] (short) (narrow) %v553_v34, 16 }
 0x29f   :  { %v3723_v35 = vpop.f32.mrf.mxu2 }
 0x2a7   :  { %v3725_v36 = vpop.f32.mrf.mxu2 }
 0x2af   :  { %v561_v38 = vpop.f32.mrf.mxu2 }
 0x2b0   :  { %v562_v39 = vadd.f32 %v561_v38, %v459_v37  ;;  %v430_v38 = vld [vmem:[%s4624_s3 + $0x70] sm:$0xff] }
 0x2b2   :  { %639 = vmatpush.msrb.mxu3 %v562_v39 }
 0x2b7   :  { %v564_v41 = vpop.f32.mrf.mxu2 }
 0x2b8   :  { %v565_v42 = vadd.f32 %v564_v41, %v464_v40 }
 0x2ba   :  { %781 = vmatpush.msrb.mxu1 %v565_v42 }
 0x336   :  { %v601_v43 = vpop.trf.xlu0 }
 0x337   :  { %3212 = vmatmul.msk.f32.vlgmr.msrb.gmra.mxu3 %vm617_vm11, %v601_v43  ;;  %v3780_v43 = vpop.f32.mrf.mxu2 }
 0x33e   :  { %v744_v44 = vpop.trf.xlu1  ;;  %v602_v45 = vpop.trf.xlu0 }
 0x33f   :  { %3217 = vmatmul.msk.f32.vlgmr.msrb.gmra.mxu1 %vm617_vm11, %v744_v44  ;;  %3213 = vmatmul.msk.f32.gmra.mxu3 %vm617_vm11, %v602_v45 }
 0x346   :  { %v745_v46 = vpop.trf.xlu1 }
 0x347   :  { %3218 = vmatmul.msk.f32.gmra.mxu1 %vm617_vm11, %v745_v46 }
 0x3ba   :  { %v641_v47 = vpop.f32.mrf.mxu3 }
 0x3bb   :  { %v647_v48 = vmul.f32 0.35355338, %v641_v47 }
 0x3bc   :  { %v783_v49 = vpop.f32.mrf.mxu1 }
 0x3bd   :  { %v789_v50 = vmul.f32 0.35355338, %v783_v49  ;;  %v649_v51 = vadd.f32 %v647_v48, %v3614_v0 }
 0x3bf   :  { %v651_v52 = vsel %vm202_vm6, %v649_v51, -inf  ;;  %v791_v53 = vadd.f32 %v789_v50, %v3614_v0 }
 0x3c0   :  { %652 = vmax.xlane.f32.xlu0 %v651_v52 }
 0x3c1   :  { %v793_v54 = vsel %vm202_vm6, %v791_v53, -inf }
 0x3c2   :  { %794 = vmax.xlane.f32.xlu2 %v793_v54  ;;  %v644_v56 = vpop.f32.mrf.mxu3 }
 0x3c3   :  { %v648_v57 = vmul.f32 0.35355338, %v644_v56 }
 0x3c4   :  { %v786_v58 = vpop.f32.mrf.mxu1 }
 0x3c5   :  { %v650_v59 = vadd.f32 %v648_v57, %v3599_v55  ;;  %v790_v61 = vmul.f32 0.35355338, %v786_v58 }
 0x3c7   :  { %v654_v60 = vsel %vm202_vm6, %v650_v59, -inf  ;;  %v792_v62 = vadd.f32 %v790_v61, %v3599_v55 }
 0x3c9   :  { %v796_v63 = vsel %vm202_vm6, %v792_v62, -inf }
 0x3ca   :  { %655 = vmax.xlane.f32.xlu2 %v654_v60 }
 0x3d2   :  { %797 = vmax.xlane.f32.xlu2 %v796_v63 }
 0x433   :  { %v653_v6 = vpop.xlane.xlu0 %652 }
 0x434   :  { %v657_v14 = vsub.f32 %v649_v51, %v653_v6 }
 0x435   :  { %v795_v33 = vpop.xlane.xlu2 %794 }
 0x436   :  { %v659_v7 = vmul.f32 1.442695, %v657_v14  ;;  %v799_v8 = vsub.f32 %v791_v53, %v795_v33  ;;  %v3784_v53 = vpop.f32.mrf.mxu2 }
 0x438   :  { %3322 = vpow2.f32 %v659_v7  ;;  %v801_v9 = vmul.f32 1.442695, %v799_v8 }
 0x43a   :  { %3324 = vpow2.f32 %v801_v9 }
 0x43d   :  { %v656_v11 = vpop.xlane.xlu2 %655 }
 0x43e   :  { %v3755_v12 = vpop.eup %3322  ;;  %v658_v15 = vsub.f32 %v650_v59, %v656_v11  ;;  %v573_v5 = vpop.f32.mrf.mxu2 }
 0x43f   :  { %v663_v17 = vsel %vm202_vm6, %v3755_v12, 0.0 }
 0x440   :  { %v661_v19 = vmul.f32 1.442695, %v658_v15  ;;  %664 = vadd.xlane.f32.xlu2 %v663_v17  ;;  %v3759_v20 = vpop.eup %3324 }
 0x441   :  { %v805_v22 = vsel %vm202_vm6, %v3759_v20, 0.0 }
 0x442   :  { %3326 = vpow2.f32 %v661_v19 }
 0x445   :  { %v798_v30 = vpop.xlane.xlu2 %797 }
 0x446   :  { %v800_v31 = vsub.f32 %v792_v62, %v798_v30 }
 0x448   :  { %v3327_v23 = vpop.eup %3326  ;;  %806 = vadd.xlane.f32.xlu2 %v805_v22  ;;  %v803_v32 = vmul.f32 1.442695, %v800_v31 }
 0x449   :  { %v666_v24 = vsel %vm202_vm6, %v3327_v23, 0.0 }
 0x44a   :  { %667 = vadd.xlane.f32.xlu1 %v666_v24  ;;  %3328 = vpow2.f32 %v803_v32 }
 0x450   :  { %v3773_v34 = vpop.eup %3328 }
 0x451   :  { %v808_v37 = vsel %vm202_vm6, %v3773_v34, 0.0 }
 0x460   :  { %448 = vperm.xlu2 %3317, %v426_v26  }
 0x468   :  { %478 = vperm.xlu2 %3317, %v432_v28  }
 0x470   :  { %483 = vperm.xlu2 %3317, %v433_v29  }
 0x499   :  { %809 = vadd.xlane.f32.xlu2 %v808_v37 }
 0x4b1   :  { %468 = vperm.xlu2 %3317, %v430_v38  }
 0x4b3   :  { %v665_v39 = vpop.xlane.xlu2 %664 }
 0x4b4   :  { %3330 = vrcp.f32 %v665_v39  ;;  %vm674_vm14 = vweird.f32 %v665_v39  ;;  %v680_v57 = vand.u32 2147483648, %v665_v39  ;;  %v678_v59 = vand.u32 2147483647, %v665_v39 }
 0x4b6   :  { %v681_v63 = vor.u32 1.1754944e-38, %v680_v57  ;;  %vm679_vm3 = vcmp.eq.f32.partialorder %v678_v59, 8.507059e+37  ;;  %v1362_v57 = vld [vmem:[%s4624_s3 + $0x138] sm:$0xff] }
 0x4b7   :  { %v1358_v59 = vld [vmem:[%s4624_s3 + $0x118] sm:$0xff] }
 0x4ba   :  { %v3331_v40 = vpop.eup %3330 }
 0x4bb   :  { %v670_v41 = vmul.f32 %v3331_v40, %v665_v39  ;;  %v3782_v44 = vpop.xlane.xlu2 %806  ;;  %vm675_vm12 = vweird.f32 %v3331_v40 }
 0x4bc   :  { %vm676_vm15 = vmor %vm674_vm14, %vm675_vm12  ;;  %vm816_vm8 = vweird.f32 %v3782_v44  ;;  %v822_v29 = vand.u32 2147483648, %v3782_v44  ;;  %v820_v31 = vand.u32 2147483647, %v3782_v44 }
 0x4bd   :  { %v668_v42 = vpop.xlane.xlu1 %667  ;;  %v671_v45 = vsub.f32 1.0, %v670_v41 }
 0x4be   :  { %3332 = vrcp.f32 %v668_v42  ;;  %v695_v50 = vand.u32 2147483648, %v668_v42  ;;  %v693_v52 = vand.u32 2147483647, %v668_v42  ;;  %vm689_vm0 = vweird.f32 %v668_v42 }
 0x4bf   :  { %v672_v47 = vmul.f32 %v3331_v40, %v671_v45  ;;  %3334 = vrcp.f32 %v3782_v44  ;;  %v823_v39 = vor.u32 1.1754944e-38, %v822_v29  ;;  %vm821_vm14 = vcmp.eq.f32.partialorder %v820_v31, 8.507059e+37  ;;  %v431_v31 = vld [vmem:[%s4624_s3 + $0x78] sm:$0xff] }
 0x4c0   :  { %v696_v60 = vor.u32 1.1754944e-38, %v695_v50  ;;  %vm694_vm2 = vcmp.eq.f32.partialorder %v693_v52, 8.507059e+37  ;;  %v1234_v50 = vld [vmem:[%s4624_s3 + $0xf8] sm:$0xff] }
 0x4c1   :  { %v673_v56 = vadd.f32 %v3331_v40, %v672_v47 }
 0x4c3   :  { %v449_v54 = vpop.permute.xlu2 %448  ;;  %v677_v62 = vsel %vm676_vm15, %v3331_v40, %v673_v56 }
 0x4c4   :  { %v3333_v46 = vpop.eup %3332  ;;  %v682_v4 = vsel %vm679_vm3, %v681_v63, %v677_v62  ;;  %v556_v33 = vadd.f32 %v3723_v35, %v449_v54  ;;  %v1232_v54 = vld [vmem:[%s4624_s3 + $0xe8] sm:$0xff]  ;;  %v1617_v62 = vld [vmem:[%s4624_s3 + $0x178] sm:$0xff] }
 0x4c5   :  { %v685_v48 = vmul.f32 %v3333_v46, %v668_v42  ;;  %vm690_vm13 = vweird.f32 %v3333_v46  ;;  %v683_v14 = vmul.f32 %v3755_v12, %v682_v4  ;;  %v3335_v9 = vpop.eup %3334  ;;  %v1615_v63 = vld [vmem:[%s4624_s3 + $0x168] sm:$0xff] }
 0x4c6   :  { %vm691_vm1 = vmor %vm689_vm0, %vm690_vm13  ;;  %v812_v11 = vmul.f32 %v3335_v9, %v3782_v44  ;;  %vm817_vm4 = vweird.f32 %v3335_v9 }
 0x4c7   :  { %v686_v49 = vsub.f32 1.0, %v685_v48  ;;  %vm818_vm9 = vmor %vm816_vm8, %vm817_vm4 }
 0x4c8   :  { %v813_v17 = vsub.f32 1.0, %v812_v11 }
 0x4c9   :  { %v687_v51 = vmul.f32 %v3333_v46, %v686_v49  ;;  %v1161_v49 = vld [vmem:[%s4624_s3 + $0xb8] sm:$0xff] }
 0x4ca   :  { %v814_v22 = vmul.f32 %v3335_v9, %v813_v17  ;;  %v422_v17 = vld [vmem:[%s4625_s2 + $0x50] sm:$0xff] }
 0x4cb   :  { %v688_v58 = vadd.f32 %v3333_v46, %v687_v51  ;;  %v479_v6 = vpop.permute.xlu2 %478  ;;  %v1233_v51 = vld [vmem:[%s4624_s3 + $0xf0] sm:$0xff]  ;;  %3210 = vmatmul.msk.f32.gmra.mxu2 %vm281_vm7, %v422_v17 }
 0x4cc   :  { %v574_v7 = vadd.f32 %v573_v5, %v479_v6  ;;  %v815_v28 = vadd.f32 %v3335_v9, %v814_v22 }
 0x4cd   :  { %v692_v61 = vsel %vm691_vm1, %v3333_v46, %v688_v58  ;;  %v576_v46 = vpop.f32.mrf.mxu2  ;;  %v1360_v58 = vld [vmem:[%s4624_s3 + $0x128] sm:$0xff] }
 0x4ce   :  { %v697_v21 = vsel %vm694_vm2, %v696_v60, %v692_v61  ;;  %v819_v38 = vsel %vm818_vm9, %v3335_v9, %v815_v28  ;;  %v1355_v60 = vld [vmem:[%s4624_s3 + $0x100] sm:$0xff]  ;;  %v1546_v61 = vld [vmem:[%s4624_s3 + $0x150] sm:$0xff] }
 0x4cf   :  { %v698_v1 = vmul.f32 %v3327_v23, %v697_v21  ;;  %v824_v42 = vsel %vm821_vm14, %v823_v39, %v819_v38  ;;  %v1619_v21 = vld [vmem:[%s4624_s3 + $0x188] sm:$0xff] }
 0x4d0   :  { %v825_v47 = vmul.f32 %v3759_v20, %v824_v42  ;;  %v1159_v20 = vld [vmem:[%s4624_s3 + $0xa8] sm:$0xff] }
 0x4d1   :  { %3214 = vmatpush.xpose.msk.msra.mxu3 %vm202_vm6, %v698_v1  ;;  %v1750_v1 = vld [vmem:[%s4624_s3 + $0x1c0] sm:$0xff] }
 0x4d3   :  { %v484_v8 = vpop.permute.xlu2 %483 }
 0x4d4   :  { %v577_v44 = vadd.f32 %v576_v46, %v484_v8 }
 0x4d5   :  { %3215 = vmatpush.xpose.msk.msra.mxu3 %vm202_vm6, %v683_v14 }
 0x4d7   :  { %870 = vxpose.xlu2.b32.start.end [1/1] (short) (narrow) %v556_v33, 16 }
 0x4d8   :  { %3216 = vmatmul.msk.f32.vlgmr.msra.gmra.mxu3 %vm202_vm6, %v574_v7 }
 0x50c   :  { %v810_v15 = vpop.xlane.xlu2 %809 }
 0x50d   :  { %3336 = vrcp.f32 %v810_v15  ;;  %v837_v35 = vand.u32 2147483648, %v810_v15  ;;  %v835_v26 = vand.u32 2147483647, %v810_v15  ;;  %vm831_vm10 = vweird.f32 %v810_v15 }
 0x50f   :  { %v838_v32 = vor.u32 1.1754944e-38, %v837_v35  ;;  %vm836_vm13 = vcmp.eq.f32.partialorder %v835_v26, 8.507059e+37 }
 0x513   :  { %v3337_v19 = vpop.eup %3336 }
 0x514   :  { %v827_v12 = vmul.f32 %v3337_v19, %v810_v15  ;;  %vm832_vm5 = vweird.f32 %v3337_v19  ;;  %v469_v45 = vpop.permute.xlu2 %468 }
 0x515   :  { %vm833_vm12 = vmor %vm831_vm10, %vm832_vm5  ;;  %v568_v48 = vadd.f32 %v3780_v43, %v469_v45  ;;  %v1230_v43 = vld [vmem:[%s4624_s3 + $0xd8] sm:$0xff] }
 0x516   :  { %v828_v23 = vsub.f32 1.0, %v827_v12 }
 0x518   :  { %v829_v24 = vmul.f32 %v3337_v19, %v828_v23 }
 0x51a   :  { %v830_v30 = vadd.f32 %v3337_v19, %v829_v24 }
 0x51c   :  { %v834_v37 = vsel %vm833_vm12, %v3337_v19, %v830_v30 }
 0x51d   :  { %v839_v40 = vsel %vm836_vm13, %v838_v32, %v834_v37  ;;  %v434_v32 = vld [vmem:[%s4624_s3 + $0x90] sm:$0xff] }
 0x51e   :  { %v840_v41 = vmul.f32 %v3773_v34, %v839_v40  ;;  %v427_v34 = vld [vmem:[%s4624_s3 + $0x58] sm:$0xff] }
 0x520   :  { %3219 = vmatpush.xpose.msk.msrb.mxu3 %vm202_vm6, %v840_v41 }
 0x524   :  { %3220 = vmatpush.xpose.msk.msrb.mxu3 %vm202_vm6, %v825_v47 }
 0x527   :  { %3221 = vmatmul.msk.f32.vlgmr.msrb.gmra.mxu3 %vm202_vm6, %v577_v44 }
 0x528   :  { %923 = vmatpush.msra.mxu3 %v568_v48 }
 0x548   :  { %453 = vperm.xlu2 %3317, %v427_v34  }
 0x550   :  { %1179 = vperm.xlu2 %3317, %v1161_v49  }
 0x558   :  { %1169 = vperm.xlu2 %3317, %v1159_v20  }
 0x55b   :  { %v3852_v4 = vpop.f32.mrf.mxu3 }
 0x560   :  { %1316 = vperm.xlu2 %3317, %v1230_v43  }
 0x568   :  { %1340 = vperm.xlu2 %3317, %v1234_v50  }
 0x570   :  { %1335 = vperm.xlu2 %3317, %v1233_v51   ;;  %v886_v52 = vpop.trf.xlu2 }
 0x571   :  { %3222 = vmatmul.msk.f32.vlgmr.msra.gmra.mxu3 %vm617_vm11, %v886_v52 }
 0x578   :  { %1330 = vperm.xlu2 %3317, %v1232_v54   ;;  %v887_v56 = vpop.trf.xlu2 }
 0x579   :  { %3223 = vmatmul.msk.f32.gmra.mxu3 %vm617_vm11, %v887_v56 }
 0x580   :  { %1400 = vperm.xlu2 %3317, %v1362_v57  }
 0x588   :  { %1390 = vperm.xlu2 %3317, %v1360_v58  }
 0x590   :  { %1380 = vperm.xlu2 %3317, %v1358_v59  }
 0x598   :  { %1365 = vperm.xlu2 %3317, %v1355_v60  }
 0x5a0   :  { %1560 = vperm.xlu2 %3317, %v1546_v61  }
 0x5a2   :  { %v454_v37 = vpop.permute.xlu2 %453 }
 0x5a3   :  { %v559_v38 = vadd.f32 %v3725_v36, %v454_v37 }
 0x5a8   :  { %1703 = vperm.xlu2 %3317, %v1617_v62   ;;  %v579_v62 = vpop.f32.mrf.mxu2 }
 0x5aa   :  { %v3854_v5 = vpop.f32.mrf.mxu3 }
 0x5b0   :  { %1693 = vperm.xlu2 %3317, %v1615_v63  }
 0x5b8   :  { %1717 = vperm.xlu2 %3317, %v1619_v21  }
 0x5c0   :  { %1780 = vperm.xlu2 %3317, %v1750_v1  }
 0x5f4   :  { %v925_v6 = vpop.f32.mrf.mxu3 }
 0x5f5   :  { %v931_v14 = vmul.f32 0.35355338, %v925_v6 }
 0x5f7   :  { %v933_v33 = vadd.f32 %v931_v14, %v3614_v0 }
 0x5f9   :  { %v935_v7 = vsel %vm202_vm6, %v933_v33, -inf }
 0x5fa   :  { %936 = vmax.xlane.f32.xlu1 %v935_v7 }
 0x5fc   :  { %v928_v8 = vpop.f32.mrf.mxu3 }
 0x5fd   :  { %v932_v9 = vmul.f32 0.35355338, %v928_v8 }
 0x5ff   :  { %v934_v11 = vadd.f32 %v932_v9, %v3599_v55 }
 0x601   :  { %v938_v15 = vsel %vm202_vm6, %v934_v11, -inf }
 0x602   :  { %939 = vmax.xlane.f32.xlu0 %v938_v15 }
 0x66d   :  { %v937_v19 = vpop.xlane.xlu1 %936 }
 0x66e   :  { %v941_v22 = vsub.f32 %v933_v33, %v937_v19 }
 0x670   :  { %v943_v12 = vmul.f32 1.442695, %v941_v22 }
 0x672   :  { %3338 = vpow2.f32 %v943_v12  ;;  %v1356_v12 = vld [vmem:[%s4624_s3 + $0x108] sm:$0xff] }
 0x675   :  { %v940_v23 = vpop.xlane.xlu0 %939 }
 0x676   :  { %v942_v35 = vsub.f32 %v934_v11, %v940_v23  ;;  %v1544_v23 = vld [vmem:[%s4624_s3 + $0x140] sm:$0xff] }
 0x678   :  { %v3339_v24 = vpop.eup %3338  ;;  %v945_v26 = vmul.f32 1.442695, %v942_v35  ;;  %v1621_v35 = vld [vmem:[%s4624_s3 + $0x198] sm:$0xff] }
 0x679   :  { %v947_v28 = vsel %vm202_vm6, %v3339_v24, 0.0 }
 0x67a   :  { %3340 = vpow2.f32 %v945_v26  ;;  %948 = vadd.xlane.f32.xlu1 %v947_v28  ;;  %v1746_v26 = vld [vmem:[%s4624_s3 + $0x1a0] sm:$0xff]  ;;  %v1751_v28 = vld [vmem:[%s4624_s3 + $0x1c8] sm:$0xff] }
 0x680   :  { %v3341_v29 = vpop.eup %3340 }
 0x681   :  { %v950_v30 = vsel %vm202_vm6, %v3341_v29, 0.0 }
 0x682   :  { %951 = vadd.xlane.f32.xlu0 %v950_v30 }
 0x693   :  { %473 = vperm.xlu1 %3316, %v431_v31  }
 0x696   :  { %488 = vperm.xlu0 %3315, %v434_v32  }
 0x6b8   :  { %1012 = vxpose.xlu0.b32.start.end [1/1] (short) (narrow) %v559_v38, 16 }
 0x6ed   :  { %v949_v39 = vpop.xlane.xlu1 %948 }
 0x6ee   :  { %3342 = vrcp.f32 %v949_v39  ;;  %vm958_vm1 = vweird.f32 %v949_v39  ;;  %v964_v36 = vand.u32 2147483648, %v949_v39  ;;  %v962_v50 = vand.u32 2147483647, %v949_v39 }
 0x6f0   :  { %v965_v57 = vor.u32 1.1754944e-38, %v964_v36  ;;  %vm963_vm8 = vcmp.eq.f32.partialorder %v962_v50, 8.507059e+37  ;;  %v1359_v36 = vld [vmem:[%s4624_s3 + $0x120] sm:$0xff]  ;;  %v1357_v50 = vld [vmem:[%s4624_s3 + $0x110] sm:$0xff] }
 0x6f4   :  { %v3343_v40 = vpop.eup %3342 }
 0x6f5   :  { %v954_v41 = vmul.f32 %v3343_v40, %v949_v39  ;;  %v952_v42 = vpop.xlane.xlu0 %951  ;;  %vm959_vm15 = vweird.f32 %v3343_v40 }
 0x6f6   :  { %3344 = vrcp.f32 %v952_v42  ;;  %v979_v34 = vand.u32 2147483648, %v952_v42  ;;  %v977_v43 = vand.u32 2147483647, %v952_v42  ;;  %vm960_vm2 = vmor %vm958_vm1, %vm959_vm15  ;;  %vm973_vm3 = vweird.f32 %v952_v42 }
 0x6f7   :  { %v955_v45 = vsub.f32 1.0, %v954_v41 }
 0x6f8   :  { %v980_v52 = vor.u32 1.1754944e-38, %v979_v34  ;;  %vm978_vm5 = vcmp.eq.f32.partialorder %v977_v43, 8.507059e+37  ;;  %v1228_v34 = vld [vmem:[%s4624_s3 + $0xc8] sm:$0xff]  ;;  %v1361_v43 = vld [vmem:[%s4624_s3 + $0x130] sm:$0xff] }
 0x6f9   :  { %v956_v47 = vmul.f32 %v3343_v40, %v955_v45 }
 0x6fb   :  { %v957_v49 = vadd.f32 %v3343_v40, %v956_v47  ;;  %v1160_v47 = vld [vmem:[%s4624_s3 + $0xb0] sm:$0xff] }
 0x6fc   :  { %v3345_v46 = vpop.eup %3344 }
 0x6fd   :  { %v969_v48 = vmul.f32 %v3345_v46, %v952_v42  ;;  %vm974_vm0 = vweird.f32 %v3345_v46  ;;  %v961_v56 = vsel %vm960_vm2, %v3343_v40, %v957_v49  ;;  %v1227_v49 = vld [vmem:[%s4624_s3 + $0xc0] sm:$0xff] }
 0x6fe   :  { %vm975_vm4 = vmor %vm973_vm3, %vm974_vm0  ;;  %v966_v60 = vsel %vm963_vm8, %v965_v57, %v961_v56 }
 0x6ff   :  { %v970_v44 = vsub.f32 1.0, %v969_v48  ;;  %v967_v21 = vmul.f32 %v3339_v24, %v966_v60  ;;  %v1614_v24 = vld [vmem:[%s4624_s3 + $0x160] sm:$0xff] }
 0x700   :  { %v1158_v48 = vld [vmem:[%s4624_s3 + $0xa0] sm:$0xff] }
 0x701   :  { %v971_v20 = vmul.f32 %v3345_v46, %v970_v44  ;;  %v1229_v44 = vld [vmem:[%s4624_s3 + $0xd0] sm:$0xff] }
 0x703   :  { %v972_v51 = vadd.f32 %v3345_v46, %v971_v20  ;;  %v1231_v20 = vld [vmem:[%s4624_s3 + $0xe0] sm:$0xff] }
 0x705   :  { %v976_v54 = vsel %vm975_vm4, %v3345_v46, %v972_v51  ;;  %v474_v61 = vpop.permute.xlu1 %473  ;;  %v435_v46 = vld [vmem:[%s4624_s3 + $0x98] sm:$0xff] }
 0x706   :  { %v981_v58 = vsel %vm978_vm5, %v980_v52, %v976_v54  ;;  %v571_v1 = vadd.f32 %v3784_v53, %v474_v61  ;;  %v1547_v51 = vld [vmem:[%s4624_s3 + $0x158] sm:$0xff]  ;;  %v1545_v54 = vld [vmem:[%s4624_s3 + $0x148] sm:$0xff]  ;;  %vm1568_vm5 = vcmask 523264  }
 0x707   :  { %v982_v59 = vmul.f32 %v3341_v29, %v981_v58  ;;  %v423_v29 = vld [vmem:[%s4625_s2 + $0x58] sm:$0xff] }
 0x708   :  { %v489_v63 = vpop.permute.xlu0 %488  ;;  %3211 = vmatmul.msk.f32.gmra.mxu2 %vm281_vm7, %v423_v29 }
 0x709   :  { %3224 = vmatpush.xpose.msk.msra.mxu1 %vm202_vm6, %v982_v59  ;;  %v580_v6 = vadd.f32 %v579_v62, %v489_v63  ;;  %v1616_v59 = vld [vmem:[%s4624_s3 + $0x170] sm:$0xff] }
 0x70d   :  { %3225 = vmatpush.xpose.msk.msra.mxu1 %vm202_vm6, %v967_v21 }
 0x710   :  { %3226 = vmatmul.msk.f32.vlgmr.msra.gmra.mxu1 %vm202_vm6, %v580_v6  ;;  %v1620_v6 = vld [vmem:[%s4624_s3 + $0x190] sm:$0xff] }
 0x711   :  { %1065 = vmatpush.msrb.mxu1 %v571_v1 }
 0x75c   :  { %v1028_v14 = vpop.trf.xlu0 }
 0x75d   :  { %3227 = vmatmul.msk.f32.vlgmr.msrb.gmra.mxu1 %vm617_vm11, %v1028_v14 }
 0x764   :  { %v1029_v33 = vpop.trf.xlu0 }
 0x765   :  { %3228 = vmatmul.msk.f32.gmra.mxu1 %vm617_vm11, %v1029_v33 }
 0x78d   :  { %v3879_v7 = vpop.f32.mrf.mxu1 }
 0x7da   :  { %v1067_v8 = vpop.f32.mrf.mxu1 }
 0x7db   :  { %v1073_v9 = vmul.f32 0.35355338, %v1067_v8 }
 0x7dd   :  { %v1075_v11 = vadd.f32 %v1073_v9, %v3614_v0 }
 0x7df   :  { %v1077_v53 = vsel %vm202_vm6, %v1075_v11, -inf }
 0x7e0   :  { %1078 = vmax.xlane.f32.xlu0 %v1077_v53 }
 0x7e2   :  { %v1070_v15 = vpop.f32.mrf.mxu1 }
 0x7e3   :  { %v1074_v17 = vmul.f32 0.35355338, %v1070_v15 }
 0x7e5   :  { %v1076_v19 = vadd.f32 %v1074_v17, %v3599_v55 }
 0x7e7   :  { %v1080_v22 = vsel %vm202_vm6, %v1076_v19, -inf }
 0x7e8   :  { %1081 = vmax.xlane.f32.xlu1 %v1080_v22 }
 0x7f4   :  { %1370 = vperm.xlu0 %3315, %v1356_v12  }
 0x7fc   :  { %1550 = vperm.xlu0 %3315, %v1544_v23  }
 0x804   :  { %1727 = vperm.xlu0 %3315, %v1621_v35  }
 0x80c   :  { %1688 = vperm.xlu0 %3315, %v1614_v24   ;;  %v1618_v24 = vld [vmem:[%s4624_s3 + $0x180] sm:$0xff] }
 0x814   :  { %1760 = vperm.xlu0 %3315, %v1746_v26  }
 0x81c   :  { %1785 = vperm.xlu0 %3315, %v1751_v28   ;;  %v582_v28 = vpop.f32.mrf.mxu2 }
 0x853   :  { %v1079_v30 = vpop.xlane.xlu0 %1078 }
 0x854   :  { %v1083_v31 = vsub.f32 %v1075_v11, %v1079_v30 }
 0x856   :  { %v1085_v32 = vmul.f32 1.442695, %v1083_v31 }
 0x858   :  { %3346 = vpow2.f32 %v1085_v32  ;;  %v1747_v32 = vld [vmem:[%s4624_s3 + $0x1a8] sm:$0xff] }
 0x85b   :  { %v1082_v37 = vpop.xlane.xlu1 %1081 }
 0x85c   :  { %v1084_v38 = vsub.f32 %v1076_v19, %v1082_v37 }
 0x85e   :  { %v3907_v39 = vpop.eup %3346  ;;  %v1087_v40 = vmul.f32 1.442695, %v1084_v38  ;;  %v1154_v38 = vld [vmem:[%s4625_s2 + $0x60] sm:$0xff] }
 0x85f   :  { %v1089_v41 = vsel %vm202_vm6, %v3907_v39, 0.0 }
 0x860   :  { %3348 = vpow2.f32 %v1087_v40  ;;  %1090 = vadd.xlane.f32.xlu1 %v1089_v41  ;;  %v1180_v41 = vpop.permute.xlu2 %1179 }
 0x866   :  { %v3349_v42 = vpop.eup %3348 }
 0x867   :  { %v1092_v45 = vsel %vm202_vm6, %v3349_v42, 0.0 }
 0x868   :  { %1093 = vadd.xlane.f32.xlu1 %v1092_v45 }
 0x881   :  { %493 = vperm.xlu1 %3316, %v435_v46  }
 0x889   :  { %1174 = vperm.xlu1 %3316, %v1160_v47  }
 0x891   :  { %1164 = vperm.xlu1 %3316, %v1158_v48  }
 0x899   :  { %1311 = vperm.xlu1 %3316, %v1229_v44   ;;  %v1170_v44 = vpop.permute.xlu2 %1169 }
 0x8a1   :  { %1306 = vperm.xlu1 %3316, %v1228_v34  }
 0x8a9   :  { %1301 = vperm.xlu1 %3316, %v1227_v49  }
 0x8b1   :  { %1325 = vperm.xlu1 %3316, %v1231_v20  }
 0x8b9   :  { %1395 = vperm.xlu1 %3316, %v1361_v43  }
 0x8c1   :  { %1385 = vperm.xlu1 %3316, %v1359_v36  }
 0x8c9   :  { %1375 = vperm.xlu1 %3316, %v1357_v50  }
 0x8d1   :  { %1565 = vperm.xlu1 %3316, %v1547_v51  }
 0x8d3   :  { %v1091_v52 = vpop.xlane.xlu1 %1090 }
 0x8d4   :  { %3350 = vrcp.f32 %v1091_v52  ;;  %vm1100_vm12 = vweird.f32 %v1091_v52  ;;  %v1106_v9 = vand.u32 2147483648, %v1091_v52  ;;  %v1104_v53 = vand.u32 2147483647, %v1091_v52 }
 0x8d6   :  { %v1107_v12 = vor.u32 1.1754944e-38, %v1106_v9  ;;  %vm1105_vm1 = vcmp.eq.f32.partialorder %v1104_v53, 8.507059e+37 }
 0x8d9   :  { %1555 = vperm.xlu1 %3316, %v1545_v54  }
 0x8da   :  { %v3351_v56 = vpop.eup %3350 }
 0x8db   :  { %v1096_v57 = vmul.f32 %v3351_v56, %v1091_v52  ;;  %v1094_v58 = vpop.xlane.xlu1 %1093  ;;  %vm1101_vm9 = vweird.f32 %v3351_v56 }
 0x8dc   :  { %3352 = vrcp.f32 %v1094_v58  ;;  %v1121_v1 = vand.u32 2147483648, %v1094_v58  ;;  %v1119_v8 = vand.u32 2147483647, %v1094_v58  ;;  %vm3954_vm13 = vmor %vm1100_vm12, %vm1101_vm9  ;;  %vm1115_vm14 = vweird.f32 %v1094_v58 }
 0x8dd   :  { %v1097_v60 = vsub.f32 1.0, %v1096_v57 }
 0x8de   :  { %v1122_v17 = vor.u32 1.1754944e-38, %v1121_v1  ;;  %vm1120_vm0 = vcmp.eq.f32.partialorder %v1119_v8, 8.507059e+37 }
 0x8df   :  { %v1098_v62 = vmul.f32 %v3351_v56, %v1097_v60 }
 0x8e1   :  { %1698 = vperm.xlu1 %3316, %v1616_v59   ;;  %v1099_v14 = vadd.f32 %v3351_v56, %v1098_v62 }
 0x8e2   :  { %v3353_v61 = vpop.eup %3352 }
 0x8e3   :  { %v1111_v63 = vmul.f32 %v3353_v61, %v1094_v58  ;;  %vm1116_vm10 = vweird.f32 %v3353_v61  ;;  %v1103_v22 = vsel %vm3954_vm13, %v3351_v56, %v1099_v14 }
 0x8e4   :  { %vm1117_vm15 = vmor %vm1115_vm14, %vm1116_vm10  ;;  %v1108_v26 = vsel %vm1105_vm1, %v1107_v12, %v1103_v22 }
 0x8e5   :  { %v1112_v21 = vsub.f32 1.0, %v1111_v63  ;;  %v1109_v29 = vmul.f32 %v3907_v39, %v1108_v26  ;;  %v1155_v39 = vld [vmem:[%s4625_s2 + $0x68] sm:$0xff] }
 0x8e7   :  { %v1113_v33 = vmul.f32 %v3353_v61, %v1112_v21 }
 0x8e9   :  { %v1114_v15 = vadd.f32 %v3353_v61, %v1113_v33  ;;  %1722 = vperm.xlu1 %3316, %v1620_v6  }
 0x8eb   :  { %v1118_v19 = vsel %vm1117_vm15, %v3353_v61, %v1114_v15 }
 0x8ec   :  { %v1123_v23 = vsel %vm1120_vm0, %v1122_v17, %v1118_v19 }
 0x8ed   :  { %v1124_v35 = vmul.f32 %v3349_v42, %v1123_v23 }
 0x8ef   :  { %3229 = vmatpush.xpose.msk.msra.mxu1 %vm202_vm6, %v1124_v35 }
 0x8f1   :  { %1712 = vperm.xlu1 %3316, %v1618_v24  }
 0x8f3   :  { %3230 = vmatpush.xpose.msk.msra.mxu1 %vm202_vm6, %v1109_v29  ;;  %v494_v30 = vpop.permute.xlu1 %493 }
 0x8f4   :  { %v583_v31 = vadd.f32 %v582_v28, %v494_v30 }
 0x8f6   :  { %3231 = vmatmul.msk.f32.vlgmr.msra.gmra.mxu1 %vm202_vm6, %v583_v31 }
 0x8f9   :  { %1765 = vperm.xlu1 %3316, %v1747_v32  }
 0x8fb   :  { %v1175_v45 = vpop.permute.xlu1 %1174 }
 0x903   :  { %v1165_v20 = vpop.permute.xlu1 %1164 }
 0x90b   :  { %v1312_v63 = vpop.permute.xlu1 %1311 }
 0x913   :  { %v1307_v14 = vpop.permute.xlu1 %1306 }
 0x91b   :  { %v1302_v19 = vpop.permute.xlu1 %1301 }
 0x973   :  { %v1151_v37 = vpop.f32.mrf.mxu1 }
 0x974   :  { %1206 = vmatpush.msrb.mxu3 %v1151_v37 }
 0x976   :  { %1207 = vmatpush.msrb.mxu3 %v3879_v7  ;;  %v1156_v7 = vld [vmem:[%s4625_s2 + $0x70] sm:$0xff] }
 0x978   :  { %1208 = vmatpush.msrb.mxu3 %v3854_v5  ;;  %v1157_v5 = vld [vmem:[%s4625_s2 + $0x78] sm:$0xff] }
 0x97a   :  { %1209 = vmatpush.msrb.mxu3 %v3852_v4 }
 0x97b   :  { %3232 = vmatmul.msk.f32.vlgmr.msrb.gmra.mxu3 %vm281_vm7, %v1154_v38  ;;  %v1326_v38 = vpop.permute.xlu1 %1325 }
 0x983   :  { %3233 = vmatmul.msk.f32.gmra.mxu3 %vm281_vm7, %v1155_v39 }
 0x98b   :  { %3234 = vmatmul.msk.f32.gmra.mxu3 %vm281_vm7, %v1156_v7  ;;  %v1347_v7 = vld [vmem:[%s4625_s2 + $0x80] sm:$0xff] }
 0x993   :  { %3235 = vmatmul.msk.f32.gmra.mxu3 %vm281_vm7, %v1157_v5  ;;  %v1348_v5 = vld [vmem:[%s4625_s2 + $0x88] sm:$0xff] }
 0x9fe   :  { %v1211_v4 = vpop.f32.mrf.mxu3 }
 0x9ff   :  { %v1212_v43 = vadd.f32 %v1211_v4, %v1165_v20  ;;  %v1349_v4 = vld [vmem:[%s4625_s2 + $0x90] sm:$0xff]  ;;  %v1396_v20 = vpop.permute.xlu1 %1395 }
 0xa01   :  { %v1223_v51 = vadd.f32 %v1212_v43, %v3695_v18  ;;  %v1317_v18 = vpop.permute.xlu2 %1316 }
 0xa06   :  { %v1214_v40 = vpop.f32.mrf.mxu3 }
 0xa07   :  { %v1215_v34 = vadd.f32 %v1214_v40, %v1170_v44  ;;  %v1350_v40 = vld [vmem:[%s4625_s2 + $0x98] sm:$0xff] }
 0xa09   :  { %v1224_v50 = vadd.f32 %v1215_v34, %v3692_v16  ;;  %v1341_v1 = vpop.permute.xlu2 %1340 }
 0xa0e   :  { %v1217_v42 = vpop.f32.mrf.mxu3 }
 0xa0f   :  { %v1218_v47 = vadd.f32 %v1217_v42, %v1175_v45  ;;  %v1352_v42 = vld [vmem:[%s4625_s2 + $0xa8] sm:$0xff]  ;;  %v1353_v45 = vld [vmem:[%s4625_s2 + $0xb0] sm:$0xff] }
 0xa11   :  { %v1225_v36 = vadd.f32 %v1218_v47, %v3690_v13  ;;  %v1336_v53 = vpop.permute.xlu2 %1335 }
 0xa16   :  { %v1220_v46 = vpop.f32.mrf.mxu3 }
 0xa17   :  { %v1221_v48 = vadd.f32 %v1220_v46, %v1180_v41  ;;  %v1351_v41 = vld [vmem:[%s4625_s2 + $0xa0] sm:$0xff]  ;;  %v1354_v46 = vld [vmem:[%s4625_s2 + $0xb8] sm:$0xff] }
 0xa19   :  { %v1226_v49 = vadd.f32 %v1221_v48, %v3687_v10  ;;  %v1331_v32 = vpop.permute.xlu2 %1330 }
 0xa1b   :  { %1247 = vmatpush.msrb.mxu0 %v1226_v49 }
 0xa1d   :  { %1248 = vmatpush.msrb.mxu0 %v1225_v36 }
 0xa1f   :  { %1249 = vmatpush.msrb.mxu0 %v1224_v50 }
 0xa21   :  { %1250 = vmatpush.msrb.mxu0 %v1223_v51  ;;  %v1401_v34 = vpop.permute.xlu2 %1400 }
 0xa22   :  { %3236 = vmatmul.msk.f32.vlgmr.msrb.gmra.mxu0 %vm281_vm7, %v3430_v25 }
 0xa29   :  { %v1391_v43 = vpop.permute.xlu2 %1390 }
 0xa9f   :  { %v1252_v52 = vpop.f32.mrf.mxu0 }
 0xaa0   :  { %v1255_v54 = vperm.slane %v1252_v52, 0  ;;  %v1381_v52 = vpop.permute.xlu2 %1380 }
 0xaa2   :  { %v1259_v56 = vsub.f32 %v1226_v49, %v1255_v54  ;;  %v1258_v57 = vsub.f32 %v1225_v36, %v1255_v54  ;;  %v1257_v58 = vsub.f32 %v1224_v50, %v1255_v54  ;;  %v1256_v60 = vsub.f32 %v1223_v51, %v1255_v54  ;;  %v1386_v50 = vpop.permute.xlu1 %1385 }
 0xaa4   :  { %v1263_v10 = vmul.f32 %v1259_v56, %v1259_v56  ;;  %v1262_v59 = vmul.f32 %v1258_v57, %v1258_v57  ;;  %v1261_v13 = vmul.f32 %v1257_v58, %v1257_v58  ;;  %v1260_v16 = vmul.f32 %v1256_v60, %v1256_v60 }
 0xaa6   :  { %1276 = vmatpush.msrb.mxu1 %v1263_v10 }
 0xaa8   :  { %1277 = vmatpush.msrb.mxu1 %v1262_v59 }
 0xaaa   :  { %1278 = vmatpush.msrb.mxu1 %v1261_v13 }
 0xaac   :  { %1279 = vmatpush.msrb.mxu1 %v1260_v16 }
 0xaad   :  { %3237 = vmatmul.msk.f32.vlgmr.msrb.gmra.mxu1 %vm281_vm7, %v3430_v25 }
 0xb2a   :  { %v1281_v61 = vpop.f32.mrf.mxu1 }
 0xb2b   :  { %v1282_v62 = vadd.f32 1e-12, %v1281_v61 }
 0xb2d   :  { %3354 = vrsqrt.f32 %v1282_v62  ;;  %vm1290_vm3 = vweird.f32 %v1282_v62 }
 0xb33   :  { %v3355_v21 = vpop.eup %3354 }
 0xb34   :  { %v1285_v6 = vmul.f32 %v3355_v21, %v1282_v62  ;;  %vm1291_vm2 = vweird.f32 %v3355_v21 }
 0xb35   :  { %vm1292_vm4 = vmor %vm1290_vm3, %vm1291_vm2 }
 0xb36   :  { %v1286_v33 = vmul.f32 %v3355_v21, %v1285_v6 }
 0xb38   :  { %v1287_v8 = vmul.f32 0.5, %v1286_v33 }
 0xb3a   :  { %v1288_v9 = vsub.f32 1.5, %v1287_v8 }
 0xb3c   :  { %v1289_v11 = vmul.f32 %v3355_v21, %v1288_v9 }
 0xb3e   :  { %v1293_v15 = vsel %vm1292_vm4, %v3355_v21, %v1289_v11 }
 0xb3f   :  { %v1294_v17 = vperm.slane %v1293_v15, 0 }
 0xb41   :  { %v1298_v22 = vmul.f32 %v1294_v17, %v1259_v56  ;;  %v1297_v12 = vmul.f32 %v1294_v17, %v1258_v57  ;;  %v1296_v23 = vmul.f32 %v1294_v17, %v1257_v58  ;;  %v1295_v26 = vmul.f32 %v1294_v17, %v1256_v60  ;;  %v1376_v58 = vpop.permute.xlu1 %1375 }
 0xb43   :  { %v1322_v35 = vmul.f32 %v1317_v18, %v1298_v22  ;;  %v1321_v24 = vmul.f32 %v1312_v63, %v1297_v12  ;;  %v1320_v29 = vmul.f32 %v1307_v14, %v1296_v23  ;;  %v1319_v31 = vmul.f32 %v1302_v19, %v1295_v26  ;;  %v1371_v18 = vpop.permute.xlu0 %1370 }
 0xb45   :  { %v3997_v28 = vadd.f32 %v1341_v1, %v1322_v35  ;;  %v4000_v30 = vadd.f32 %v1336_v53, %v1321_v24  ;;  %v4003_v37 = vadd.f32 %v1331_v32, %v1320_v29  ;;  %v4006_v39 = vadd.f32 %v1326_v38, %v1319_v31  ;;  %v1366_v1 = vpop.permute.xlu2 %1365 }
 0xb47   :  { %1439 = vmatpush.msra.mxu0 %v3997_v28 }
 0xb49   :  { %1440 = vmatpush.msra.mxu0 %v4000_v30 }
 0xb4b   :  { %1441 = vmatpush.msra.mxu0 %v4003_v37 }
 0xb4d   :  { %1442 = vmatpush.msra.mxu0 %v4006_v39 }
 0xb4e   :  { %3238 = vmatmul.msk.f32.vlgmr.msra.gmra.mxu0 %vm281_vm7, %v1347_v7 }
 0xb56   :  { %3239 = vmatmul.msk.f32.gmra.mxu0 %vm281_vm7, %v1348_v5 }
 0xb5e   :  { %3240 = vmatmul.msk.f32.gmra.mxu0 %vm281_vm7, %v1349_v4 }
 0xb66   :  { %3241 = vmatmul.msk.f32.gmra.mxu0 %vm281_vm7, %v1350_v40 }
 0xb6e   :  { %3242 = vmatmul.msk.f32.gmra.mxu0 %vm281_vm7, %v1351_v41 }
 0xb76   :  { %3243 = vmatmul.msk.f32.gmra.mxu0 %vm281_vm7, %v1352_v42 }
 0xb7e   :  { %3244 = vmatmul.msk.f32.gmra.mxu0 %vm281_vm7, %v1353_v45 }
 0xb86   :  { %3245 = vmatmul.msk.f32.gmra.mxu0 %vm281_vm7, %v1354_v46 }
 0xbcb   :  { %v1444_v47 = vpop.f32.mrf.mxu0 }
 0xbcc   :  { %v4063_v14 = vadd.f32 %v1444_v47, %v1366_v1 }
 0xbce   :  { %v1468_v22 = vmul.f32 %v4063_v14, %v4063_v14 }
 0xbd0   :  { %v1476_v38 = vmul.f32 %v1468_v22, %v4063_v14 }
 0xbd2   :  { %v1484_v47 = vmul.f32 0.044715, %v1476_v38 }
 0xbd3   :  { %v1447_v48 = vpop.f32.mrf.mxu0 }
 0xbd4   :  { %v4055_v61 = vadd.f32 %v1447_v48, %v1371_v18 }
 0xbd6   :  { %v1469_v9 = vmul.f32 %v4055_v61, %v4055_v61 }
 0xbd8   :  { %v1477_v24 = vmul.f32 %v1469_v9, %v4055_v61 }
 0xbda   :  { %v1485_v40 = vmul.f32 0.044715, %v1477_v24 }
 0xbdb   :  { %v1450_v44 = vpop.f32.mrf.mxu0 }
 0xbdc   :  { %v4051_v13 = vadd.f32 %v1450_v44, %v1376_v58 }
 0xbde   :  { %v1470_v33 = vmul.f32 %v4051_v13, %v4051_v13 }
 0xbe0   :  { %v1478_v12 = vmul.f32 %v1470_v33, %v4051_v13 }
 0xbe2   :  { %v1486_v7 = vmul.f32 0.044715, %v1478_v12 }
 0xbe3   :  { %v1453_v49 = vpop.f32.mrf.mxu0 }
 0xbe4   :  { %v4045_v57 = vadd.f32 %v1453_v49, %v1381_v52  ;;  %v1494_v48 = vadd.f32 %v1486_v7, %v4051_v13 }
 0xbe6   :  { %v1471_v62 = vmul.f32 %v4045_v57, %v4045_v57 }
 0xbe8   :  { %v1479_v11 = vmul.f32 %v1471_v62, %v4045_v57 }
 0xbea   :  { %v1487_v26 = vmul.f32 0.044715, %v1479_v11 }
 0xbeb   :  { %v1456_v36 = vpop.f32.mrf.mxu0 }
 0xbec   :  { %v4043_v56 = vadd.f32 %v1456_v36, %v1386_v50  ;;  %v1495_v41 = vadd.f32 %v1487_v26, %v4045_v57  ;;  %v1502_v36 = vmul.f32 0.7978846, %v1494_v48 }
 0xbee   :  { %v1472_v59 = vmul.f32 %v4043_v56, %v4043_v56 }
 0xbf0   :  { %v1480_v6 = vmul.f32 %v1472_v59, %v4043_v56 }
 0xbf2   :  { %v1488_v17 = vmul.f32 0.044715, %v1480_v6 }
 0xbf3   :  { %v1459_v51 = vpop.f32.mrf.mxu0 }
 0xbf4   :  { %v4041_v54 = vadd.f32 %v1459_v51, %v1391_v43  ;;  %v1496_v32 = vadd.f32 %v1488_v17, %v4043_v56  ;;  %v1492_v43 = vadd.f32 %v1484_v47, %v4063_v14 }
 0xbf6   :  { %v1473_v10 = vmul.f32 %v4041_v54, %v4041_v54  ;;  %v1504_v46 = vmul.f32 0.7978846, %v1496_v32 }
 0xbf8   :  { %v1481_v63 = vmul.f32 %v1473_v10, %v4041_v54  ;;  %v1500_v10 = vmul.f32 0.7978846, %v1492_v43 }
 0xbfa   :  { %v1489_v53 = vmul.f32 0.044715, %v1481_v63 }
 0xbfb   :  { %v1462_v60 = vpop.f32.mrf.mxu0 }
 0xbfc   :  { %v4053_v16 = vadd.f32 %v1462_v60, %v1396_v20  ;;  %v1497_v29 = vadd.f32 %v1489_v53, %v4041_v54  ;;  %v1503_v20 = vmul.f32 0.7978846, %v1495_v41  ;;  %v1561_v41 = vpop.permute.xlu2 %1560 }
 0xbfe   :  { %v1474_v21 = vmul.f32 %v4053_v16, %v4053_v16  ;;  %v1505_v45 = vmul.f32 0.7978846, %v1497_v29 }
 0xc00   :  { %v1482_v8 = vmul.f32 %v1474_v21, %v4053_v16 }
 0xc02   :  { %v1490_v15 = vmul.f32 0.044715, %v1482_v8 }
 0xc03   :  { %v1465_v19 = vpop.f32.mrf.mxu0 }
 0xc04   :  { %v1498_v23 = vadd.f32 %v1490_v15, %v4053_v16  ;;  %v1466_v35 = vadd.f32 %v1465_v19, %v1401_v34  ;;  %v1493_v34 = vadd.f32 %v1485_v40, %v4055_v61 }
 0xc06   :  { %v1475_v31 = vmul.f32 %v1466_v35, %v1466_v35  ;;  %v1506_v4 = vmul.f32 0.7978846, %v1498_v23  ;;  %v1501_v51 = vmul.f32 0.7978846, %v1493_v34  ;;  %v1551_v34 = vpop.permute.xlu0 %1550 }
 0xc08   :  { %v1483_v5 = vmul.f32 %v1475_v31, %v1466_v35  ;;  %3356 = vtanh.f32 %v1506_v4  ;;  %v1566_v4 = vpop.permute.xlu1 %1565 }
 0xc09   :  { %3358 = vtanh.f32 %v1505_v45 }
 0xc0a   :  { %v1491_v42 = vmul.f32 0.044715, %v1483_v5  ;;  %3360 = vtanh.f32 %v1504_v46 }
 0xc0c   :  { %v1499_v44 = vadd.f32 %v1491_v42, %v1466_v35 }
 0xc0e   :  { %v1507_v49 = vmul.f32 0.7978846, %v1499_v44  ;;  %v3357_v50 = vpop.eup %3356 }
 0xc0f   :  { %v3359_v52 = vpop.eup %3358  ;;  %v1522_v59 = vadd.f32 1.0, %v3357_v50 }
 0xc10   :  { %3362 = vtanh.f32 %v1507_v49  ;;  %v3361_v58 = vpop.eup %3360  ;;  %v1521_v62 = vadd.f32 1.0, %v3359_v52  ;;  %v1556_v47 = vpop.permute.xlu1 %1555 }
 0xc11   :  { %3364 = vtanh.f32 %v1503_v20  ;;  %v1530_v1 = vmul.f32 0.5, %v1522_v59  ;;  %v1520_v6 = vadd.f32 1.0, %v3361_v58 }
 0xc12   :  { %3366 = vtanh.f32 %v1502_v36  ;;  %v1529_v9 = vmul.f32 0.5, %v1521_v62 }
 0xc13   :  { %3368 = vtanh.f32 %v1501_v51  ;;  %v1538_v15 = vmul.f32 %v1530_v1, %v4053_v16  ;;  %v1528_v17 = vmul.f32 0.5, %v1520_v6 }
 0xc14   :  { %3370 = vtanh.f32 %v1500_v10  ;;  %v1537_v12 = vmul.f32 %v1529_v9, %v4041_v54  ;;  %v1728_v9 = vpop.permute.xlu0 %1727 }
 0xc15   :  { %v1536_v26 = vmul.f32 %v1528_v17, %v4043_v56  ;;  %v1540_v56 = vld [vmem:[%s4625_s2 + $0xc0] sm:$0xff] }
 0xc16   :  { %v3363_v60 = vpop.eup %3362 }
 0xc17   :  { %v1523_v18 = vadd.f32 1.0, %v3363_v60  ;;  %v3365_v63 = vpop.eup %3364 }
 0xc18   :  { %v3367_v33 = vpop.eup %3366  ;;  %v1519_v11 = vadd.f32 1.0, %v3365_v63  ;;  %v1704_v63 = vpop.permute.xlu2 %1703 }
 0xc19   :  { %v1531_v21 = vmul.f32 0.5, %v1523_v18  ;;  %v3369_v53 = vpop.eup %3368  ;;  %v1518_v19 = vadd.f32 1.0, %v3367_v33  ;;  %v1699_v1 = vpop.permute.xlu1 %1698 }
 0xc1a   :  { %v3371_v22 = vpop.eup %3370  ;;  %v1527_v23 = vmul.f32 0.5, %v1519_v11  ;;  %v1517_v24 = vadd.f32 1.0, %v3369_v53 }
 0xc1b   :  { %v1539_v8 = vmul.f32 %v1531_v21, %v1466_v35  ;;  %v1526_v29 = vmul.f32 0.5, %v1518_v19  ;;  %v1516_v31 = vadd.f32 1.0, %v3371_v22 }
 0xc1c   :  { %v1535_v35 = vmul.f32 %v1527_v23, %v4045_v57  ;;  %v1525_v32 = vmul.f32 0.5, %v1517_v24  ;;  %v1541_v57 = vld [vmem:[%s4625_s2 + $0xc8] sm:$0xff] }
 0xc1d   :  { %1589 = vmatpush.msra.mxu1 %v1539_v8  ;;  %v1534_v16 = vmul.f32 %v1526_v29, %v4051_v13  ;;  %v1524_v38 = vmul.f32 0.5, %v1516_v31  ;;  %v1542_v13 = vld [vmem:[%s4625_s2 + $0xd0] sm:$0xff] }
 0xc1e   :  { %v1533_v7 = vmul.f32 %v1525_v32, %v4055_v61  ;;  %v1543_v61 = vld [vmem:[%s4625_s2 + $0xd8] sm:$0xff]  ;;  %v1689_v32 = vpop.permute.xlu0 %1688 }
 0xc1f   :  { %1590 = vmatpush.msra.mxu1 %v1538_v15  ;;  %v1532_v54 = vmul.f32 %v1524_v38, %v4063_v14 }
 0xc20   :  { %v1694_v53 = vpop.permute.xlu2 %1693 }
 0xc21   :  { %1591 = vmatpush.msra.mxu1 %v1537_v12  ;;  %v1723_v19 = vpop.permute.xlu1 %1722 }
 0xc23   :  { %1592 = vmatpush.msra.mxu1 %v1536_v26 }
 0xc25   :  { %1593 = vmatpush.msra.mxu1 %v1535_v35 }
 0xc27   :  { %1594 = vmatpush.msra.mxu1 %v1534_v16 }
 0xc29   :  { %1595 = vmatpush.msra.mxu1 %v1533_v7  ;;  %v1718_v7 = vpop.permute.xlu2 %1717 }
 0xc2b   :  { %1596 = vmatpush.msra.mxu1 %v1532_v54 }
 0xc2c   :  { %3246 = vmatmul.msk.f32.vlgmr.msra.gmra.mxu1 %vm1568_vm5, %v1540_v56  ;;  %v1713_v56 = vpop.permute.xlu1 %1712 }
 0xc34   :  { %3247 = vmatmul.msk.f32.gmra.mxu1 %vm1568_vm5, %v1541_v57 }
 0xc3c   :  { %3248 = vmatmul.msk.f32.gmra.mxu1 %vm1568_vm5, %v1542_v13  ;;  %v1734_v13 = vld [vmem:[%s4625_s2 + $0xe0] sm:$0xff] }
 0xc44   :  { %3249 = vmatmul.msk.f32.gmra.mxu1 %vm1568_vm5, %v1543_v61  ;;  %v1735_v61 = vld [vmem:[%s4625_s2 + $0xe8] sm:$0xff] }
 0xca9   :  { %v1598_v14 = vpop.f32.mrf.mxu1 }
 0xcaa   :  { %v1599_v49 = vadd.f32 %v1598_v14, %v1551_v34  ;;  %v1736_v14 = vld [vmem:[%s4625_s2 + $0xf0] sm:$0xff] }
 0xcac   :  { %v1610_v36 = vadd.f32 %v1599_v49, %v4006_v39  ;;  %v1781_v49 = vpop.permute.xlu2 %1780 }
 0xcb1   :  { %v1601_v5 = vpop.f32.mrf.mxu1 }
 0xcb2   :  { %v1602_v48 = vadd.f32 %v1601_v5, %v1556_v47  ;;  %v1737_v5 = vld [vmem:[%s4625_s2 + $0xf8] sm:$0xff] }
 0xcb4   :  { %v1611_v43 = vadd.f32 %v1602_v48, %v4003_v37 }
 0xcb9   :  { %v1604_v40 = vpop.f32.mrf.mxu1 }
 0xcba   :  { %v1605_v45 = vadd.f32 %v1604_v40, %v1561_v41  ;;  %v1739_v40 = vld [vmem:[%s4625_s2 + $0x108] sm:$0xff]  ;;  %v1761_v41 = vpop.permute.xlu0 %1760 }
 0xcbc   :  { %v1612_v20 = vadd.f32 %v1605_v45, %v4000_v30 }
 0xcc1   :  { %v1607_v42 = vpop.f32.mrf.mxu1 }
 0xcc2   :  { %v1608_v46 = vadd.f32 %v1607_v42, %v1566_v4  ;;  %v1738_v4 = vld [vmem:[%s4625_s2 + $0x100] sm:$0xff] }
 0xcc4   :  { %v1613_v44 = vadd.f32 %v1608_v46, %v3997_v28  ;;  %v1766_v46 = vpop.permute.xlu1 %1765 }
 0xcc6   :  { %1634 = vmatpush.msra.mxu3 %v1613_v44 }
 0xcc8   :  { %1635 = vmatpush.msra.mxu3 %v1612_v20 }
 0xcca   :  { %1636 = vmatpush.msra.mxu3 %v1611_v43 }
 0xccc   :  { %1637 = vmatpush.msra.mxu3 %v1610_v36 }
 0xccd   :  { %3250 = vmatmul.msk.f32.vlgmr.msra.gmra.mxu3 %vm281_vm7, %v3430_v25 }
 0xd50   :  { %v1639_v50 = vpop.f32.mrf.mxu3 }
 0xd51   :  { %v1642_v51 = vperm.slane %v1639_v50, 0 }
 0xd53   :  { %v1646_v52 = vsub.f32 %v1613_v44, %v1642_v51  ;;  %v1645_v10 = vsub.f32 %v1612_v20, %v1642_v51  ;;  %v1644_v58 = vsub.f32 %v1611_v43, %v1642_v51  ;;  %v1643_v30 = vsub.f32 %v1610_v36, %v1642_v51  ;;  %v1786_v36 = vpop.permute.xlu0 %1785 }
 0xd55   :  { %v1650_v28 = vmul.f32 %v1646_v52, %v1646_v52  ;;  %v1649_v59 = vmul.f32 %v1645_v10, %v1645_v10  ;;  %v1648_v60 = vmul.f32 %v1644_v58, %v1644_v58  ;;  %v1647_v37 = vmul.f32 %v1643_v30, %v1643_v30 }
 0xd57   :  { %1663 = vmatpush.msrb.mxu3 %v1650_v28 }
 0xd59   :  { %1664 = vmatpush.msrb.mxu3 %v1649_v59  ;;  %v1740_v59 = vld [vmem:[%s4625_s2 + $0x110] sm:$0xff] }
 0xd5b   :  { %1665 = vmatpush.msrb.mxu3 %v1648_v60  ;;  %v1742_v60 = vld [vmem:[%s4625_s2 + $0x120] sm:$0xff] }
 0xd5d   :  { %1666 = vmatpush.msrb.mxu3 %v1647_v37 }
 0xd5e   :  { %3251 = vmatmul.msk.f32.vlgmr.msrb.gmra.mxu3 %vm281_vm7, %v3430_v25 }
 0xde1   :  { %v1668_v39 = vpop.f32.mrf.mxu3 }
 0xde2   :  { %v1669_v18 = vadd.f32 1e-12, %v1668_v39 }
 0xde4   :  { %3372 = vrsqrt.f32 %v1669_v18  ;;  %vm1677_vm9 = vweird.f32 %v1669_v18 }
 0xdea   :  { %v3373_v62 = vpop.eup %3372 }
 0xdeb   :  { %v1672_v21 = vmul.f32 %v3373_v62, %v1669_v18  ;;  %vm1678_vm8 = vweird.f32 %v3373_v62  ;;  %v1743_v18 = vld [vmem:[%s4625_s2 + $0x128] sm:$0xff] }
 0xdec   :  { %vm1679_vm10 = vmor %vm1677_vm9, %vm1678_vm8 }
 0xded   :  { %v1673_v6 = vmul.f32 %v3373_v62, %v1672_v21 }
 0xdef   :  { %v1674_v33 = vmul.f32 0.5, %v1673_v6 }
 0xdf1   :  { %v1675_v8 = vsub.f32 1.5, %v1674_v33 }
 0xdf3   :  { %v1676_v11 = vmul.f32 %v3373_v62, %v1675_v8 }
 0xdf5   :  { %v1680_v15 = vsel %vm1679_vm10, %v3373_v62, %v1676_v11 }
 0xdf6   :  { %v1681_v17 = vperm.slane %v1680_v15, 0  ;;  %v1748_v15 = vld [vmem:[%s4624_s3 + $0x1b0] sm:$0xff] }
 0xdf8   :  { %v1685_v22 = vmul.f32 %v1681_v17, %v1646_v52  ;;  %v1684_v12 = vmul.f32 %v1681_v17, %v1645_v10  ;;  %v1683_v23 = vmul.f32 %v1681_v17, %v1644_v58  ;;  %v1682_v29 = vmul.f32 %v1681_v17, %v1643_v30  ;;  %v1741_v30 = vld [vmem:[%s4625_s2 + $0x118] sm:$0xff]  ;;  %v1754_v17 = vld [vmem:[%s4624_s3 + $0x1e0] sm:$0xff] }
 0xdfa   :  { %v1709_v24 = vmul.f32 %v1704_v63, %v1685_v22  ;;  %v1708_v26 = vmul.f32 %v1699_v1, %v1684_v12  ;;  %v1707_v35 = vmul.f32 %v1694_v53, %v1683_v23  ;;  %v1706_v38 = vmul.f32 %v1689_v32, %v1682_v29  ;;  %v1755_v22 = vld [vmem:[%s4624_s3 + $0x1e8] sm:$0xff]  ;;  %v1752_v29 = vld [vmem:[%s4624_s3 + $0x1d0] sm:$0xff] }
 0xdfc   :  { %v4114_v31 = vadd.f32 %v1728_v9, %v1709_v24  ;;  %v4117_v16 = vadd.f32 %v1723_v19, %v1708_v26  ;;  %v4120_v54 = vadd.f32 %v1718_v7, %v1707_v35  ;;  %v4123_v57 = vadd.f32 %v1713_v56, %v1706_v38  ;;  %v1749_v19 = vld [vmem:[%s4624_s3 + $0x1b8] sm:$0xff] }
 0xdfe   :  { %1866 = vmatpush.msra.mxu2 %v4114_v31 }
 0xe00   :  { %1867 = vmatpush.msra.mxu2 %v4117_v16 }
 0xe02   :  { %1868 = vmatpush.msra.mxu2 %v4120_v54 }
 0xe04   :  { %1869 = vmatpush.msra.mxu2 %v4123_v57 }
 0xe05   :  { %3252 = vmatmul.msk.f32.vlgmr.msra.gmra.mxu2 %vm281_vm7, %v1734_v13 }
 0xe0d   :  { %3253 = vmatmul.msk.f32.gmra.mxu2 %vm281_vm7, %v1735_v61 }
 0xe15   :  { %3254 = vmatmul.msk.f32.gmra.mxu2 %vm281_vm7, %v1736_v14 }
 0xe1d   :  { %3255 = vmatmul.msk.f32.gmra.mxu2 %vm281_vm7, %v1737_v5 }
 0xe25   :  { %3256 = vmatmul.msk.f32.gmra.mxu2 %vm281_vm7, %v1738_v4 }
 0xe2d   :  { %3257 = vmatmul.msk.f32.gmra.mxu2 %vm281_vm7, %v1739_v40 }
 0xe35   :  { %3258 = vmatmul.msk.f32.gmra.mxu2 %vm281_vm7, %v1740_v59  ;;  %v1757_v59 = vld [vmem:[%s4624_s3 + $0x1f8] sm:$0xff] }
 0xe3d   :  { %3259 = vmatmul.msk.f32.gmra.mxu2 %vm281_vm7, %v1741_v30 }
 0xe45   :  { %3260 = vmatmul.msk.f32.gmra.mxu2 %vm281_vm7, %v1742_v60  ;;  %v2552_v60 = vld [vmem:[%s4624_s3 + $0x240] sm:$0xff] }
 0xe4d   :  { %3261 = vmatmul.msk.f32.gmra.mxu2 %vm281_vm7, %v1743_v18 }
 0xe88   :  { %v1871_v42 = vpop.f32.mrf.mxu2 }
 0xe89   :  { %v1872_v45 = vadd.f32 %v1871_v42, %v1761_v41 }
 0xe8b   :  { %1907 = vxpose.xlu2.b32.start.end [1/1] (short) (narrow) %v1872_v45, 16 }
 0xe90   :  { %v1874_v47 = vpop.f32.mrf.mxu2 }
 0xe91   :  { %v1875_v48 = vadd.f32 %v1874_v47, %v1766_v46 }
 0xe93   :  { %2049 = vxpose.xlu1.b32.start.end [1/1] (short) (narrow) %v1875_v48, 16 }
 0xe98   :  { %v4150_v44 = vpop.f32.mrf.mxu2 }
 0xea0   :  { %v4152_v34 = vpop.f32.mrf.mxu2 }
 0xea8   :  { %v1883_v20 = vpop.f32.mrf.mxu2 }
 0xea9   :  { %v1884_v43 = vadd.f32 %v1883_v20, %v1781_v49 }
 0xeab   :  { %1960 = vmatpush.msra.mxu3 %v1884_v43  ;;  %v1744_v43 = vld [vmem:[%s4625_s2 + $0x130] sm:$0xff] }
 0xeac   :  { %3262 = vmatmul.msk.f32.gmra.mxu2 %vm281_vm7, %v1744_v43 }
 0xeb0   :  { %v1886_v50 = vpop.f32.mrf.mxu2 }
 0xeb1   :  { %v1887_v51 = vadd.f32 %v1886_v50, %v1786_v36  ;;  %v1745_v36 = vld [vmem:[%s4625_s2 + $0x138] sm:$0xff] }
 0xeb3   :  { %2102 = vmatpush.msrb.mxu3 %v1887_v51 }
 0xeb4   :  { %3263 = vmatmul.msk.f32.gmra.mxu2 %vm281_vm7, %v1745_v36 }
 0xf24   :  { %v1923_v52 = vpop.trf.xlu2 }
 0xf25   :  { %3264 = vmatmul.msk.f32.vlgmr.msra.gmra.mxu3 %vm617_vm11, %v1923_v52 }
 0xf2c   :  { %v1924_v10 = vpop.trf.xlu2 }
 0xf2d   :  { %3265 = vmatmul.msk.f32.gmra.mxu3 %vm617_vm11, %v1924_v10 }
 0xf37   :  { %v2065_v28 = vpop.trf.xlu1 }
 0xf38   :  { %3269 = vmatmul.msk.f32.vlgmr.msrb.gmra.mxu3 %vm617_vm11, %v2065_v28 }
 0xf3f   :  { %v2066_v58 = vpop.trf.xlu1 }
 0xf40   :  { %3270 = vmatmul.msk.f32.gmra.mxu3 %vm617_vm11, %v2066_v58  ;;  %v1753_v58 = vld [vmem:[%s4624_s3 + $0x1d8] sm:$0xff] }
 0xfa8   :  { %v1962_v37 = vpop.f32.mrf.mxu3 }
 0xfa9   :  { %v1968_v39 = vmul.f32 0.35355338, %v1962_v37 }
 0xfab   :  { %v1970_v62 = vadd.f32 %v1968_v39, %v3614_v0  ;;  %v2682_v39 = vld [vmem:[%s4624_s3 + $0x290] sm:$0xff] }
 0xfad   :  { %v1972_v63 = vsel %vm202_vm6, %v1970_v62, -inf }
 0xfae   :  { %1973 = vmax.xlane.f32.xlu2 %v1972_v63 }
 0xfb0   :  { %v1965_v21 = vpop.f32.mrf.mxu3 }
 0xfb1   :  { %v1969_v1 = vmul.f32 0.35355338, %v1965_v21 }
 0xfb3   :  { %v1971_v6 = vadd.f32 %v1969_v1, %v3599_v55  ;;  %v2679_v1 = vld [vmem:[%s4624_s3 + $0x278] sm:$0xff] }
 0xfb5   :  { %v1975_v33 = vsel %vm202_vm6, %v1971_v6, -inf }
 0xfb6   :  { %1976 = vmax.xlane.f32.xlu0 %v1975_v33 }
 0xfbb   :  { %v2104_v8 = vpop.f32.mrf.mxu3 }
 0xfbc   :  { %v2110_v9 = vmul.f32 0.35355338, %v2104_v8 }
 0xfbe   :  { %v2112_v11 = vadd.f32 %v2110_v9, %v3614_v0 }
 0xfc0   :  { %v2114_v53 = vsel %vm202_vm6, %v2112_v11, -inf }
 0xfc1   :  { %2115 = vmax.xlane.f32.xlu1 %v2114_v53 }
 0xfc3   :  { %v2107_v12 = vpop.f32.mrf.mxu3 }
 0xfc4   :  { %v2111_v23 = vmul.f32 0.35355338, %v2107_v12 }
 0xfc6   :  { %v2113_v24 = vadd.f32 %v2111_v23, %v3599_v55 }
 0xfc8   :  { %v2117_v26 = vsel %vm202_vm6, %v2113_v24, -inf }
 0xfca   :  { %1770 = vperm.xlu0 %3315, %v1748_v15  }
 0xfd2   :  { %1800 = vperm.xlu0 %3315, %v1754_v17  }
 0xfda   :  { %1775 = vperm.xlu0 %3315, %v1749_v19  }
 0xfe2   :  { %1805 = vperm.xlu0 %3315, %v1755_v22  }
0x100c   :  { %2118 = vmax.xlane.f32.xlu0 %v2117_v26 }
0x1020   :  { %1790 = vperm.xlu0 %3315, %v1752_v29  }
0x1021   :  { %v1974_v32 = vpop.xlane.xlu2 %1973 }
0x1022   :  { %v1978_v38 = vsub.f32 %v1970_v62, %v1974_v32 }
0x1024   :  { %v1980_v7 = vmul.f32 1.442695, %v1978_v38 }
0x1026   :  { %3374 = vpow2.f32 %v1980_v7 }
0x1029   :  { %v1977_v35 = vpop.xlane.xlu0 %1976 }
0x102a   :  { %v1979_v13 = vsub.f32 %v1971_v6, %v1977_v35  ;;  %v4244_v6 = vpop.f32.mrf.mxu2 }
0x102c   :  { %v1982_v61 = vmul.f32 1.442695, %v1979_v13  ;;  %v4199_v4 = vpop.eup %3374 }
0x102d   :  { %v1984_v41 = vsel %vm202_vm6, %v4199_v4, 0.0 }
0x102e   :  { %3376 = vpow2.f32 %v1982_v61 }
0x1032   :  { %v4249_v17 = vpop.f32.mrf.mxu2 }
0x1034   :  { %v2116_v5 = vpop.xlane.xlu1 %2115  ;;  %v4204_v47 = vpop.eup %3376 }
0x1035   :  { %v2120_v40 = vsub.f32 %v2112_v11, %v2116_v5  ;;  %v1987_v48 = vsel %vm202_vm6, %v4204_v47, 0.0 }
0x1037   :  { %v2122_v42 = vmul.f32 1.442695, %v2120_v40 }
0x1039   :  { %3378 = vpow2.f32 %v2122_v42  ;;  %v2941_v42 = vld [vmem:[%s4624_s3 + $0x2f8] sm:$0xff] }
0x103a   :  { %v1895_v5 = vpop.f32.mrf.mxu2 }
0x103c   :  { %v1771_v56 = vpop.permute.xlu0 %1770 }
0x103d   :  { %v1878_v18 = vadd.f32 %v4150_v44, %v1771_v56  ;;  %v2676_v44 = vld [vmem:[%s4624_s3 + $0x260] sm:$0xff]  ;;  %v2866_v56 = vld [vmem:[%s4624_s3 + $0x2a8] sm:$0xff] }
0x103f   :  { %v4208_v49 = vpop.eup %3378 }
0x1040   :  { %v2126_v20 = vsel %vm202_vm6, %v4208_v49, 0.0 }
0x1044   :  { %v4197_v14 = vpop.permute.xlu0 %1800 }
0x104a   :  { %1985 = vadd.xlane.f32.xlu0 %v1984_v41  ;;  %v1896_v41 = vadd.f32 %v1895_v5, %v4197_v14 }
0x104c   :  { %v1776_v45 = vpop.permute.xlu0 %1775 }
0x104d   :  { %v1881_v46 = vadd.f32 %v4152_v34, %v1776_v45  ;;  %v2935_v45 = vld [vmem:[%s4624_s3 + $0x2c8] sm:$0xff] }
0x104f   :  { %2333 = vxpose.xlu1.b32.start.end [1/1] (short) (narrow) %v1881_v46, 16 }
0x1052   :  { %1988 = vadd.xlane.f32.xlu0 %v1987_v48 }
0x1054   :  { %v4216_v34 = vpop.permute.xlu0 %1805 }
0x105a   :  { %2127 = vadd.xlane.f32.xlu0 %v2126_v20 }
0x107f   :  { %v2119_v50 = vpop.xlane.xlu0 %2118 }
0x1080   :  { %v2121_v51 = vsub.f32 %v2113_v24, %v2119_v50 }
0x1082   :  { %v2124_v52 = vmul.f32 1.442695, %v2121_v51 }
0x1084   :  { %3380 = vpow2.f32 %v2124_v52 }
0x108a   :  { %v4222_v10 = vpop.eup %3380 }
0x108b   :  { %v2129_v28 = vsel %vm202_vm6, %v4222_v10, 0.0 }
0x108c   :  { %2130 = vadd.xlane.f32.xlu0 %v2129_v28 }
0x1092   :  { %v4232_v30 = vpop.permute.xlu0 %1790 }
0x10a0   :  { %1795 = vperm.xlu0 %3315, %v1753_v58  }
0x10b1   :  { %1815 = vperm.xlu1 %3316, %v1757_v59  }
0x10b9   :  { %2646 = vperm.xlu1 %3316, %v2552_v60  }
0x10bd   :  { %v1986_v37 = vpop.xlane.xlu0 %1985 }
0x10be   :  { %3382 = vrcp.f32 %v1986_v37  ;;  %vm1995_vm14 = vweird.f32 %v1986_v37  ;;  %v2001_v23 = vand.u32 2147483648, %v1986_v37  ;;  %v1999_v24 = vand.u32 2147483647, %v1986_v37 }
0x10c0   :  { %v2002_v38 = vor.u32 1.1754944e-38, %v2001_v23  ;;  %vm2000_vm3 = vcmp.eq.f32.partialorder %v1999_v24, 8.507059e+37  ;;  %v2681_v24 = vld [vmem:[%s4624_s3 + $0x288] sm:$0xff] }
0x10c1   :  { %2716 = vperm.xlu1 %3316, %v2682_v39  }
0x10c2   :  { %2191 = vxpose.xlu0.b32.start.end [1/1] (short) (narrow) %v1878_v18, 16 }
0x10c4   :  { %v3383_v62 = vpop.eup %3382 }
0x10c5   :  { %v1991_v63 = vmul.f32 %v3383_v62, %v1986_v37  ;;  %v1989_v21 = vpop.xlane.xlu0 %1988  ;;  %vm1996_vm12 = vweird.f32 %v3383_v62 }
0x10c6   :  { %3384 = vrcp.f32 %v1989_v21  ;;  %v2016_v15 = vand.u32 2147483648, %v1989_v21  ;;  %v2014_v12 = vand.u32 2147483647, %v1989_v21  ;;  %vm1997_vm15 = vmor %vm1995_vm14, %vm1996_vm12  ;;  %vm2010_vm0 = vweird.f32 %v1989_v21 }
0x10c7   :  { %v1992_v33 = vsub.f32 1.0, %v1991_v63 }
0x10c8   :  { %v2017_v29 = vor.u32 1.1754944e-38, %v2016_v15  ;;  %vm2015_vm2 = vcmp.eq.f32.partialorder %v2014_v12, 8.507059e+37 }
0x10c9   :  { %2701 = vperm.xlu1 %3316, %v2679_v1   ;;  %v1993_v9 = vmul.f32 %v3383_v62, %v1992_v33 }
0x10cb   :  { %v1994_v19 = vadd.f32 %v3383_v62, %v1993_v9 }
0x10cc   :  { %v3385_v8 = vpop.eup %3384 }
0x10cd   :  { %v2006_v11 = vmul.f32 %v3385_v8, %v1989_v21  ;;  %vm2011_vm13 = vweird.f32 %v3385_v8  ;;  %v1998_v32 = vsel %vm1997_vm15, %v3383_v62, %v1994_v19  ;;  %v2128_v46 = vpop.xlane.xlu0 %2127  ;;  %v1890_v19 = vadd.f32 %v4244_v6, %v4232_v30 }
0x10ce   :  { %vm2012_vm1 = vmor %vm2010_vm0, %vm2011_vm13  ;;  %v2003_v61 = vsel %vm2000_vm3, %v2002_v38, %v1998_v32  ;;  %3386 = vrcp.f32 %v2128_v46  ;;  %vm2137_vm9 = vweird.f32 %v2128_v46  ;;  %v2143_v60 = vand.u32 2147483648, %v2128_v46  ;;  %v2936_v38 = vld [vmem:[%s4624_s3 + $0x2d0] sm:$0xff] }
0x10cf   :  { %v2007_v53 = vsub.f32 1.0, %v2006_v11  ;;  %v2004_v40 = vmul.f32 %v4199_v4, %v2003_v61  ;;  %v2938_v4 = vld [vmem:[%s4624_s3 + $0x2e0] sm:$0xff]  ;;  %v2141_v37 = vand.u32 2147483647, %v2128_v46 }
0x10d0   :  { %v2144_v21 = vor.u32 1.1754944e-38, %v2143_v60 }
0x10d1   :  { %v2008_v22 = vmul.f32 %v3385_v8, %v2007_v53  ;;  %2686 = vperm.xlu1 %3316, %v2676_v44   ;;  %vm2142_vm15 = vcmp.eq.f32.partialorder %v2141_v37, 8.507059e+37  ;;  %v1898_v53 = vpop.f32.mrf.mxu2 }
0x10d3   :  { %v2009_v26 = vadd.f32 %v3385_v8, %v2008_v22 }
0x10d4   :  { %v3387_v14 = vpop.eup %3386 }
0x10d5   :  { %v2013_v35 = vsel %vm2012_vm1, %v3385_v8, %v2009_v26  ;;  %vm2138_vm4 = vweird.f32 %v3387_v14  ;;  %v2678_v26 = vld [vmem:[%s4624_s3 + $0x270] sm:$0xff] }
0x10d6   :  { %v2018_v7 = vsel %vm2015_vm2, %v2017_v29, %v2013_v35  ;;  %vm2139_vm10 = vmor %vm2137_vm9, %vm2138_vm4  ;;  %v2868_v29 = vld [vmem:[%s4624_s3 + $0x2b8] sm:$0xff]  ;;  %v2865_v35 = vld [vmem:[%s4624_s3 + $0x2a0] sm:$0xff] }
0x10d7   :  { %v2019_v13 = vmul.f32 %v4204_v47, %v2018_v7  ;;  %v2133_v47 = vmul.f32 %v3387_v14, %v2128_v46 }
0x10d9   :  { %2876 = vperm.xlu1 %3316, %v2866_v56   ;;  %3266 = vmatpush.xpose.msk.msrb.mxu1 %vm202_vm6, %v2019_v13  ;;  %v2134_v20 = vsub.f32 1.0, %v2133_v47  ;;  %v2939_v56 = vld [vmem:[%s4624_s3 + $0x2e8] sm:$0xff] }
0x10db   :  { %v2135_v36 = vmul.f32 %v3387_v14, %v2134_v20 }
0x10dd   :  { %3267 = vmatpush.xpose.msk.msrb.mxu1 %vm202_vm6, %v2004_v40  ;;  %v2136_v28 = vadd.f32 %v3387_v14, %v2135_v36 }
0x10df   :  { %v2140_v63 = vsel %vm2139_vm10, %v3387_v14, %v2136_v28 }
0x10e0   :  { %3268 = vmatmul.msk.f32.vlgmr.msrb.gmra.mxu1 %vm202_vm6, %v1896_v41  ;;  %v2145_v9 = vsel %vm2142_vm15, %v2144_v21, %v2140_v63 }
0x10e1   :  { %3047 = vperm.xlu1 %3316, %v2941_v42   ;;  %v2146_v15 = vmul.f32 %v4208_v49, %v2145_v9  ;;  %v2482_v9 = vld [vmem:[%s4624_s3 + $0x218] sm:$0xff] }
0x10e9   :  { %3013 = vperm.xlu1 %3316, %v2935_v45  }
0x10f1   :  { %3032 = vperm.xlu1 %3316, %v2938_v4  }
0x10f3   :  { %v2349_v44 = vpop.trf.xlu1 }
0x10ff   :  { %v2131_v48 = vpop.xlane.xlu0 %2130 }
0x1100   :  { %3388 = vrcp.f32 %v2131_v48  ;;  %v2158_v52 = vand.u32 2147483648, %v2131_v48  ;;  %v2156_v59 = vand.u32 2147483647, %v2131_v48  ;;  %vm2152_vm12 = vweird.f32 %v2131_v48 }
0x1102   :  { %v2159_v18 = vor.u32 1.1754944e-38, %v2158_v52  ;;  %vm2157_vm14 = vcmp.eq.f32.partialorder %v2156_v59, 8.507059e+37 }
0x1106   :  { %v3389_v43 = vpop.eup %3388 }
0x1107   :  { %v2148_v50 = vmul.f32 %v3389_v43, %v2131_v48  ;;  %vm2153_vm8 = vweird.f32 %v3389_v43 }
0x1108   :  { %vm2154_vm13 = vmor %vm2152_vm12, %vm2153_vm8 }
0x1109   :  { %v2149_v51 = vsub.f32 1.0, %v2148_v50 }
0x110b   :  { %v2150_v58 = vmul.f32 %v3389_v43, %v2149_v51 }
0x110d   :  { %v2151_v39 = vadd.f32 %v3389_v43, %v2150_v58 }
0x110f   :  { %v2155_v62 = vsel %vm2154_vm13, %v3389_v43, %v2151_v39 }
0x1110   :  { %v2160_v1 = vsel %vm2157_vm14, %v2159_v18, %v2155_v62 }
0x1111   :  { %v2161_v33 = vmul.f32 %v4222_v10, %v2160_v1  ;;  %v1899_v10 = vadd.f32 %v1898_v53, %v4216_v34  ;;  %v2554_v34 = vld [vmem:[%s4624_s3 + $0x250] sm:$0xff]  ;;  %v2479_v53 = vld [vmem:[%s4624_s3 + $0x200] sm:$0xff] }
0x1112   :  { %v1796_v8 = vpop.permute.xlu0 %1795 }
0x1113   :  { %v1893_v11 = vadd.f32 %v4249_v17, %v1796_v8  ;;  %3271 = vmatpush.xpose.msk.msra.mxu1 %vm202_vm6, %v2161_v33  ;;  %v2350_v17 = vpop.trf.xlu1  ;;  %v1756_v8 = vld [vmem:[%s4624_s3 + $0x1f0] sm:$0xff] }
0x1115   :  { %2386 = vmatpush.msra.mxu3 %v1893_v11  ;;  %v2481_v11 = vld [vmem:[%s4624_s3 + $0x210] sm:$0xff] }
0x1116   :  { %3279 = vmatmul.msk.f32.vlgmr.msra.gmra.mxu3 %vm617_vm11, %v2349_v44  ;;  %v2480_v44 = vld [vmem:[%s4624_s3 + $0x208] sm:$0xff] }
0x1117   :  { %3272 = vmatpush.xpose.msk.msra.mxu1 %vm202_vm6, %v2146_v15  ;;  %v2551_v15 = vld [vmem:[%s4624_s3 + $0x238] sm:$0xff] }
0x111a   :  { %3273 = vmatmul.msk.f32.vlgmr.msra.gmra.mxu1 %vm202_vm6, %v1899_v10  ;;  %v2555_v10 = vld [vmem:[%s4624_s3 + $0x258] sm:$0xff] }
0x111b   :  { %2244 = vmatpush.msrb.mxu1 %v1890_v19  ;;  %v2550_v19 = vld [vmem:[%s4624_s3 + $0x230] sm:$0xff] }
0x111e   :  { %3280 = vmatmul.msk.f32.gmra.mxu3 %vm617_vm11, %v2350_v17  ;;  %v2549_v17 = vld [vmem:[%s4624_s3 + $0x228] sm:$0xff] }
0x115d   :  { %v4299_v32 = vpop.f32.mrf.mxu1 }
0x1166   :  { %v2207_v22 = vpop.trf.xlu0 }
0x1167   :  { %3274 = vmatmul.msk.f32.vlgmr.msrb.gmra.mxu1 %vm617_vm11, %v2207_v22 }
0x116e   :  { %v2208_v12 = vpop.trf.xlu0 }
0x116f   :  { %3275 = vmatmul.msk.f32.gmra.mxu1 %vm617_vm11, %v2208_v12  ;;  %v2548_v12 = vld [vmem:[%s4624_s3 + $0x220] sm:$0xff] }
0x1197   :  { %v4304_v7 = vpop.f32.mrf.mxu1 }
0x1199   :  { %v2388_v49 = vpop.f32.mrf.mxu3 }
0x119a   :  { %v2394_v30 = vmul.f32 0.35355338, %v2388_v49 }
0x119c   :  { %v2396_v6 = vadd.f32 %v2394_v30, %v3614_v0  ;;  %v2553_v30 = vld [vmem:[%s4624_s3 + $0x248] sm:$0xff] }
0x119e   :  { %v2398_v23 = vsel %vm202_vm6, %v2396_v6, -inf }
0x119f   :  { %2399 = vmax.xlane.f32.xlu0 %v2398_v23  ;;  %v2683_v23 = vld [vmem:[%s4624_s3 + $0x298] sm:$0xff] }
0x11a1   :  { %v2391_v42 = vpop.f32.mrf.mxu3 }
0x11a2   :  { %v2395_v46 = vmul.f32 0.35355338, %v2391_v42 }
0x11a4   :  { %v2397_v47 = vadd.f32 %v2395_v46, %v3599_v55 }
0x11a6   :  { %v2401_v48 = vsel %vm202_vm6, %v2397_v47, -inf }
0x11b3   :  { %2656 = vperm.xlu0 %3315, %v2554_v34  }
0x11bb   :  { %2711 = vperm.xlu0 %3315, %v2681_v24  }
0x11c3   :  { %2696 = vperm.xlu0 %3315, %v2678_v26  }
0x11cb   :  { %2886 = vperm.xlu0 %3315, %v2868_v29  }
0x11d3   :  { %2871 = vperm.xlu0 %3315, %v2865_v35  }
0x11db   :  { %3018 = vperm.xlu0 %3315, %v2936_v38  }
0x11e3   :  { %3037 = vperm.xlu0 %3315, %v2939_v56   ;;  %v2680_v56 = vld [vmem:[%s4624_s3 + $0x280] sm:$0xff] }
0x11e4   :  { %v2246_v13 = vpop.f32.mrf.mxu1 }
0x11e5   :  { %v2252_v61 = vmul.f32 0.35355338, %v2246_v13 }
0x11e7   :  { %v2254_v5 = vadd.f32 %v2252_v61, %v3614_v0 }
0x11e9   :  { %v2256_v40 = vsel %vm202_vm6, %v2254_v5, -inf }
0x11ea   :  { %2257 = vmax.xlane.f32.xlu2 %v2256_v40 }
0x11ec   :  { %v2249_v41 = vpop.f32.mrf.mxu1 }
0x11ed   :  { %v2253_v45 = vmul.f32 0.35355338, %v2249_v41 }
0x11ef   :  { %v2255_v4 = vadd.f32 %v2253_v45, %v3599_v55 }
0x11f1   :  { %v2259_v14 = vsel %vm202_vm6, %v2255_v4, -inf }
0x11f2   :  { %2260 = vmax.xlane.f32.xlu2 %v2259_v14  ;;  %v2677_v14 = vld [vmem:[%s4624_s3 + $0x268] sm:$0xff] }
0x11fa   :  { %2402 = vmax.xlane.f32.xlu2 %v2401_v48 }
0x1212   :  { %v2400_v0 = vpop.xlane.xlu0 %2399 }
0x1213   :  { %v2404_v51 = vsub.f32 %v2396_v6, %v2400_v0 }
0x1215   :  { %v2406_v28 = vmul.f32 1.442695, %v2404_v51 }
0x125d   :  { %v2258_v20 = vpop.xlane.xlu2 %2257 }
0x125e   :  { %v2262_v59 = vsub.f32 %v2254_v5, %v2258_v20 }
0x1260   :  { %v2264_v55 = vmul.f32 1.442695, %v2262_v59 }
0x1265   :  { %v2261_v43 = vpop.xlane.xlu2 %2260 }
0x1266   :  { %v2263_v39 = vsub.f32 %v2255_v4, %v2261_v43 }
0x1268   :  { %v2266_v62 = vmul.f32 1.442695, %v2263_v39 }
0x126d   :  { %v2403_v36 = vpop.xlane.xlu2 %2402 }
0x126e   :  { %v2405_v50 = vsub.f32 %v2397_v47, %v2403_v36 }
0x1270   :  { %v2408_v52 = vmul.f32 1.442695, %v2405_v50 }
0x1272   :  { %3390 = vpow2.f32 %v2408_v52 }
0x1273   :  { %3392 = vpow2.f32 %v2406_v28 }
0x1274   :  { %3394 = vpow2.f32 %v2264_v55 }
0x1275   :  { %3396 = vpow2.f32 %v2266_v62 }
0x1278   :  { %v4315_v58 = vpop.eup %3390 }
0x1279   :  { %v2413_v60 = vsel %vm202_vm6, %v4315_v58, 0.0  ;;  %v4319_v37 = vpop.eup %3392 }
0x127a   :  { %2414 = vadd.xlane.f32.xlu2 %v2413_v60  ;;  %v2410_v18 = vsel %vm202_vm6, %v4319_v37, 0.0  ;;  %v4323_v63 = vpop.eup %3394 }
0x127b   :  { %v2268_v21 = vsel %vm202_vm6, %v4323_v63, 0.0  ;;  %v4327_v1 = vpop.eup %3396 }
0x127c   :  { %v2271_v33 = vsel %vm202_vm6, %v4327_v1, 0.0 }
0x1282   :  { %2411 = vadd.xlane.f32.xlu2 %v2410_v18 }
0x128a   :  { %2269 = vadd.xlane.f32.xlu2 %v2268_v21 }
0x1292   :  { %2272 = vadd.xlane.f32.xlu2 %v2271_v33 }
0x12aa   :  { %1810 = vperm.xlu2 %3317, %v1756_v8  }
0x12b2   :  { %2500 = vperm.xlu2 %3317, %v2482_v9  }
0x12ba   :  { %2495 = vperm.xlu2 %3317, %v2481_v11  }
0x12c2   :  { %2490 = vperm.xlu2 %3317, %v2480_v44  }
0x12ca   :  { %2485 = vperm.xlu2 %3317, %v2479_v53  }
0x12d2   :  { %2637 = vperm.xlu2 %3317, %v2551_v15   ;;  %v2867_v15 = vld [vmem:[%s4624_s3 + $0x2b0] sm:$0xff] }
0x12da   :  { %2632 = vperm.xlu2 %3317, %v2550_v19  }
0x12e2   :  { %2661 = vperm.xlu2 %3317, %v2555_v10  }
0x12ea   :  { %2627 = vperm.xlu2 %3317, %v2549_v17   ;;  %v1901_v17 = vpop.f32.mrf.mxu2 }
0x12ed   :  { %v4358_v22 = vpop.xlane.xlu2 %2414 }
0x12ee   :  { %3398 = vrcp.f32 %v4358_v22  ;;  %vm2436_vm0 = vweird.f32 %v4358_v22  ;;  %v2442_v52 = vand.u32 2147483648, %v4358_v22  ;;  %v2440_v55 = vand.u32 2147483647, %v4358_v22 }
0x12f0   :  { %v2443_v11 = vor.u32 1.1754944e-38, %v2442_v52  ;;  %vm2441_vm15 = vcmp.eq.f32.partialorder %v2440_v55, 8.507059e+37 }
0x12f2   :  { %2622 = vperm.xlu2 %3317, %v2548_v12  }
0x12f4   :  { %v4372_v34 = vpop.eup %3398 }
0x12f5   :  { %v4363_v49 = vpop.xlane.xlu2 %2411  ;;  %v2432_v26 = vmul.f32 %v4372_v34, %v4358_v22  ;;  %vm2437_vm11 = vweird.f32 %v4372_v34 }
0x12f6   :  { %vm4391_vm3 = vmor %vm2436_vm0, %vm2437_vm11  ;;  %v2427_v44 = vand.u32 2147483648, %v4363_v49  ;;  %vm2421_vm11 = vweird.f32 %v4363_v49  ;;  %v2425_v19 = vand.u32 2147483647, %v4363_v49 }
0x12f7   :  { %v2433_v13 = vsub.f32 1.0, %v2432_v26 }
0x12f9   :  { %v2434_v41 = vmul.f32 %v4372_v34, %v2433_v13  ;;  %v2475_v13 = vld [vmem:[%s4625_s2 + $0x140] sm:$0xff] }
0x12fa   :  { %2651 = vperm.xlu2 %3317, %v2553_v30   ;;  %v2428_v30 = vor.u32 1.1754944e-38, %v2427_v44 }
0x12fb   :  { %v2435_v47 = vadd.f32 %v4372_v34, %v2434_v41 }
0x12fd   :  { %v2270_v6 = vpop.xlane.xlu2 %2269  ;;  %v2439_v18 = vsel %vm4391_vm3, %v4372_v34, %v2435_v47 }
0x12fe   :  { %3400 = vrcp.f32 %v2270_v6  ;;  %vm2279_vm4 = vweird.f32 %v2270_v6  ;;  %v2285_v51 = vand.u32 2147483648, %v2270_v6  ;;  %v2283_v59 = vand.u32 2147483647, %v2270_v6 }
0x12ff   :  { %3402 = vrcp.f32 %v4363_v49  ;;  %v2444_v22 = vsel %vm2441_vm15, %v2443_v11, %v2439_v18 }
0x1300   :  { %v2286_v8 = vor.u32 1.1754944e-38, %v2285_v51  ;;  %vm2284_vm14 = vcmp.eq.f32.partialorder %v2283_v59, 8.507059e+37 }
0x1302   :  { %2721 = vperm.xlu2 %3317, %v2683_v23   ;;  %v2445_v23 = vmul.f32 %v4315_v58, %v2444_v22 }
0x1304   :  { %v3401_v24 = vpop.eup %3400 }
0x1305   :  { %v2275_v29 = vmul.f32 %v3401_v24, %v2270_v6  ;;  %v2273_v35 = vpop.xlane.xlu2 %2272  ;;  %v4377_v38 = vpop.eup %3402  ;;  %vm2280_vm1 = vweird.f32 %v3401_v24 }
0x1306   :  { %3404 = vrcp.f32 %v2273_v35  ;;  %v2417_v5 = vmul.f32 %v4377_v38, %v4363_v49  ;;  %v2300_v48 = vand.u32 2147483648, %v2273_v35  ;;  %v2298_v0 = vand.u32 2147483647, %v2273_v35  ;;  %vm4397_vm8 = vmor %vm2279_vm4, %vm2280_vm1 }
0x1307   :  { %v2276_v61 = vsub.f32 1.0, %v2275_v29  ;;  %vm2294_vm9 = vweird.f32 %v2273_v35  ;;  %vm2422_vm13 = vweird.f32 %v4377_v38  ;;  %vm2426_vm1 = vcmp.eq.f32.partialorder %v2425_v19, 8.507059e+37  ;;  %v1816_v29 = vpop.permute.xlu1 %1815 }
0x1308   :  { %v2418_v4 = vsub.f32 1.0, %v2417_v5  ;;  %v2301_v39 = vor.u32 1.1754944e-38, %v2300_v48  ;;  %vm2299_vm12 = vcmp.eq.f32.partialorder %v2298_v0, 8.507059e+37  ;;  %vm2423_vm0 = vmor %vm2421_vm11, %vm2422_vm13  ;;  %v2477_v5 = vld [vmem:[%s4625_s2 + $0x150] sm:$0xff] }
0x1309   :  { %v2277_v42 = vmul.f32 %v3401_v24, %v2276_v61  ;;  %v2476_v61 = vld [vmem:[%s4625_s2 + $0x148] sm:$0xff] }
0x130a   :  { %2706 = vperm.xlu2 %3317, %v2680_v56   ;;  %v2419_v50 = vmul.f32 %v4377_v38, %v2418_v4 }
0x130b   :  { %v2278_v20 = vadd.f32 %v3401_v24, %v2277_v42 }
0x130c   :  { %v3405_v40 = vpop.eup %3404  ;;  %v2420_v33 = vadd.f32 %v4377_v38, %v2419_v50 }
0x130d   :  { %v2290_v45 = vmul.f32 %v3405_v40, %v2273_v35  ;;  %vm2295_vm2 = vweird.f32 %v3405_v40  ;;  %v2282_v21 = vsel %vm4397_vm8, %v3401_v24, %v2278_v20  ;;  %v2937_v24 = vld [vmem:[%s4624_s3 + $0x2d8] sm:$0xff]  ;;  %v2940_v35 = vld [vmem:[%s4624_s3 + $0x2f0] sm:$0xff] }
0x130e   :  { %vm2296_vm10 = vmor %vm2294_vm9, %vm2295_vm2  ;;  %v2287_v10 = vsel %vm2284_vm14, %v2286_v8, %v2282_v21  ;;  %v2424_v12 = vsel %vm2423_vm0, %v4377_v38, %v2420_v33  ;;  %v2934_v38 = vld [vmem:[%s4624_s3 + $0x2c0] sm:$0xff] }
0x130f   :  { %v2291_v46 = vsub.f32 1.0, %v2290_v45  ;;  %v2288_v6 = vmul.f32 %v4323_v63, %v2287_v10  ;;  %v2429_v34 = vsel %vm2426_vm1, %v2428_v30, %v2424_v12  ;;  %v1904_v63 = vpop.f32.mrf.mxu2 }
0x1310   :  { %v2430_v26 = vmul.f32 %v4319_v37, %v2429_v34  ;;  %v1905_v58 = vadd.f32 %v1904_v63, %v1816_v29  ;;  %v2657_v63 = vpop.permute.xlu0 %2656 }
0x1311   :  { %v2292_v43 = vmul.f32 %v3405_v40, %v2291_v46 }
0x1312   :  { %2691 = vperm.xlu2 %3317, %v2677_v14  }
0x1313   :  { %v2293_v60 = vadd.f32 %v3405_v40, %v2292_v43 }
0x1315   :  { %v2297_v62 = vsel %vm2296_vm10, %v3405_v40, %v2293_v60 }
0x1316   :  { %v2302_v9 = vsel %vm2299_vm12, %v2301_v39, %v2297_v62  ;;  %vm3056_vm12 = vcmp.lt.s32.totalorder %v3460_v2, 2 }
0x1317   :  { %v2303_v53 = vmul.f32 %v4327_v1, %v2302_v9  ;;  %v1811_v1 = vpop.permute.xlu2 %1810 }
0x1318   :  { %v1902_v49 = vadd.f32 %v1901_v17, %v1811_v1 }
0x1319   :  { %3276 = vmatpush.xpose.msk.msrb.mxu0 %vm202_vm6, %v2303_v53 }
0x131a   :  { %2881 = vperm.xlu2 %3317, %v2867_v15  }
0x131d   :  { %3277 = vmatpush.xpose.msk.msrb.mxu0 %vm202_vm6, %v2288_v6 }
0x1320   :  { %3278 = vmatmul.msk.f32.vlgmr.msrb.gmra.mxu0 %vm202_vm6, %v1902_v49 }
0x1321   :  { %3281 = vmatpush.xpose.msk.msra.mxu0 %vm202_vm6, %v2445_v23 }
0x1322   :  { %3023 = vperm.xlu2 %3317, %v2937_v24  }
0x1325   :  { %3282 = vmatpush.xpose.msk.msra.mxu0 %vm202_vm6, %v2430_v26 }
0x1328   :  { %3283 = vmatmul.msk.f32.vlgmr.msra.gmra.mxu0 %vm202_vm6, %v1905_v58 }
0x132a   :  { %3042 = vperm.xlu2 %3317, %v2940_v35  }
0x1332   :  { %3008 = vperm.xlu2 %3317, %v2934_v38  }
0x139d   :  { %v2330_v56 = vpop.f32.mrf.mxu0 }
0x13a5   :  { %v2472_v37 = vpop.f32.mrf.mxu0 }
0x13a6   :  { %2527 = vmatpush.msra.mxu1 %v2472_v37 }
0x13a8   :  { %2528 = vmatpush.msra.mxu1 %v2330_v56  ;;  %v2647_v56 = vpop.permute.xlu1 %2646 }
0x13aa   :  { %2529 = vmatpush.msra.mxu1 %v4304_v7  ;;  %v2478_v7 = vld [vmem:[%s4625_s2 + $0x158] sm:$0xff] }
0x13ac   :  { %2530 = vmatpush.msra.mxu1 %v4299_v32  ;;  %v2501_v32 = vpop.permute.xlu2 %2500 }
0x13ad   :  { %3284 = vmatmul.msk.f32.vlgmr.msra.gmra.mxu1 %vm281_vm7, %v2475_v13  ;;  %v2668_v13 = vld [vmem:[%s4625_s2 + $0x160] sm:$0xff] }
0x13b4   :  { %v2496_v41 = vpop.permute.xlu2 %2495 }
0x13b5   :  { %3285 = vmatmul.msk.f32.gmra.mxu1 %vm281_vm7, %v2476_v61  ;;  %v2669_v61 = vld [vmem:[%s4625_s2 + $0x168] sm:$0xff] }
0x13bc   :  { %v2491_v4 = vpop.permute.xlu2 %2490 }
0x13bd   :  { %3286 = vmatmul.msk.f32.gmra.mxu1 %vm281_vm7, %v2477_v5  ;;  %v2670_v5 = vld [vmem:[%s4625_s2 + $0x170] sm:$0xff] }
0x13c4   :  { %v2486_v43 = vpop.permute.xlu2 %2485 }
0x13c5   :  { %3287 = vmatmul.msk.f32.gmra.mxu1 %vm281_vm7, %v2478_v7  ;;  %v2671_v7 = vld [vmem:[%s4625_s2 + $0x178] sm:$0xff] }
0x142a   :  { %v2532_v40 = vpop.f32.mrf.mxu1 }
0x142b   :  { %v2533_v0 = vadd.f32 %v2532_v40, %v2486_v43  ;;  %v2673_v40 = vld [vmem:[%s4625_s2 + $0x188] sm:$0xff]  ;;  %v2712_v43 = vpop.permute.xlu0 %2711 }
0x142d   :  { %v2544_v51 = vadd.f32 %v2533_v0, %v4123_v57  ;;  %v2638_v57 = vpop.permute.xlu2 %2637 }
0x1432   :  { %v2535_v42 = vpop.f32.mrf.mxu1 }
0x1433   :  { %v2536_v48 = vadd.f32 %v2535_v42, %v2491_v4  ;;  %v2675_v42 = vld [vmem:[%s4625_s2 + $0x198] sm:$0xff] }
0x1435   :  { %v2545_v50 = vadd.f32 %v2536_v48, %v4120_v54  ;;  %v2633_v62 = vpop.permute.xlu2 %2632  ;;  %v2717_v48 = vpop.permute.xlu1 %2716 }
0x143a   :  { %v2538_v45 = vpop.f32.mrf.mxu1 }
0x143b   :  { %v2539_v14 = vadd.f32 %v2538_v45, %v2496_v41  ;;  %v2674_v41 = vld [vmem:[%s4625_s2 + $0x190] sm:$0xff] }
0x143d   :  { %v2546_v36 = vadd.f32 %v2539_v14, %v4117_v16  ;;  %v2662_v21 = vpop.permute.xlu2 %2661 }
0x1442   :  { %v2541_v46 = vpop.f32.mrf.mxu1 }
0x1443   :  { %v2542_v47 = vadd.f32 %v2541_v46, %v2501_v32  ;;  %v2672_v32 = vld [vmem:[%s4625_s2 + $0x180] sm:$0xff] }
0x1445   :  { %v2547_v20 = vadd.f32 %v2542_v47, %v4114_v31  ;;  %v2628_v11 = vpop.permute.xlu2 %2627 }
0x1447   :  { %2568 = vmatpush.msrb.mxu0 %v2547_v20 }
0x1449   :  { %2569 = vmatpush.msrb.mxu0 %v2546_v36 }
0x144b   :  { %2570 = vmatpush.msrb.mxu0 %v2545_v50 }
0x144d   :  { %2571 = vmatpush.msrb.mxu0 %v2544_v51  ;;  %v2623_v17 = vpop.permute.xlu2 %2622 }
0x144e   :  { %3288 = vmatmul.msk.f32.vlgmr.msrb.gmra.mxu0 %vm281_vm7, %v3430_v25 }
0x1455   :  { %v2652_v35 = vpop.permute.xlu2 %2651 }
0x145d   :  { %v2722_v47 = vpop.permute.xlu2 %2721 }
0x1465   :  { %v2707_v0 = vpop.permute.xlu2 %2706 }
0x14cb   :  { %v2573_v52 = vpop.f32.mrf.mxu0 }
0x14cc   :  { %v2576_v28 = vperm.slane %v2573_v52, 0 }
0x14ce   :  { %v2580_v59 = vsub.f32 %v2547_v20, %v2576_v28  ;;  %v2579_v60 = vsub.f32 %v2546_v36, %v2576_v28  ;;  %v2578_v55 = vsub.f32 %v2545_v50, %v2576_v28  ;;  %v2577_v16 = vsub.f32 %v2544_v51, %v2576_v28  ;;  %v2702_v50 = vpop.permute.xlu1 %2701 }
0x14d0   :  { %v2584_v31 = vmul.f32 %v2580_v59, %v2580_v59  ;;  %v2583_v39 = vmul.f32 %v2579_v60, %v2579_v60  ;;  %v2582_v18 = vmul.f32 %v2578_v55, %v2578_v55  ;;  %v2581_v54 = vmul.f32 %v2577_v16, %v2577_v16 }
0x14d2   :  { %2597 = vmatpush.msrb.mxu3 %v2584_v31 }
0x14d4   :  { %2598 = vmatpush.msrb.mxu3 %v2583_v39 }
0x14d6   :  { %2599 = vmatpush.msrb.mxu3 %v2582_v18  ;;  %v2692_v18 = vpop.permute.xlu2 %2691 }
0x14d8   :  { %2600 = vmatpush.msrb.mxu3 %v2581_v54 }
0x14d9   :  { %3289 = vmatmul.msk.f32.vlgmr.msrb.gmra.mxu3 %vm281_vm7, %v3430_v25 }
0x155c   :  { %v2602_v33 = vpop.f32.mrf.mxu3 }
0x155d   :  { %v2603_v8 = vadd.f32 1e-12, %v2602_v33  ;;  %v2687_v33 = vpop.permute.xlu1 %2686 }
0x155f   :  { %3406 = vrsqrt.f32 %v2603_v8  ;;  %vm2611_vm3 = vweird.f32 %v2603_v8 }
0x1565   :  { %v3407_v9 = vpop.eup %3406 }
0x1566   :  { %v2606_v44 = vmul.f32 %v3407_v9, %v2603_v8  ;;  %vm2612_vm2 = vweird.f32 %v3407_v9 }
0x1567   :  { %vm2613_vm4 = vmor %vm2611_vm3, %vm2612_vm2 }
0x1568   :  { %v2607_v53 = vmul.f32 %v3407_v9, %v2606_v44 }
0x156a   :  { %v2608_v15 = vmul.f32 0.5, %v2607_v53 }
0x156c   :  { %v2609_v19 = vsub.f32 1.5, %v2608_v15 }
0x156e   :  { %v2610_v10 = vmul.f32 %v3407_v9, %v2609_v19 }
0x1570   :  { %v2614_v22 = vsel %vm2613_vm4, %v3407_v9, %v2610_v10 }
0x1571   :  { %v2615_v12 = vperm.slane %v2614_v22, 0 }
0x1573   :  { %v2619_v30 = vmul.f32 %v2615_v12, %v2580_v59  ;;  %v2618_v1 = vmul.f32 %v2615_v12, %v2579_v60  ;;  %v2617_v6 = vmul.f32 %v2615_v12, %v2578_v55  ;;  %v2616_v49 = vmul.f32 %v2615_v12, %v2577_v16  ;;  %v2697_v60 = vpop.permute.xlu0 %2696 }
0x1575   :  { %v2643_v23 = vmul.f32 %v2638_v57, %v2619_v30  ;;  %v2642_v34 = vmul.f32 %v2633_v62, %v2618_v1  ;;  %v2641_v26 = vmul.f32 %v2628_v11, %v2617_v6  ;;  %v2640_v58 = vmul.f32 %v2623_v17, %v2616_v49 }
0x1577   :  { %v4461_v24 = vadd.f32 %v2662_v21, %v2643_v23  ;;  %v4464_v29 = vadd.f32 %v2657_v63, %v2642_v34  ;;  %v4467_v38 = vadd.f32 %v2652_v35, %v2641_v26  ;;  %v4470_v37 = vadd.f32 %v2647_v56, %v2640_v58 }
0x1579   :  { %2760 = vmatpush.msra.mxu0 %v4461_v24 }
0x157b   :  { %2761 = vmatpush.msra.mxu0 %v4464_v29 }
0x157d   :  { %2762 = vmatpush.msra.mxu0 %v4467_v38 }
0x157f   :  { %2763 = vmatpush.msra.mxu0 %v4470_v37 }
0x1580   :  { %3290 = vmatmul.msk.f32.vlgmr.msra.gmra.mxu0 %vm281_vm7, %v2668_v13 }
0x1588   :  { %3291 = vmatmul.msk.f32.gmra.mxu0 %vm281_vm7, %v2669_v61 }
0x1590   :  { %3292 = vmatmul.msk.f32.gmra.mxu0 %vm281_vm7, %v2670_v5 }
0x1598   :  { %3293 = vmatmul.msk.f32.gmra.mxu0 %vm281_vm7, %v2671_v7 }
0x15a0   :  { %3294 = vmatmul.msk.f32.gmra.mxu0 %vm281_vm7, %v2672_v32 }
0x15a8   :  { %3295 = vmatmul.msk.f32.gmra.mxu0 %vm281_vm7, %v2673_v40 }
0x15b0   :  { %3296 = vmatmul.msk.f32.gmra.mxu0 %vm281_vm7, %v2674_v41 }
0x15b8   :  { %3297 = vmatmul.msk.f32.gmra.mxu0 %vm281_vm7, %v2675_v42 }
0x15fd   :  { %v2765_v45 = vpop.f32.mrf.mxu0 }
0x15fe   :  { %v4527_v9 = vadd.f32 %v2765_v45, %v2687_v33 }
0x1600   :  { %v2789_v12 = vmul.f32 %v4527_v9, %v4527_v9 }
0x1602   :  { %v2797_v58 = vmul.f32 %v2789_v12, %v4527_v9 }
0x1604   :  { %v2805_v41 = vmul.f32 0.044715, %v2797_v58 }
0x1605   :  { %v2768_v4 = vpop.f32.mrf.mxu0 }
0x1606   :  { %v4519_v54 = vadd.f32 %v2768_v4, %v2692_v18 }
0x1608   :  { %v2790_v53 = vmul.f32 %v4519_v54, %v4519_v54 }
0x160a   :  { %v2798_v23 = vmul.f32 %v2790_v53, %v4519_v54 }
0x160c   :  { %v2806_v61 = vmul.f32 0.044715, %v2798_v23 }
0x160d   :  { %v2771_v46 = vpop.f32.mrf.mxu0 }
0x160e   :  { %v4515_v39 = vadd.f32 %v2771_v46, %v2697_v60  ;;  %v2814_v4 = vadd.f32 %v2806_v61, %v4519_v54 }
0x1610   :  { %v2791_v11 = vmul.f32 %v4515_v39, %v4515_v39 }
0x1612   :  { %v2799_v30 = vmul.f32 %v2791_v11, %v4515_v39 }
0x1614   :  { %v2807_v35 = vmul.f32 0.044715, %v2799_v30 }
0x1615   :  { %v2774_v14 = vpop.f32.mrf.mxu0 }
0x1616   :  { %v4509_v28 = vadd.f32 %v2774_v14, %v2702_v50  ;;  %v2815_v42 = vadd.f32 %v2807_v35, %v4515_v39 }
0x1618   :  { %v2792_v57 = vmul.f32 %v4509_v28, %v4509_v28 }
0x161a   :  { %v2800_v15 = vmul.f32 %v2792_v57, %v4509_v28 }
0x161c   :  { %v2808_v34 = vmul.f32 0.044715, %v2800_v15 }
0x161d   :  { %v2777_v20 = vpop.f32.mrf.mxu0 }
0x161e   :  { %v4507_v52 = vadd.f32 %v2777_v20, %v2707_v0  ;;  %v2816_v5 = vadd.f32 %v2808_v34, %v4509_v28 }
0x1620   :  { %v2793_v31 = vmul.f32 %v4507_v52, %v4507_v52  ;;  %v2824_v14 = vmul.f32 0.7978846, %v2816_v5 }
0x1622   :  { %v2801_v8 = vmul.f32 %v2793_v31, %v4507_v52 }
0x1624   :  { %v2809_v17 = vmul.f32 0.044715, %v2801_v8 }
0x1625   :  { %v2780_v36 = vpop.f32.mrf.mxu0 }
0x1626   :  { %v4505_v51 = vadd.f32 %v2780_v36, %v2712_v43  ;;  %v2817_v63 = vadd.f32 %v2809_v17, %v4507_v52  ;;  %v2822_v43 = vmul.f32 0.7978846, %v2814_v4 }
0x1628   :  { %v2794_v59 = vmul.f32 %v4505_v51, %v4505_v51  ;;  %v2825_v40 = vmul.f32 0.7978846, %v2817_v63 }
0x162a   :  { %v2802_v62 = vmul.f32 %v2794_v59, %v4505_v51 }
0x162c   :  { %v2810_v19 = vmul.f32 0.044715, %v2802_v62 }
0x162d   :  { %v2783_v55 = vpop.f32.mrf.mxu0 }
0x162e   :  { %v4517_v16 = vadd.f32 %v2783_v55, %v2717_v48  ;;  %v2818_v49 = vadd.f32 %v2810_v19, %v4505_v51  ;;  %v2823_v48 = vmul.f32 0.7978846, %v2815_v42 }
0x1630   :  { %v2795_v21 = vmul.f32 %v4517_v16, %v4517_v16  ;;  %v2826_v32 = vmul.f32 0.7978846, %v2818_v49 }
0x1632   :  { %v2803_v44 = vmul.f32 %v2795_v21, %v4517_v16 }
0x1634   :  { %v2811_v10 = vmul.f32 0.044715, %v2803_v44 }
0x1635   :  { %v2786_v22 = vpop.f32.mrf.mxu0 }
0x1636   :  { %v2819_v1 = vadd.f32 %v2811_v10, %v4517_v16  ;;  %v2787_v6 = vadd.f32 %v2786_v22, %v2722_v47  ;;  %v2813_v47 = vadd.f32 %v2805_v41, %v4527_v9 }
0x1638   :  { %v2796_v26 = vmul.f32 %v2787_v6, %v2787_v6  ;;  %v2827_v13 = vmul.f32 0.7978846, %v2819_v1  ;;  %v2821_v36 = vmul.f32 0.7978846, %v2813_v47 }
0x163a   :  { %v2804_v56 = vmul.f32 %v2796_v26, %v2787_v6  ;;  %3408 = vtanh.f32 %v2827_v13  ;;  %v2882_v13 = vpop.permute.xlu2 %2881 }
0x163b   :  { %3410 = vtanh.f32 %v2826_v32  ;;  %v2877_v32 = vpop.permute.xlu1 %2876 }
0x163c   :  { %v2812_v7 = vmul.f32 0.044715, %v2804_v56  ;;  %3412 = vtanh.f32 %v2825_v40  ;;  %v2887_v56 = vpop.permute.xlu0 %2886 }
0x163e   :  { %v2820_v45 = vadd.f32 %v2812_v7, %v2787_v6 }
0x1640   :  { %v2828_v46 = vmul.f32 0.7978846, %v2820_v45  ;;  %v3409_v20 = vpop.eup %3408 }
0x1641   :  { %v3411_v0 = vpop.eup %3410  ;;  %v2843_v59 = vadd.f32 1.0, %v3409_v20 }
0x1642   :  { %3414 = vtanh.f32 %v2828_v46  ;;  %v3413_v50 = vpop.eup %3412  ;;  %v2842_v55 = vadd.f32 1.0, %v3411_v0 }
0x1643   :  { %3416 = vtanh.f32 %v2824_v14  ;;  %v2851_v62 = vmul.f32 0.5, %v2843_v59  ;;  %v2841_v21 = vadd.f32 1.0, %v3413_v50 }
0x1644   :  { %3418 = vtanh.f32 %v2823_v48  ;;  %v2850_v11 = vmul.f32 0.5, %v2842_v55  ;;  %v2872_v42 = vpop.permute.xlu0 %2871 }
0x1645   :  { %3420 = vtanh.f32 %v2822_v43  ;;  %v2859_v15 = vmul.f32 %v2851_v62, %v4517_v16  ;;  %v2849_v19 = vmul.f32 0.5, %v2841_v21  ;;  %v3024_v62 = vpop.permute.xlu2 %3023 }
0x1646   :  { %3422 = vtanh.f32 %v2821_v36  ;;  %v2858_v22 = vmul.f32 %v2850_v11, %v4505_v51  ;;  %v3048_v11 = vpop.permute.xlu1 %3047 }
0x1647   :  { %v2857_v1 = vmul.f32 %v2849_v19, %v4507_v52  ;;  %v2861_v52 = vld [vmem:[%s4625_s2 + $0x1a0] sm:$0xff] }
0x1648   :  { %v3415_v60 = vpop.eup %3414 }
0x1649   :  { %v2844_v31 = vadd.f32 1.0, %v3415_v60  ;;  %v3417_v18 = vpop.eup %3416 }
0x164a   :  { %v3419_v33 = vpop.eup %3418  ;;  %v2840_v44 = vadd.f32 1.0, %v3417_v18  ;;  %v3097_v18 = vld [vmem:[%s4625_s2 + $0x1d8] sm:$0xff] }
0x164b   :  { %v2852_v57 = vmul.f32 0.5, %v2844_v31  ;;  %v3421_v53 = vpop.eup %3420  ;;  %v2839_v10 = vadd.f32 1.0, %v3419_v33 }
0x164c   :  { %v3423_v17 = vpop.eup %3422  ;;  %v2848_v12 = vmul.f32 0.5, %v2840_v44  ;;  %v2838_v30 = vadd.f32 1.0, %v3421_v53 }
0x164d   :  { %v2860_v8 = vmul.f32 %v2852_v57, %v2787_v6  ;;  %v2847_v23 = vmul.f32 0.5, %v2839_v10  ;;  %v2837_v34 = vadd.f32 1.0, %v3423_v17  ;;  %v3096_v57 = vld [vmem:[%s4625_s2 + $0x1d0] sm:$0xff]  ;;  %v3019_v17 = vpop.permute.xlu0 %3018 }
0x164e   :  { %v2856_v6 = vmul.f32 %v2848_v12, %v4509_v28  ;;  %v2846_v49 = vmul.f32 0.5, %v2838_v30  ;;  %v2862_v28 = vld [vmem:[%s4625_s2 + $0x1a8] sm:$0xff] }
0x164f   :  { %2909 = vmatpush.msra.mxu3 %v2860_v8  ;;  %v2855_v16 = vmul.f32 %v2847_v23, %v4515_v39  ;;  %v2845_v26 = vmul.f32 0.5, %v2837_v34  ;;  %v2863_v39 = vld [vmem:[%s4625_s2 + $0x1b0] sm:$0xff]  ;;  %v3094_v8 = vld [vmem:[%s4625_s2 + $0x1c0] sm:$0xff]  ;;  %v3014_v34 = vpop.permute.xlu1 %3013 }
0x1650   :  { %v2854_v63 = vmul.f32 %v2846_v49, %v4519_v54  ;;  %v2864_v54 = vld [vmem:[%s4625_s2 + $0x1b8] sm:$0xff] }
0x1651   :  { %2910 = vmatpush.msra.mxu3 %v2859_v15  ;;  %v2853_v51 = vmul.f32 %v2845_v26, %v4527_v9  ;;  %v3054_v26 = vmul.u32 8, %v3460_v2  ;;  %v3125_v2 = vld [vmem:[%s4625_s2 + $0x1e8] sm:$0xff] }
0x1653   :  { %2911 = vmatpush.msra.mxu3 %v2858_v22  ;;  %v3043_v22 = vpop.permute.xlu2 %3042  ;;  %vm3055_vm10 = vcmp.eq.s32.totalorder %v3462_v3, %v3054_v26  ;;  %v3126_v3 = vld [vmem:[%s4625_s2 + $0x1f0] sm:$0xff] }
0x1654   :  { %vm3057_vm13 = vmand %vm3055_vm10, %vm3056_vm12 }
0x1655   :  { %2912 = vmatpush.msra.mxu3 %v2857_v1 }
0x1657   :  { %2913 = vmatpush.msra.mxu3 %v2856_v6 }
0x1659   :  { %2914 = vmatpush.msra.mxu3 %v2855_v16 }
0x165b   :  { %2915 = vmatpush.msra.mxu3 %v2854_v63  ;;  %v3038_v63 = vpop.permute.xlu0 %3037 }
0x165d   :  { %2916 = vmatpush.msra.mxu3 %v2853_v51  ;;  %v3009_v51 = vpop.permute.xlu2 %3008 }
0x165e   :  { %3298 = vmatmul.msk.f32.vlgmr.msra.gmra.mxu3 %vm1568_vm5, %v2861_v52 }
0x1666   :  { %3299 = vmatmul.msk.f32.gmra.mxu3 %vm1568_vm5, %v2862_v28 }
0x166e   :  { %3300 = vmatmul.msk.f32.gmra.mxu3 %vm1568_vm5, %v2863_v39  ;;  %v3033_v39 = vpop.permute.xlu1 %3032 }
0x1676   :  { %3301 = vmatmul.msk.f32.gmra.mxu3 %vm1568_vm5, %v2864_v54 }
0x16e1   :  { %v2918_v9 = vpop.f32.mrf.mxu3 }
0x16e2   :  { %v2919_v45 = vadd.f32 %v2918_v9, %v2872_v42  ;;  %v3058_v9 = vsel %vm3057_vm13, 1.0, %v3428_v27  ;;  %v3124_v27 = vld [vmem:[%s4625_s2 + $0x1e0] sm:$0xff] }
0x16e4   :  { %v2930_v14 = vadd.f32 %v2919_v45, %v4470_v37 }
0x16e9   :  { %v2921_v58 = vpop.f32.mrf.mxu3 }
0x16ea   :  { %v2922_v40 = vadd.f32 %v2921_v58, %v2877_v32  ;;  %v3127_v58 = vld [vmem:[%s4625_s2 + $0x1f8] sm:$0xff] }
0x16eb   :  { %3145 = vmatpush.msrb.mxu3 %v3127_v58 }
0x16ec   :  { %v2931_v46 = vadd.f32 %v2922_v40, %v4467_v38 }
0x16ed   :  { %3146 = vmatpush.msrb.mxu3 %v3126_v3 }
0x16ef   :  { %3147 = vmatpush.msrb.mxu3 %v3125_v2 }
0x16f1   :  { %v2924_v35 = vpop.f32.mrf.mxu3  ;;  %3148 = vmatpush.msrb.mxu3 %v3124_v27 }
0x16f2   :  { %v2925_v5 = vadd.f32 %v2924_v35, %v2882_v13 }
0x16f4   :  { %v2932_v4 = vadd.f32 %v2925_v5, %v4464_v29 }
0x16f9   :  { %v2927_v61 = vpop.f32.mrf.mxu3 }
0x16fa   :  { %v2928_v7 = vadd.f32 %v2927_v61, %v2887_v56  ;;  %v3318_v56 = vld [vmem:[%s4625_s2 + $0x200] ss:$0 sm:$0xff] }
0x16fc   :  { %v2933_v41 = vadd.f32 %v2928_v7, %v4461_v24  ;;  %v3319_v7 = vld [vmem:[%s4625_s2 + $0x208] ss:$0 sm:$0xff] }
0x16fe   :  { %2954 = vmatpush.msrb.mxu1 %v2933_v41 }
0x1700   :  { %2955 = vmatpush.msrb.mxu1 %v2932_v4 }
0x1702   :  { %2956 = vmatpush.msrb.mxu1 %v2931_v46 }
0x1704   :  { %2957 = vmatpush.msrb.mxu1 %v2930_v14 }
0x1705   :  { %3302 = vmatmul.msk.f32.vlgmr.msrb.gmra.mxu1 %vm281_vm7, %v3430_v25 }
0x1782   :  { %v2959_v47 = vpop.f32.mrf.mxu1 }
0x1783   :  { %v2962_v48 = vperm.slane %v2959_v47, 0 }
0x1785   :  { %v2966_v20 = vsub.f32 %v2933_v41, %v2962_v48  ;;  %v2965_v43 = vsub.f32 %v2932_v4, %v2962_v48  ;;  %v2964_v0 = vsub.f32 %v2931_v46, %v2962_v48  ;;  %v2963_v29 = vsub.f32 %v2930_v14, %v2962_v48 }
0x1787   :  { %v2970_v24 = vmul.f32 %v2966_v20, %v2966_v20  ;;  %v2969_v36 = vmul.f32 %v2965_v43, %v2965_v43  ;;  %v2968_v50 = vmul.f32 %v2964_v0, %v2964_v0  ;;  %v2967_v38 = vmul.f32 %v2963_v29, %v2963_v29 }
0x1789   :  { %2983 = vmatpush.msra.mxu1 %v2970_v24 }
0x178b   :  { %2984 = vmatpush.msra.mxu1 %v2969_v36 }
0x178d   :  { %2985 = vmatpush.msra.mxu1 %v2968_v50 }
0x178f   :  { %2986 = vmatpush.msra.mxu1 %v2967_v38 }
0x1790   :  { %3303 = vmatmul.msk.f32.vlgmr.msra.gmra.mxu1 %vm281_vm7, %v3430_v25  ;;  %v3095_v25 = vld [vmem:[%s4625_s2 + $0x1c8] sm:$0xff] }
0x1791   :  { %3115 = vmatpush.msrb.mxu1 %v3097_v18 }
0x1793   :  { %3116 = vmatpush.msrb.mxu1 %v3096_v57 }
0x1795   :  { %3117 = vmatpush.msrb.mxu1 %v3095_v25 }
0x1797   :  { %3118 = vmatpush.msrb.mxu1 %v3094_v8 }
0x180d   :  { %v2988_v37 = vpop.f32.mrf.mxu1 }
0x180e   :  { %v2989_v59 = vadd.f32 1e-12, %v2988_v37 }
0x1810   :  { %3424 = vrsqrt.f32 %v2989_v59  ;;  %vm2997_vm8 = vweird.f32 %v2989_v59 }
0x1816   :  { %v3425_v60 = vpop.eup %3424 }
0x1817   :  { %v2992_v31 = vmul.f32 %v3425_v60, %v2989_v59  ;;  %vm2998_vm5 = vweird.f32 %v3425_v60 }
0x1818   :  { %vm2999_vm9 = vmor %vm2997_vm8, %vm2998_vm5 }
0x1819   :  { %v2993_v55 = vmul.f32 %v3425_v60, %v2992_v31 }
0x181b   :  { %v2994_v21 = vmul.f32 0.5, %v2993_v55 }
0x181d   :  { %v2995_v33 = vsub.f32 1.5, %v2994_v21 }
0x181f   :  { %v2996_v44 = vmul.f32 %v3425_v60, %v2995_v33 }
0x1821   :  { %v3000_v53 = vsel %vm2999_vm9, %v3425_v60, %v2996_v44 }
0x1822   :  { %v3001_v15 = vperm.slane %v3000_v53, 0 }
0x1824   :  { %v3005_v19 = vmul.f32 %v3001_v15, %v2966_v20  ;;  %v3004_v10 = vmul.f32 %v3001_v15, %v2965_v43  ;;  %v3003_v23 = vmul.f32 %v3001_v15, %v2964_v0  ;;  %v3002_v16 = vmul.f32 %v3001_v15, %v2963_v29 }
0x1826   :  { %v3029_v12 = vmul.f32 %v3024_v62, %v3005_v19  ;;  %v3028_v1 = vmul.f32 %v3019_v17, %v3004_v10  ;;  %v3027_v49 = vmul.f32 %v3014_v34, %v3003_v23  ;;  %v3026_v28 = vmul.f32 %v3009_v51, %v3002_v16 }
0x1828   :  { %v3053_v30 = vadd.f32 %v3048_v11, %v3029_v12  ;;  %v3052_v6 = vadd.f32 %v3043_v22, %v3028_v1  ;;  %v3051_v52 = vadd.f32 %v3038_v63, %v3027_v49  ;;  %v3050_v54 = vadd.f32 %v3033_v39, %v3026_v28 }
0x182a   :  { %3304 = vmatpush.xpose.msk.msrb.mxu2 %vm202_vm6, %v3053_v30 }
0x182e   :  { %3305 = vmatpush.xpose.msk.msrb.mxu2 %vm202_vm6, %v3052_v6 }
0x1832   :  { %3306 = vmatpush.xpose.msk.msrb.mxu2 %vm202_vm6, %v3051_v52 }
0x1836   :  { %3307 = vmatpush.xpose.msk.msrb.mxu2 %vm202_vm6, %v3050_v54 }
0x1839   :  { %3308 = vmatmul.msk.f32.vlgmr.msrb.gmra.mxu2 %vm202_vm6, %v3058_v9 }
0x18bc   :  { %v3091_v35 = vpop.f32.mrf.mxu2 }
0x18bd   :  { %3309 = vmatmul.msk.f32.vlgmr.msrb.gmra.mxu1 %vm281_vm7, %v3091_v35 }
0x193a   :  { %v3120_v13 = vpop.f32.mrf.mxu1 }
0x193b   :  { %v3121_v61 = vadd.f32 %v3318_v56, %v3120_v13 }
0x193d   :  { %3426 = vtanh.f32 %v3121_v61 }
0x1943   :  { %v3427_v5 = vpop.eup %3426 }
0x1944   :  { %3310 = vmatmul.msk.f32.vlgmr.msrb.gmra.mxu3 %vm281_vm7, %v3427_v5 }
0x19c7   :  { %v3150_v32 = vpop.f32.mrf.mxu3 }
0x19c8   :  { %v3151_v40 = vadd.f32 %v3319_v7, %v3150_v32 }
0x19ca   :  { %3153 = vst [vmem:[%s4626_s4] sm:$0xff] %v3151_v40 }

</bundles_post_ra>
